<compile_context>
chip_gen: v7x
topology: tpu7x:2x2x1
jax: 0.10.0
libtpu: 0.0.40
codegen_flags: <defaults>
</compile_context>

<pallas_src>
import numpy as np

import jax
import jax.numpy as jnp
from jax.experimental import pallas as pl
from jax.experimental.pallas import tpu as pltpu


# ----------------------------------------------------------------------------
# Fused kernel: whole LeNet forward for one batch tile.
# Activation layout inside the kernel: rows = (n, i), lanes = col*C + c.
# ----------------------------------------------------------------------------
def _lenet_kernel(x_ref, g1_ref, b1_ref, g2_ref, b2_ref,
                  wf1_ref, bf1_ref, wf2_ref, bf2_ref, wf3_ref, bf3_ref,
                  out_ref, c1e_ref, c1o_ref, s1p_ref, c2_ref, s2p_ref):
    tb = x_ref.shape[0]
    f32 = jnp.float32

    # ---- conv1: 5 banded MXU matmuls per column parity, accumulated in VMEM.
    # g1[kh, s] maps the 28 input columns -> 12 pooled output columns x 6 ch.
    for kh in range(5):
        xk = x_ref[:, pl.ds(kh, 24), :].reshape(tb * 24, 28)
        pe = jnp.dot(xk, g1_ref[kh, 0],
                     preferred_element_type=f32).reshape(tb, 24, 72)
        po = jnp.dot(xk, g1_ref[kh, 1],
                     preferred_element_type=f32).reshape(tb, 24, 72)
        if kh == 0:
            c1e_ref[...] = pe
            c1o_ref[...] = po
        else:
            c1e_ref[...] += pe
            c1o_ref[...] += po

    # ---- pool1 (2x2 max) + bias + ReLU -> (tb, 12, 72).
    # Horizontal half = parity max, vertical half = stride-2 row max, read
    # straight from the accumulators (no pre-pool buffer round-trip).
    m1 = jnp.maximum(
        jnp.maximum(c1e_ref[:, pl.ds(0, 12, 2), :],
                    c1e_ref[:, pl.ds(1, 12, 2), :]),
        jnp.maximum(c1o_ref[:, pl.ds(0, 12, 2), :],
                    c1o_ref[:, pl.ds(1, 12, 2), :]))
    s1p_ref[...] = jnp.maximum(m1 + b1_ref[...], 0.0)

    # ---- conv2: parity-merged banded matmuls, N = 64 (even) || 64 (odd) = 128.
    for kh in range(5):
        ak = s1p_ref[:, pl.ds(kh, 8), :].reshape(tb * 8, 72)
        p2 = jnp.dot(ak, g2_ref[kh],
                     preferred_element_type=f32).reshape(tb, 8, 128)
        if kh == 0:
            c2_ref[...] = p2
        else:
            c2_ref[...] += p2

    # ---- pool2 + bias + ReLU.  Vertical half: stride-2 rows; horizontal half:
    # swap the 64-lane parity halves with an XLU roll and take the max.  Both
    # halves then hold the pooled values; wf1's rows 64:128 are zero, so the
    # duplicated upper half is harmless in fc1.
    v2 = jnp.maximum(c2_ref[:, pl.ds(0, 4, 2), :],
                     c2_ref[:, pl.ds(1, 4, 2), :]).reshape(tb * 4, 128)
    h2 = jnp.maximum(v2, pltpu.roll(v2, shift=64, axis=1))
    s2p_ref[...] = jnp.maximum(h2 + b2_ref[...], 0.0).reshape(tb, 4, 128)

    # ---- fc1 (accumulated over the 4 pooled rows, torch (c,h,w) flatten order
    # folded into wf1 at pack time) + fc2 + fc3 (output padded to 128 lanes).
    acc = jnp.dot(s2p_ref[:, 0, :], wf1_ref[0], preferred_element_type=f32)
    for h in range(1, 4):
        acc = acc + jnp.dot(s2p_ref[:, h, :], wf1_ref[h],
                            preferred_element_type=f32)
    h1 = jnp.maximum(acc + bf1_ref[...], 0.0)                                  # fc1
    hm = jnp.maximum(jnp.dot(h1, wf2_ref[...], preferred_element_type=f32)
                     + bf2_ref[...], 0.0)                                      # fc2
    out = jnp.dot(hm, wf3_ref[...], preferred_element_type=f32) + bf3_ref[...]  # fc3
    out_ref[...] = out.astype(out_ref.dtype)


# ----------------------------------------------------------------------------
# Forward wrapper: one pallas_call, grid over batch tiles.
# ----------------------------------------------------------------------------
def _resident_spec(arr):
    zeros = (0,) * arr.ndim
    return pl.BlockSpec(arr.shape, lambda i, z=zeros: z)  # constant block -> fetched once


_W_ORDER = ("g1", "b1", "g2", "b2", "wf1", "bf1", "wf2", "bf2", "wf3", "bf3")


@jax.jit
def simple_convnet_forward(packed, x):
    n = x.shape[0]
    tb = 128 if n >= 128 else -(-n // 8) * 8       # batch tile (review #1/#2)
    npad = -(-n // tb) * tb
    xi = x.reshape(n, 28, 28).astype(jnp.float32)  # C=1 squeezed (free reshape)
    if npad != n:
        xi = jnp.pad(xi, ((0, npad - n), (0, 0), (0, 0)))

    out = pl.pallas_call(
        _lenet_kernel,
        out_shape=jax.ShapeDtypeStruct((npad, 128), jnp.float32),
        grid_spec=pltpu.PrefetchScalarGridSpec(
            num_scalar_prefetch=0,
            grid=(npad // tb,),
            in_specs=[pl.BlockSpec((tb, 28, 28), lambda i: (i, 0, 0))]
                     + [_resident_spec(packed[k]) for k in _W_ORDER],
            out_specs=pl.BlockSpec((tb, 128), lambda i: (i, 0)),
            scratch_shapes=[
                pltpu.VMEM((tb, 24, 72), jnp.float32),   # conv1 even-parity acc
                pltpu.VMEM((tb, 24, 72), jnp.float32),   # conv1 odd-parity acc
                pltpu.VMEM((tb, 12, 72), jnp.float32),   # pooled conv1 activation
                pltpu.VMEM((tb, 8, 128), jnp.float32),   # conv2 parity-merged acc
                pltpu.VMEM((tb, 4, 128), jnp.float32),   # pooled conv2 activation
            ],
        ),
        compiler_params=pltpu.CompilerParams(
            dimension_semantics=("parallel",),
            vmem_limit_bytes=32 * 1024 * 1024,
        ),
    )(xi, *[packed[k] for k in _W_ORDER])
    return out[:n, :10]                            # lane-dense store, slice logits


# ----------------------------------------------------------------------------
# Parameters: PyTorch-default-style init, plus a ONE-TIME repack for the kernel.
# ----------------------------------------------------------------------------
def init_params(key):
    def uinit(k, shape, fan_in):
        bound = 1.0 / np.sqrt(fan_in)
        return jax.random.uniform(k, shape, jnp.float32, -bound, bound)

    keys = jax.random.split(key, 10)
    return {
        "conv1_w": uinit(keys[0], (6, 1, 5, 5), 25),
        "conv1_b": uinit(keys[1], (6,), 25),
        "conv2_w": uinit(keys[2], (16, 6, 5, 5), 150),
        "conv2_b": uinit(keys[3], (16,), 150),
        "fc1_w": uinit(keys[4], (120, 256), 256),
        "fc1_b": uinit(keys[5], (120,), 256),
        "fc2_w": uinit(keys[6], (84, 120), 120),
        "fc2_b": uinit(keys[7], (84,), 120),
        "fc3_w": uinit(keys[8], (10, 84), 84),
        "fc3_b": uinit(keys[9], (10,), 84),
    }


def pack_params(params):
    """One-time repack of PyTorch-layout weights into kernel-ready operands.

    G[kh, parity][p*IC+ic, jj*OC+oc] = W[oc, ic, kh, kw] with p = 2*jj+parity+kw,
    so conv + the horizontal half of the 2x2 max-pool become lane-dense matmuls.
    Runs outside jit (numpy)."""
    def band(w, win):
        w = np.asarray(w, np.float32)                    # (OC, IC, KH, KW)
        oc, ic, nkh, nkw = w.shape
        half = (win - nkw + 1) // 2
        g = np.zeros((nkh, 2, win * ic, half * oc), np.float32)
        for kh in range(nkh):
            for s in range(2):
                for jj in range(half):
                    for kw in range(nkw):
                        p = 2 * jj + s + kw              # input column
                        g[kh, s, p * ic:(p + 1) * ic, jj * oc:(jj + 1) * oc] = \
                            w[:, :, kh, kw].T
        return g

    g1 = band(params["conv1_w"], 28)                      # (5, 2, 28, 72)
    g2b = band(params["conv2_w"], 12)                      # (5, 2, 72, 64)
    g2 = np.concatenate([g2b[:, 0], g2b[:, 1]], axis=-1)   # (5, 72, 128) even||odd

    # fc1 rows reordered to the kernel's (h, w*16+c) activation layout, which
    # matches torch's .view(-1, 256) (c, h, w) flatten order; rows 64:128 are
    # zero so the duplicated odd-parity half of the pooled conv2 activation is
    # ignored.
    fc1 = np.asarray(params["fc1_w"], np.float32)          # (120, 256)
    wf1 = np.zeros((4, 128, 120), np.float32)
    wf1[:, :64, :] = (fc1.reshape(120, 16, 4, 4)
                      .transpose(2, 3, 1, 0).reshape(4, 64, 120))

    # fc3 zero-padded to 128 output lanes for an unmasked, lane-dense store.
    wf3 = np.zeros((84, 128), np.float32)
    wf3[:, :10] = np.asarray(params["fc3_w"], np.float32).T
    bf3 = np.zeros((1, 128), np.float32)
    bf3[0, :10] = np.asarray(params["fc3_b"], np.float32)

    return {
        "g1": jnp.asarray(g1),
        "b1": jnp.asarray(np.tile(np.asarray(params["conv1_b"], np.float32), 12)
                          .reshape(1, 72)),
        "g2": jnp.asarray(g2),
        "b2": jnp.asarray(np.tile(np.asarray(params["conv2_b"], np.float32), 8)
                          .reshape(1, 128)),
        "wf1": jnp.asarray(wf1),
        "bf1": jnp.asarray(params["fc1_b"]).reshape(1, 120),
        "wf2": jnp.asarray(params["fc2_w"]).T,              # (120, 84)
        "bf2": jnp.asarray(params["fc2_b"]).reshape(1, 84),
        "wf3": jnp.asarray(wf3),                             # (84, 128)
        "bf3": jnp.asarray(bf3),                              # (1, 128)
    }


# ----------------------------------------------------------------------------
# Plain-JAX reference (mirrors the PyTorch module) for the numerical check.
# ----------------------------------------------------------------------------
def reference_forward(p, x):
    dn = ("NCHW", "OIHW", "NCHW")
    y = jax.lax.conv_general_dilated(x, p["conv1_w"], (1, 1), "VALID",
                                     dimension_numbers=dn)
    y = jax.nn.relu(y + p["conv1_b"].reshape(1, 6, 1, 1))
    y = jax.lax.reduce_window(y, -jnp.inf, jax.lax.max,
                              (1, 1, 2, 2), (1, 1, 2, 2), "VALID")
    y = jax.lax.conv_general_dilated(y, p["conv2_w"], (1, 1), "VALID",
                                     dimension_numbers=dn)
    y = jax.nn.relu(y + p["conv2_b"].reshape(1, 16, 1, 1))
    y = jax.lax.reduce_window(y, -jnp.inf, jax.lax.max,
                              (1, 1, 2, 2), (1, 1, 2, 2), "VALID")
    y = y.reshape(y.shape[0], 256)
    y = jax.nn.relu(y @ p["fc1_w"].T + p["fc1_b"])
    y = jax.nn.relu(y @ p["fc2_w"].T + p["fc2_b"])
    return y @ p["fc3_w"].T + p["fc3_b"]


if __name__ == "__main__":
    key = jax.random.PRNGKey(0)
    pkey, xkey, xkey2 = jax.random.split(key, 3)
    params = init_params(pkey)
    packed = pack_params(params)                       # one-time weight repack

    # Small demo batch (matches the torch summary input shape (1, 28, 28)).
    x = jax.random.normal(xkey, (2, 1, 28, 28), dtype=jnp.float32)
    out = jax.block_until_ready(simple_convnet_forward(packed, x))
    assert out.shape == (2, 10), out.shape
    ref = jax.block_until_ready(reference_forward(params, x))
    np.testing.assert_allclose(np.asarray(out), np.asarray(ref),
                               rtol=1e-2, atol=1e-2)

    # Larger batch exercising the 128-image tile, batch padding and a 2-step grid.
    xb = jax.random.normal(xkey2, (130, 1, 28, 28), dtype=jnp.float32)
    outb = jax.block_until_ready(simple_convnet_forward(packed, xb))
    assert outb.shape == (130, 10), outb.shape
    refb = jax.block_until_ready(reference_forward(params, xb))
    np.testing.assert_allclose(np.asarray(outb), np.asarray(refb),
                               rtol=1e-2, atol=1e-2)

    print("KERNEL_OK")
</pallas_src>

<mosaic_0001>
module attributes {stable_mosaic.version = 11 : i64} {
  func.func @_lenet_kernel(%arg0: i32, %arg1: memref<8x28x28xf32, #tpu.memory_space<vmem>>, %arg2: memref<5x2x28x72xf32, #tpu.memory_space<vmem>>, %arg3: memref<1x72xf32, #tpu.memory_space<vmem>>, %arg4: memref<5x72x128xf32, #tpu.memory_space<vmem>>, %arg5: memref<1x128xf32, #tpu.memory_space<vmem>>, %arg6: memref<4x128x120xf32, #tpu.memory_space<vmem>>, %arg7: memref<1x120xf32, #tpu.memory_space<vmem>>, %arg8: memref<120x84xf32, #tpu.memory_space<vmem>>, %arg9: memref<1x84xf32, #tpu.memory_space<vmem>>, %arg10: memref<84x128xf32, #tpu.memory_space<vmem>>, %arg11: memref<1x128xf32, #tpu.memory_space<vmem>>, %arg12: memref<8x128xf32, #tpu.memory_space<vmem>>, %arg13: memref<8x24x72xf32, #tpu.memory_space<vmem>>, %arg14: memref<8x24x72xf32, #tpu.memory_space<vmem>>, %arg15: memref<8x12x72xf32, #tpu.memory_space<vmem>>, %arg16: memref<8x8x128xf32, #tpu.memory_space<vmem>>, %arg17: memref<8x4x128xf32, #tpu.memory_space<vmem>>) attributes {dimension_semantics = [#tpu.dimension_semantics<parallel>], iteration_bounds = array<i64: 1>, scalar_prefetch = 0 : i64, scratch_operands = 5 : i64, tpu.core_type = #tpu.core_type<tc>, window_params = [{transform_indices = @transform_0, window_bounds = array<i64: 8, 28, 28>}, {pipeline_mode = #tpu.pipeline_mode<synchronous>, transform_indices = @transform_1, window_bounds = array<i64: 5, 2, 28, 72>}, {pipeline_mode = #tpu.pipeline_mode<synchronous>, transform_indices = @transform_2, window_bounds = array<i64: 1, 72>}, {pipeline_mode = #tpu.pipeline_mode<synchronous>, transform_indices = @transform_3, window_bounds = array<i64: 5, 72, 128>}, {pipeline_mode = #tpu.pipeline_mode<synchronous>, transform_indices = @transform_4, window_bounds = array<i64: 1, 128>}, {pipeline_mode = #tpu.pipeline_mode<synchronous>, transform_indices = @transform_5, window_bounds = array<i64: 4, 128, 120>}, {pipeline_mode = #tpu.pipeline_mode<synchronous>, transform_indices = @transform_6, window_bounds = array<i64: 1, 120>}, {pipeline_mode = #tpu.pipeline_mode<synchronous>, transform_indices = @transform_7, window_bounds = array<i64: 120, 84>}, {pipeline_mode = #tpu.pipeline_mode<synchronous>, transform_indices = @transform_8, window_bounds = array<i64: 1, 84>}, {pipeline_mode = #tpu.pipeline_mode<synchronous>, transform_indices = @transform_9, window_bounds = array<i64: 84, 128>}, {pipeline_mode = #tpu.pipeline_mode<synchronous>, transform_indices = @transform_10, window_bounds = array<i64: 1, 128>}, {transform_indices = @transform_11, window_bounds = array<i64: 8, 128>}]} {
    %c0 = arith.constant 0 : index
    %c0_0 = arith.constant 0 : index
    %c0_1 = arith.constant 0 : index
    %0 = vector.load %arg1[%c0, %c0_0, %c0_1] : memref<8x28x28xf32, #tpu.memory_space<vmem>>, vector<8x24x28xf32>
    %1 = vector.shape_cast %0 : vector<8x24x28xf32> to vector<192x28xf32>
    %c0_2 = arith.constant 0 : index
    %c0_3 = arith.constant 0 : index
    %c0_4 = arith.constant 0 : index
    %c0_5 = arith.constant 0 : index
    %2 = vector.load %arg2[%c0_2, %c0_3, %c0_4, %c0_5] : memref<5x2x28x72xf32, #tpu.memory_space<vmem>>, vector<1x1x28x72xf32>
    %3 = vector.shape_cast %2 : vector<1x1x28x72xf32> to vector<28x72xf32>
    %cst = arith.constant dense<0.000000e+00> : vector<192x72xf32>
    %4 = tpu.matmul %1, %3, %cst {dimension_numbers = #tpu.dot_dimension_numbers<[1], [0], [0], [1], [0, 0, 1, 1], [], []>} : vector<192x28xf32>, vector<28x72xf32>, vector<192x72xf32> -> vector<192x72xf32>
    %5 = vector.shape_cast %4 : vector<192x72xf32> to vector<8x24x72xf32>
    %c0_6 = arith.constant 0 : index
    %c1 = arith.constant 1 : index
    %c0_7 = arith.constant 0 : index
    %c0_8 = arith.constant 0 : index
    %6 = vector.load %arg2[%c0_6, %c1, %c0_7, %c0_8] : memref<5x2x28x72xf32, #tpu.memory_space<vmem>>, vector<1x1x28x72xf32>
    %7 = vector.shape_cast %6 : vector<1x1x28x72xf32> to vector<28x72xf32>
    %cst_9 = arith.constant dense<0.000000e+00> : vector<192x72xf32>
    %8 = tpu.matmul %1, %7, %cst_9 {dimension_numbers = #tpu.dot_dimension_numbers<[1], [0], [0], [1], [0, 0, 1, 1], [], []>} : vector<192x28xf32>, vector<28x72xf32>, vector<192x72xf32> -> vector<192x72xf32>
    %9 = vector.shape_cast %8 : vector<192x72xf32> to vector<8x24x72xf32>
    %c0_10 = arith.constant 0 : index
    %c0_11 = arith.constant 0 : index
    %c0_12 = arith.constant 0 : index
    %10 = vector.load %arg13[%c0_10, %c0_11, %c0_12] : memref<8x24x72xf32, #tpu.memory_space<vmem>>, vector<8x24x72xf32>
    tpu.vector_store %arg13[%c0_10, %c0_11, %c0_12], %5 {strides = array<i32>} : memref<8x24x72xf32, #tpu.memory_space<vmem>>, vector<8x24x72xf32>,
    %c0_13 = arith.constant 0 : index
    %c0_14 = arith.constant 0 : index
    %c0_15 = arith.constant 0 : index
    %11 = vector.load %arg14[%c0_13, %c0_14, %c0_15] : memref<8x24x72xf32, #tpu.memory_space<vmem>>, vector<8x24x72xf32>
    tpu.vector_store %arg14[%c0_13, %c0_14, %c0_15], %9 {strides = array<i32>} : memref<8x24x72xf32, #tpu.memory_space<vmem>>, vector<8x24x72xf32>,
    %c0_16 = arith.constant 0 : index
    %c1_17 = arith.constant 1 : index
    %c0_18 = arith.constant 0 : index
    %12 = vector.load %arg1[%c0_16, %c1_17, %c0_18] : memref<8x28x28xf32, #tpu.memory_space<vmem>>, vector<8x24x28xf32>
    %13 = vector.shape_cast %12 : vector<8x24x28xf32> to vector<192x28xf32>
    %c1_19 = arith.constant 1 : index
    %c0_20 = arith.constant 0 : index
    %c0_21 = arith.constant 0 : index
    %c0_22 = arith.constant 0 : index
    %14 = vector.load %arg2[%c1_19, %c0_20, %c0_21, %c0_22] : memref<5x2x28x72xf32, #tpu.memory_space<vmem>>, vector<1x1x28x72xf32>
    %15 = vector.shape_cast %14 : vector<1x1x28x72xf32> to vector<28x72xf32>
    %cst_23 = arith.constant dense<0.000000e+00> : vector<192x72xf32>
    %16 = tpu.matmul %13, %15, %cst_23 {dimension_numbers = #tpu.dot_dimension_numbers<[1], [0], [0], [1], [0, 0, 1, 1], [], []>} : vector<192x28xf32>, vector<28x72xf32>, vector<192x72xf32> -> vector<192x72xf32>
    %17 = vector.shape_cast %16 : vector<192x72xf32> to vector<8x24x72xf32>
    %c1_24 = arith.constant 1 : index
    %c1_25 = arith.constant 1 : index
    %c0_26 = arith.constant 0 : index
    %c0_27 = arith.constant 0 : index
    %18 = vector.load %arg2[%c1_24, %c1_25, %c0_26, %c0_27] : memref<5x2x28x72xf32, #tpu.memory_space<vmem>>, vector<1x1x28x72xf32>
    %19 = vector.shape_cast %18 : vector<1x1x28x72xf32> to vector<28x72xf32>
    %cst_28 = arith.constant dense<0.000000e+00> : vector<192x72xf32>
    %20 = tpu.matmul %13, %19, %cst_28 {dimension_numbers = #tpu.dot_dimension_numbers<[1], [0], [0], [1], [0, 0, 1, 1], [], []>} : vector<192x28xf32>, vector<28x72xf32>, vector<192x72xf32> -> vector<192x72xf32>
    %21 = vector.shape_cast %20 : vector<192x72xf32> to vector<8x24x72xf32>
    %c0_29 = arith.constant 0 : index
    %c0_30 = arith.constant 0 : index
    %c0_31 = arith.constant 0 : index
    %22 = vector.load %arg13[%c0_29, %c0_30, %c0_31] : memref<8x24x72xf32, #tpu.memory_space<vmem>>, vector<8x24x72xf32>
    %23 = arith.addf %22, %17 : vector<8x24x72xf32>
    %c0_32 = arith.constant 0 : index
    %c0_33 = arith.constant 0 : index
    %c0_34 = arith.constant 0 : index
    %24 = vector.load %arg13[%c0_32, %c0_33, %c0_34] : memref<8x24x72xf32, #tpu.memory_space<vmem>>, vector<8x24x72xf32>
    tpu.vector_store %arg13[%c0_32, %c0_33, %c0_34], %23 {strides = array<i32>} : memref<8x24x72xf32, #tpu.memory_space<vmem>>, vector<8x24x72xf32>,
    %c0_35 = arith.constant 0 : index
    %c0_36 = arith.constant 0 : index
    %c0_37 = arith.constant 0 : index
    %25 = vector.load %arg14[%c0_35, %c0_36, %c0_37] : memref<8x24x72xf32, #tpu.memory_space<vmem>>, vector<8x24x72xf32>
    %26 = arith.addf %25, %21 : vector<8x24x72xf32>
    %c0_38 = arith.constant 0 : index
    %c0_39 = arith.constant 0 : index
    %c0_40 = arith.constant 0 : index
    %27 = vector.load %arg14[%c0_38, %c0_39, %c0_40] : memref<8x24x72xf32, #tpu.memory_space<vmem>>, vector<8x24x72xf32>
    tpu.vector_store %arg14[%c0_38, %c0_39, %c0_40], %26 {strides = array<i32>} : memref<8x24x72xf32, #tpu.memory_space<vmem>>, vector<8x24x72xf32>,
    %c0_41 = arith.constant 0 : index
    %c2 = arith.constant 2 : index
    %c0_42 = arith.constant 0 : index
    %28 = vector.load %arg1[%c0_41, %c2, %c0_42] : memref<8x28x28xf32, #tpu.memory_space<vmem>>, vector<8x24x28xf32>
    %29 = vector.shape_cast %28 : vector<8x24x28xf32> to vector<192x28xf32>
    %c2_43 = arith.constant 2 : index
    %c0_44 = arith.constant 0 : index
    %c0_45 = arith.constant 0 : index
    %c0_46 = arith.constant 0 : index
    %30 = vector.load %arg2[%c2_43, %c0_44, %c0_45, %c0_46] : memref<5x2x28x72xf32, #tpu.memory_space<vmem>>, vector<1x1x28x72xf32>
    %31 = vector.shape_cast %30 : vector<1x1x28x72xf32> to vector<28x72xf32>
    %cst_47 = arith.constant dense<0.000000e+00> : vector<192x72xf32>
    %32 = tpu.matmul %29, %31, %cst_47 {dimension_numbers = #tpu.dot_dimension_numbers<[1], [0], [0], [1], [0, 0, 1, 1], [], []>} : vector<192x28xf32>, vector<28x72xf32>, vector<192x72xf32> -> vector<192x72xf32>
    %33 = vector.shape_cast %32 : vector<192x72xf32> to vector<8x24x72xf32>
    %c2_48 = arith.constant 2 : index
    %c1_49 = arith.constant 1 : index
    %c0_50 = arith.constant 0 : index
    %c0_51 = arith.constant 0 : index
    %34 = vector.load %arg2[%c2_48, %c1_49, %c0_50, %c0_51] : memref<5x2x28x72xf32, #tpu.memory_space<vmem>>, vector<1x1x28x72xf32>
    %35 = vector.shape_cast %34 : vector<1x1x28x72xf32> to vector<28x72xf32>
    %cst_52 = arith.constant dense<0.000000e+00> : vector<192x72xf32>
    %36 = tpu.matmul %29, %35, %cst_52 {dimension_numbers = #tpu.dot_dimension_numbers<[1], [0], [0], [1], [0, 0, 1, 1], [], []>} : vector<192x28xf32>, vector<28x72xf32>, vector<192x72xf32> -> vector<192x72xf32>
    %37 = vector.shape_cast %36 : vector<192x72xf32> to vector<8x24x72xf32>
    %c0_53 = arith.constant 0 : index
    %c0_54 = arith.constant 0 : index
    %c0_55 = arith.constant 0 : index
    %38 = vector.load %arg13[%c0_53, %c0_54, %c0_55] : memref<8x24x72xf32, #tpu.memory_space<vmem>>, vector<8x24x72xf32>
    %39 = arith.addf %38, %33 : vector<8x24x72xf32>
    %c0_56 = arith.constant 0 : index
    %c0_57 = arith.constant 0 : index
    %c0_58 = arith.constant 0 : index
    %40 = vector.load %arg13[%c0_56, %c0_57, %c0_58] : memref<8x24x72xf32, #tpu.memory_space<vmem>>, vector<8x24x72xf32>
    tpu.vector_store %arg13[%c0_56, %c0_57, %c0_58], %39 {strides = array<i32>} : memref<8x24x72xf32, #tpu.memory_space<vmem>>, vector<8x24x72xf32>,
    %c0_59 = arith.constant 0 : index
    %c0_60 = arith.constant 0 : index
    %c0_61 = arith.constant 0 : index
    %41 = vector.load %arg14[%c0_59, %c0_60, %c0_61] : memref<8x24x72xf32, #tpu.memory_space<vmem>>, vector<8x24x72xf32>
    %42 = arith.addf %41, %37 : vector<8x24x72xf32>
    %c0_62 = arith.constant 0 : index
    %c0_63 = arith.constant 0 : index
    %c0_64 = arith.constant 0 : index
    %43 = vector.load %arg14[%c0_62, %c0_63, %c0_64] : memref<8x24x72xf32, #tpu.memory_space<vmem>>, vector<8x24x72xf32>
    tpu.vector_store %arg14[%c0_62, %c0_63, %c0_64], %42 {strides = array<i32>} : memref<8x24x72xf32, #tpu.memory_space<vmem>>, vector<8x24x72xf32>,
    %c0_65 = arith.constant 0 : index
    %c3 = arith.constant 3 : index
    %c0_66 = arith.constant 0 : index
    %44 = vector.load %arg1[%c0_65, %c3, %c0_66] : memref<8x28x28xf32, #tpu.memory_space<vmem>>, vector<8x24x28xf32>
    %45 = vector.shape_cast %44 : vector<8x24x28xf32> to vector<192x28xf32>
    %c3_67 = arith.constant 3 : index
    %c0_68 = arith.constant 0 : index
    %c0_69 = arith.constant 0 : index
    %c0_70 = arith.constant 0 : index
    %46 = vector.load %arg2[%c3_67, %c0_68, %c0_69, %c0_70] : memref<5x2x28x72xf32, #tpu.memory_space<vmem>>, vector<1x1x28x72xf32>
    %47 = vector.shape_cast %46 : vector<1x1x28x72xf32> to vector<28x72xf32>
    %cst_71 = arith.constant dense<0.000000e+00> : vector<192x72xf32>
    %48 = tpu.matmul %45, %47, %cst_71 {dimension_numbers = #tpu.dot_dimension_numbers<[1], [0], [0], [1], [0, 0, 1, 1], [], []>} : vector<192x28xf32>, vector<28x72xf32>, vector<192x72xf32> -> vector<192x72xf32>
    %49 = vector.shape_cast %48 : vector<192x72xf32> to vector<8x24x72xf32>
    %c3_72 = arith.constant 3 : index
    %c1_73 = arith.constant 1 : index
    %c0_74 = arith.constant 0 : index
    %c0_75 = arith.constant 0 : index
    %50 = vector.load %arg2[%c3_72, %c1_73, %c0_74, %c0_75] : memref<5x2x28x72xf32, #tpu.memory_space<vmem>>, vector<1x1x28x72xf32>
    %51 = vector.shape_cast %50 : vector<1x1x28x72xf32> to vector<28x72xf32>
    %cst_76 = arith.constant dense<0.000000e+00> : vector<192x72xf32>
    %52 = tpu.matmul %45, %51, %cst_76 {dimension_numbers = #tpu.dot_dimension_numbers<[1], [0], [0], [1], [0, 0, 1, 1], [], []>} : vector<192x28xf32>, vector<28x72xf32>, vector<192x72xf32> -> vector<192x72xf32>
    %53 = vector.shape_cast %52 : vector<192x72xf32> to vector<8x24x72xf32>
    %c0_77 = arith.constant 0 : index
    %c0_78 = arith.constant 0 : index
    %c0_79 = arith.constant 0 : index
    %54 = vector.load %arg13[%c0_77, %c0_78, %c0_79] : memref<8x24x72xf32, #tpu.memory_space<vmem>>, vector<8x24x72xf32>
    %55 = arith.addf %54, %49 : vector<8x24x72xf32>
    %c0_80 = arith.constant 0 : index
    %c0_81 = arith.constant 0 : index
    %c0_82 = arith.constant 0 : index
    %56 = vector.load %arg13[%c0_80, %c0_81, %c0_82] : memref<8x24x72xf32, #tpu.memory_space<vmem>>, vector<8x24x72xf32>
    tpu.vector_store %arg13[%c0_80, %c0_81, %c0_82], %55 {strides = array<i32>} : memref<8x24x72xf32, #tpu.memory_space<vmem>>, vector<8x24x72xf32>,
    %c0_83 = arith.constant 0 : index
    %c0_84 = arith.constant 0 : index
    %c0_85 = arith.constant 0 : index
    %57 = vector.load %arg14[%c0_83, %c0_84, %c0_85] : memref<8x24x72xf32, #tpu.memory_space<vmem>>, vector<8x24x72xf32>
    %58 = arith.addf %57, %53 : vector<8x24x72xf32>
    %c0_86 = arith.constant 0 : index
    %c0_87 = arith.constant 0 : index
    %c0_88 = arith.constant 0 : index
    %59 = vector.load %arg14[%c0_86, %c0_87, %c0_88] : memref<8x24x72xf32, #tpu.memory_space<vmem>>, vector<8x24x72xf32>
    tpu.vector_store %arg14[%c0_86, %c0_87, %c0_88], %58 {strides = array<i32>} : memref<8x24x72xf32, #tpu.memory_space<vmem>>, vector<8x24x72xf32>,
    %c0_89 = arith.constant 0 : index
    %c4 = arith.constant 4 : index
    %c0_90 = arith.constant 0 : index
    %60 = vector.load %arg1[%c0_89, %c4, %c0_90] : memref<8x28x28xf32, #tpu.memory_space<vmem>>, vector<8x24x28xf32>
    %61 = vector.shape_cast %60 : vector<8x24x28xf32> to vector<192x28xf32>
    %c4_91 = arith.constant 4 : index
    %c0_92 = arith.constant 0 : index
    %c0_93 = arith.constant 0 : index
    %c0_94 = arith.constant 0 : index
    %62 = vector.load %arg2[%c4_91, %c0_92, %c0_93, %c0_94] : memref<5x2x28x72xf32, #tpu.memory_space<vmem>>, vector<1x1x28x72xf32>
    %63 = vector.shape_cast %62 : vector<1x1x28x72xf32> to vector<28x72xf32>
    %cst_95 = arith.constant dense<0.000000e+00> : vector<192x72xf32>
    %64 = tpu.matmul %61, %63, %cst_95 {dimension_numbers = #tpu.dot_dimension_numbers<[1], [0], [0], [1], [0, 0, 1, 1], [], []>} : vector<192x28xf32>, vector<28x72xf32>, vector<192x72xf32> -> vector<192x72xf32>
    %65 = vector.shape_cast %64 : vector<192x72xf32> to vector<8x24x72xf32>
    %c4_96 = arith.constant 4 : index
    %c1_97 = arith.constant 1 : index
    %c0_98 = arith.constant 0 : index
    %c0_99 = arith.constant 0 : index
    %66 = vector.load %arg2[%c4_96, %c1_97, %c0_98, %c0_99] : memref<5x2x28x72xf32, #tpu.memory_space<vmem>>, vector<1x1x28x72xf32>
    %67 = vector.shape_cast %66 : vector<1x1x28x72xf32> to vector<28x72xf32>
    %cst_100 = arith.constant dense<0.000000e+00> : vector<192x72xf32>
    %68 = tpu.matmul %61, %67, %cst_100 {dimension_numbers = #tpu.dot_dimension_numbers<[1], [0], [0], [1], [0, 0, 1, 1], [], []>} : vector<192x28xf32>, vector<28x72xf32>, vector<192x72xf32> -> vector<192x72xf32>
    %69 = vector.shape_cast %68 : vector<192x72xf32> to vector<8x24x72xf32>
    %c0_101 = arith.constant 0 : index
    %c0_102 = arith.constant 0 : index
    %c0_103 = arith.constant 0 : index
    %70 = vector.load %arg13[%c0_101, %c0_102, %c0_103] : memref<8x24x72xf32, #tpu.memory_space<vmem>>, vector<8x24x72xf32>
    %71 = arith.addf %70, %65 : vector<8x24x72xf32>
    %c0_104 = arith.constant 0 : index
    %c0_105 = arith.constant 0 : index
    %c0_106 = arith.constant 0 : index
    %72 = vector.load %arg13[%c0_104, %c0_105, %c0_106] : memref<8x24x72xf32, #tpu.memory_space<vmem>>, vector<8x24x72xf32>
    tpu.vector_store %arg13[%c0_104, %c0_105, %c0_106], %71 {strides = array<i32>} : memref<8x24x72xf32, #tpu.memory_space<vmem>>, vector<8x24x72xf32>,
    %c0_107 = arith.constant 0 : index
    %c0_108 = arith.constant 0 : index
    %c0_109 = arith.constant 0 : index
    %73 = vector.load %arg14[%c0_107, %c0_108, %c0_109] : memref<8x24x72xf32, #tpu.memory_space<vmem>>, vector<8x24x72xf32>
    %74 = arith.addf %73, %69 : vector<8x24x72xf32>
    %c0_110 = arith.constant 0 : index
    %c0_111 = arith.constant 0 : index
    %c0_112 = arith.constant 0 : index
    %75 = vector.load %arg14[%c0_110, %c0_111, %c0_112] : memref<8x24x72xf32, #tpu.memory_space<vmem>>, vector<8x24x72xf32>
    tpu.vector_store %arg14[%c0_110, %c0_111, %c0_112], %74 {strides = array<i32>} : memref<8x24x72xf32, #tpu.memory_space<vmem>>, vector<8x24x72xf32>,
    %c0_113 = arith.constant 0 : index
    %c0_114 = arith.constant 0 : index
    %c0_115 = arith.constant 0 : index
    %76 = tpu.strided_load %arg13[%c0_113, %c0_114, %c0_115] {strides = array<i32: 1, 2, 1>} : memref<8x24x72xf32, #tpu.memory_space<vmem>>, vector<8x12x72xf32>
    %c0_116 = arith.constant 0 : index
    %c1_117 = arith.constant 1 : index
    %c0_118 = arith.constant 0 : index
    %77 = tpu.strided_load %arg13[%c0_116, %c1_117, %c0_118] {strides = array<i32: 1, 2, 1>} : memref<8x24x72xf32, #tpu.memory_space<vmem>>, vector<8x12x72xf32>
    %78 = arith.maximumf %76, %77 : vector<8x12x72xf32>
    %c0_119 = arith.constant 0 : index
    %c0_120 = arith.constant 0 : index
    %c0_121 = arith.constant 0 : index
    %79 = tpu.strided_load %arg14[%c0_119, %c0_120, %c0_121] {strides = array<i32: 1, 2, 1>} : memref<8x24x72xf32, #tpu.memory_space<vmem>>, vector<8x12x72xf32>
    %c0_122 = arith.constant 0 : index
    %c1_123 = arith.constant 1 : index
    %c0_124 = arith.constant 0 : index
    %80 = tpu.strided_load %arg14[%c0_122, %c1_123, %c0_124] {strides = array<i32: 1, 2, 1>} : memref<8x24x72xf32, #tpu.memory_space<vmem>>, vector<8x12x72xf32>
    %81 = arith.maximumf %79, %80 : vector<8x12x72xf32>
    %82 = arith.maximumf %78, %81 : vector<8x12x72xf32>
    %c0_125 = arith.constant 0 : index
    %c0_126 = arith.constant 0 : index
    %83 = vector.load %arg3[%c0_125, %c0_126] : memref<1x72xf32, #tpu.memory_space<vmem>>, vector<1x72xf32>
    %84 = vector.shape_cast %83 : vector<1x72xf32> to vector<1x1x72xf32>
    %85 = vector.broadcast %84 : vector<1x1x72xf32> to vector<8x12x72xf32>
    %86 = arith.addf %82, %85 : vector<8x12x72xf32>
    %cst_127 = arith.constant 0.000000e+00 : f32
    %87 = vector.broadcast %cst_127 : f32 to vector<8x12x72xf32>
    %88 = arith.maximumf %86, %87 : vector<8x12x72xf32>
    %c0_128 = arith.constant 0 : index
    %c0_129 = arith.constant 0 : index
    %c0_130 = arith.constant 0 : index
    %89 = vector.load %arg15[%c0_128, %c0_129, %c0_130] : memref<8x12x72xf32, #tpu.memory_space<vmem>>, vector<8x12x72xf32>
    tpu.vector_store %arg15[%c0_128, %c0_129, %c0_130], %88 {strides = array<i32>} : memref<8x12x72xf32, #tpu.memory_space<vmem>>, vector<8x12x72xf32>,
    %c0_131 = arith.constant 0 : index
    %c0_132 = arith.constant 0 : index
    %c0_133 = arith.constant 0 : index
    %90 = vector.load %arg15[%c0_131, %c0_132, %c0_133] : memref<8x12x72xf32, #tpu.memory_space<vmem>>, vector<8x8x72xf32>
    %91 = vector.shape_cast %90 : vector<8x8x72xf32> to vector<64x72xf32>
    %c0_134 = arith.constant 0 : index
    %c0_135 = arith.constant 0 : index
    %c0_136 = arith.constant 0 : index
    %92 = vector.load %arg4[%c0_134, %c0_135, %c0_136] : memref<5x72x128xf32, #tpu.memory_space<vmem>>, vector<1x72x128xf32>
    %93 = vector.shape_cast %92 : vector<1x72x128xf32> to vector<72x128xf32>
    %cst_137 = arith.constant dense<0.000000e+00> : vector<64x128xf32>
    %94 = tpu.matmul %91, %93, %cst_137 {dimension_numbers = #tpu.dot_dimension_numbers<[1], [0], [0], [1], [0, 0, 1, 1], [], []>} : vector<64x72xf32>, vector<72x128xf32>, vector<64x128xf32> -> vector<64x128xf32>
    %95 = vector.shape_cast %94 : vector<64x128xf32> to vector<8x8x128xf32>
    %c0_138 = arith.constant 0 : index
    %c0_139 = arith.constant 0 : index
    %c0_140 = arith.constant 0 : index
    %96 = vector.load %arg16[%c0_138, %c0_139, %c0_140] : memref<8x8x128xf32, #tpu.memory_space<vmem>>, vector<8x8x128xf32>
    tpu.vector_store %arg16[%c0_138, %c0_139, %c0_140], %95 {strides = array<i32>} : memref<8x8x128xf32, #tpu.memory_space<vmem>>, vector<8x8x128xf32>,
    %c0_141 = arith.constant 0 : index
    %c1_142 = arith.constant 1 : index
    %c0_143 = arith.constant 0 : index
    %97 = vector.load %arg15[%c0_141, %c1_142, %c0_143] : memref<8x12x72xf32, #tpu.memory_space<vmem>>, vector<8x8x72xf32>
    %98 = vector.shape_cast %97 : vector<8x8x72xf32> to vector<64x72xf32>
    %c1_144 = arith.constant 1 : index
    %c0_145 = arith.constant 0 : index
    %c0_146 = arith.constant 0 : index
    %99 = vector.load %arg4[%c1_144, %c0_145, %c0_146] : memref<5x72x128xf32, #tpu.memory_space<vmem>>, vector<1x72x128xf32>
    %100 = vector.shape_cast %99 : vector<1x72x128xf32> to vector<72x128xf32>
    %cst_147 = arith.constant dense<0.000000e+00> : vector<64x128xf32>
    %101 = tpu.matmul %98, %100, %cst_147 {dimension_numbers = #tpu.dot_dimension_numbers<[1], [0], [0], [1], [0, 0, 1, 1], [], []>} : vector<64x72xf32>, vector<72x128xf32>, vector<64x128xf32> -> vector<64x128xf32>
    %102 = vector.shape_cast %101 : vector<64x128xf32> to vector<8x8x128xf32>
    %c0_148 = arith.constant 0 : index
    %c0_149 = arith.constant 0 : index
    %c0_150 = arith.constant 0 : index
    %103 = vector.load %arg16[%c0_148, %c0_149, %c0_150] : memref<8x8x128xf32, #tpu.memory_space<vmem>>, vector<8x8x128xf32>
    %104 = arith.addf %103, %102 : vector<8x8x128xf32>
    %c0_151 = arith.constant 0 : index
    %c0_152 = arith.constant 0 : index
    %c0_153 = arith.constant 0 : index
    %105 = vector.load %arg16[%c0_151, %c0_152, %c0_153] : memref<8x8x128xf32, #tpu.memory_space<vmem>>, vector<8x8x128xf32>
    tpu.vector_store %arg16[%c0_151, %c0_152, %c0_153], %104 {strides = array<i32>} : memref<8x8x128xf32, #tpu.memory_space<vmem>>, vector<8x8x128xf32>,
    %c0_154 = arith.constant 0 : index
    %c2_155 = arith.constant 2 : index
    %c0_156 = arith.constant 0 : index
    %106 = vector.load %arg15[%c0_154, %c2_155, %c0_156] : memref<8x12x72xf32, #tpu.memory_space<vmem>>, vector<8x8x72xf32>
    %107 = vector.shape_cast %106 : vector<8x8x72xf32> to vector<64x72xf32>
    %c2_157 = arith.constant 2 : index
    %c0_158 = arith.constant 0 : index
    %c0_159 = arith.constant 0 : index
    %108 = vector.load %arg4[%c2_157, %c0_158, %c0_159] : memref<5x72x128xf32, #tpu.memory_space<vmem>>, vector<1x72x128xf32>
    %109 = vector.shape_cast %108 : vector<1x72x128xf32> to vector<72x128xf32>
    %cst_160 = arith.constant dense<0.000000e+00> : vector<64x128xf32>
    %110 = tpu.matmul %107, %109, %cst_160 {dimension_numbers = #tpu.dot_dimension_numbers<[1], [0], [0], [1], [0, 0, 1, 1], [], []>} : vector<64x72xf32>, vector<72x128xf32>, vector<64x128xf32> -> vector<64x128xf32>
    %111 = vector.shape_cast %110 : vector<64x128xf32> to vector<8x8x128xf32>
    %c0_161 = arith.constant 0 : index
    %c0_162 = arith.constant 0 : index
    %c0_163 = arith.constant 0 : index
    %112 = vector.load %arg16[%c0_161, %c0_162, %c0_163] : memref<8x8x128xf32, #tpu.memory_space<vmem>>, vector<8x8x128xf32>
    %113 = arith.addf %112, %111 : vector<8x8x128xf32>
    %c0_164 = arith.constant 0 : index
    %c0_165 = arith.constant 0 : index
    %c0_166 = arith.constant 0 : index
    %114 = vector.load %arg16[%c0_164, %c0_165, %c0_166] : memref<8x8x128xf32, #tpu.memory_space<vmem>>, vector<8x8x128xf32>
    tpu.vector_store %arg16[%c0_164, %c0_165, %c0_166], %113 {strides = array<i32>} : memref<8x8x128xf32, #tpu.memory_space<vmem>>, vector<8x8x128xf32>,
    %c0_167 = arith.constant 0 : index
    %c3_168 = arith.constant 3 : index
    %c0_169 = arith.constant 0 : index
    %115 = vector.load %arg15[%c0_167, %c3_168, %c0_169] : memref<8x12x72xf32, #tpu.memory_space<vmem>>, vector<8x8x72xf32>
    %116 = vector.shape_cast %115 : vector<8x8x72xf32> to vector<64x72xf32>
    %c3_170 = arith.constant 3 : index
    %c0_171 = arith.constant 0 : index
    %c0_172 = arith.constant 0 : index
    %117 = vector.load %arg4[%c3_170, %c0_171, %c0_172] : memref<5x72x128xf32, #tpu.memory_space<vmem>>, vector<1x72x128xf32>
    %118 = vector.shape_cast %117 : vector<1x72x128xf32> to vector<72x128xf32>
    %cst_173 = arith.constant dense<0.000000e+00> : vector<64x128xf32>
    %119 = tpu.matmul %116, %118, %cst_173 {dimension_numbers = #tpu.dot_dimension_numbers<[1], [0], [0], [1], [0, 0, 1, 1], [], []>} : vector<64x72xf32>, vector<72x128xf32>, vector<64x128xf32> -> vector<64x128xf32>
    %120 = vector.shape_cast %119 : vector<64x128xf32> to vector<8x8x128xf32>
    %c0_174 = arith.constant 0 : index
    %c0_175 = arith.constant 0 : index
    %c0_176 = arith.constant 0 : index
    %121 = vector.load %arg16[%c0_174, %c0_175, %c0_176] : memref<8x8x128xf32, #tpu.memory_space<vmem>>, vector<8x8x128xf32>
    %122 = arith.addf %121, %120 : vector<8x8x128xf32>
    %c0_177 = arith.constant 0 : index
    %c0_178 = arith.constant 0 : index
    %c0_179 = arith.constant 0 : index
    %123 = vector.load %arg16[%c0_177, %c0_178, %c0_179] : memref<8x8x128xf32, #tpu.memory_space<vmem>>, vector<8x8x128xf32>
    tpu.vector_store %arg16[%c0_177, %c0_178, %c0_179], %122 {strides = array<i32>} : memref<8x8x128xf32, #tpu.memory_space<vmem>>, vector<8x8x128xf32>,
    %c0_180 = arith.constant 0 : index
    %c4_181 = arith.constant 4 : index
    %c0_182 = arith.constant 0 : index
    %124 = vector.load %arg15[%c0_180, %c4_181, %c0_182] : memref<8x12x72xf32, #tpu.memory_space<vmem>>, vector<8x8x72xf32>
    %125 = vector.shape_cast %124 : vector<8x8x72xf32> to vector<64x72xf32>
    %c4_183 = arith.constant 4 : index
    %c0_184 = arith.constant 0 : index
    %c0_185 = arith.constant 0 : index
    %126 = vector.load %arg4[%c4_183, %c0_184, %c0_185] : memref<5x72x128xf32, #tpu.memory_space<vmem>>, vector<1x72x128xf32>
    %127 = vector.shape_cast %126 : vector<1x72x128xf32> to vector<72x128xf32>
    %cst_186 = arith.constant dense<0.000000e+00> : vector<64x128xf32>
    %128 = tpu.matmul %125, %127, %cst_186 {dimension_numbers = #tpu.dot_dimension_numbers<[1], [0], [0], [1], [0, 0, 1, 1], [], []>} : vector<64x72xf32>, vector<72x128xf32>, vector<64x128xf32> -> vector<64x128xf32>
    %129 = vector.shape_cast %128 : vector<64x128xf32> to vector<8x8x128xf32>
    %c0_187 = arith.constant 0 : index
    %c0_188 = arith.constant 0 : index
    %c0_189 = arith.constant 0 : index
    %130 = vector.load %arg16[%c0_187, %c0_188, %c0_189] : memref<8x8x128xf32, #tpu.memory_space<vmem>>, vector<8x8x128xf32>
    %131 = arith.addf %130, %129 : vector<8x8x128xf32>
    %c0_190 = arith.constant 0 : index
    %c0_191 = arith.constant 0 : index
    %c0_192 = arith.constant 0 : index
    %132 = vector.load %arg16[%c0_190, %c0_191, %c0_192] : memref<8x8x128xf32, #tpu.memory_space<vmem>>, vector<8x8x128xf32>
    tpu.vector_store %arg16[%c0_190, %c0_191, %c0_192], %131 {strides = array<i32>} : memref<8x8x128xf32, #tpu.memory_space<vmem>>, vector<8x8x128xf32>,
    %c0_193 = arith.constant 0 : index
    %c0_194 = arith.constant 0 : index
    %c0_195 = arith.constant 0 : index
    %133 = tpu.strided_load %arg16[%c0_193, %c0_194, %c0_195] {strides = array<i32: 1, 2, 1>} : memref<8x8x128xf32, #tpu.memory_space<vmem>>, vector<8x4x128xf32>
    %c0_196 = arith.constant 0 : index
    %c1_197 = arith.constant 1 : index
    %c0_198 = arith.constant 0 : index
    %134 = tpu.strided_load %arg16[%c0_196, %c1_197, %c0_198] {strides = array<i32: 1, 2, 1>} : memref<8x8x128xf32, #tpu.memory_space<vmem>>, vector<8x4x128xf32>
    %135 = arith.maximumf %133, %134 : vector<8x4x128xf32>
    %136 = vector.shape_cast %135 : vector<8x4x128xf32> to vector<32x128xf32>
    %c64_i32 = arith.constant 64 : i32
    %137 = tpu.dynamic_rotate %136 by %c64_i32 dim 1 : vector<32x128xf32>, i32 -> vector<32x128xf32>
    %138 = arith.maximumf %136, %137 : vector<32x128xf32>
    %c0_199 = arith.constant 0 : index
    %c0_200 = arith.constant 0 : index
    %139 = vector.load %arg5[%c0_199, %c0_200] : memref<1x128xf32, #tpu.memory_space<vmem>>, vector<1x128xf32>
    %140 = vector.broadcast %139 : vector<1x128xf32> to vector<32x128xf32>
    %141 = arith.addf %138, %140 : vector<32x128xf32>
    %cst_201 = arith.constant 0.000000e+00 : f32
    %142 = vector.broadcast %cst_201 : f32 to vector<32x128xf32>
    %143 = arith.maximumf %141, %142 : vector<32x128xf32>
    %144 = vector.shape_cast %143 : vector<32x128xf32> to vector<8x4x128xf32>
    %c0_202 = arith.constant 0 : index
    %c0_203 = arith.constant 0 : index
    %c0_204 = arith.constant 0 : index
    %145 = vector.load %arg17[%c0_202, %c0_203, %c0_204] : memref<8x4x128xf32, #tpu.memory_space<vmem>>, vector<8x4x128xf32>
    tpu.vector_store %arg17[%c0_202, %c0_203, %c0_204], %144 {strides = array<i32>} : memref<8x4x128xf32, #tpu.memory_space<vmem>>, vector<8x4x128xf32>,
    %c0_205 = arith.constant 0 : index
    %c0_206 = arith.constant 0 : index
    %c0_207 = arith.constant 0 : index
    %146 = vector.load %arg17[%c0_205, %c0_206, %c0_207] : memref<8x4x128xf32, #tpu.memory_space<vmem>>, vector<8x1x128xf32>
    %147 = vector.shape_cast %146 : vector<8x1x128xf32> to vector<8x128xf32>
    %c0_208 = arith.constant 0 : index
    %c0_209 = arith.constant 0 : index
    %c0_210 = arith.constant 0 : index
    %148 = vector.load %arg6[%c0_208, %c0_209, %c0_210] : memref<4x128x120xf32, #tpu.memory_space<vmem>>, vector<1x128x120xf32>
    %149 = vector.shape_cast %148 : vector<1x128x120xf32> to vector<128x120xf32>
    %cst_211 = arith.constant dense<0.000000e+00> : vector<8x120xf32>
    %150 = tpu.matmul %147, %149, %cst_211 {dimension_numbers = #tpu.dot_dimension_numbers<[1], [0], [0], [1], [0, 0, 1, 1], [], []>} : vector<8x128xf32>, vector<128x120xf32>, vector<8x120xf32> -> vector<8x120xf32>
    %c0_212 = arith.constant 0 : index
    %c1_213 = arith.constant 1 : index
    %c0_214 = arith.constant 0 : index
    %151 = vector.load %arg17[%c0_212, %c1_213, %c0_214] : memref<8x4x128xf32, #tpu.memory_space<vmem>>, vector<8x1x128xf32>
    %152 = vector.shape_cast %151 : vector<8x1x128xf32> to vector<8x128xf32>
    %c1_215 = arith.constant 1 : index
    %c0_216 = arith.constant 0 : index
    %c0_217 = arith.constant 0 : index
    %153 = vector.load %arg6[%c1_215, %c0_216, %c0_217] : memref<4x128x120xf32, #tpu.memory_space<vmem>>, vector<1x128x120xf32>
    %154 = vector.shape_cast %153 : vector<1x128x120xf32> to vector<128x120xf32>
    %cst_218 = arith.constant dense<0.000000e+00> : vector<8x120xf32>
    %155 = tpu.matmul %152, %154, %cst_218 {dimension_numbers = #tpu.dot_dimension_numbers<[1], [0], [0], [1], [0, 0, 1, 1], [], []>} : vector<8x128xf32>, vector<128x120xf32>, vector<8x120xf32> -> vector<8x120xf32>
    %156 = arith.addf %150, %155 : vector<8x120xf32>
    %c0_219 = arith.constant 0 : index
    %c2_220 = arith.constant 2 : index
    %c0_221 = arith.constant 0 : index
    %157 = vector.load %arg17[%c0_219, %c2_220, %c0_221] : memref<8x4x128xf32, #tpu.memory_space<vmem>>, vector<8x1x128xf32>
    %158 = vector.shape_cast %157 : vector<8x1x128xf32> to vector<8x128xf32>
    %c2_222 = arith.constant 2 : index
    %c0_223 = arith.constant 0 : index
    %c0_224 = arith.constant 0 : index
    %159 = vector.load %arg6[%c2_222, %c0_223, %c0_224] : memref<4x128x120xf32, #tpu.memory_space<vmem>>, vector<1x128x120xf32>
    %160 = vector.shape_cast %159 : vector<1x128x120xf32> to vector<128x120xf32>
    %cst_225 = arith.constant dense<0.000000e+00> : vector<8x120xf32>
    %161 = tpu.matmul %158, %160, %cst_225 {dimension_numbers = #tpu.dot_dimension_numbers<[1], [0], [0], [1], [0, 0, 1, 1], [], []>} : vector<8x128xf32>, vector<128x120xf32>, vector<8x120xf32> -> vector<8x120xf32>
    %162 = arith.addf %156, %161 : vector<8x120xf32>
    %c0_226 = arith.constant 0 : index
    %c3_227 = arith.constant 3 : index
    %c0_228 = arith.constant 0 : index
    %163 = vector.load %arg17[%c0_226, %c3_227, %c0_228] : memref<8x4x128xf32, #tpu.memory_space<vmem>>, vector<8x1x128xf32>
    %164 = vector.shape_cast %163 : vector<8x1x128xf32> to vector<8x128xf32>
    %c3_229 = arith.constant 3 : index
    %c0_230 = arith.constant 0 : index
    %c0_231 = arith.constant 0 : index
    %165 = vector.load %arg6[%c3_229, %c0_230, %c0_231] : memref<4x128x120xf32, #tpu.memory_space<vmem>>, vector<1x128x120xf32>
    %166 = vector.shape_cast %165 : vector<1x128x120xf32> to vector<128x120xf32>
    %cst_232 = arith.constant dense<0.000000e+00> : vector<8x120xf32>
    %167 = tpu.matmul %164, %166, %cst_232 {dimension_numbers = #tpu.dot_dimension_numbers<[1], [0], [0], [1], [0, 0, 1, 1], [], []>} : vector<8x128xf32>, vector<128x120xf32>, vector<8x120xf32> -> vector<8x120xf32>
    %168 = arith.addf %162, %167 : vector<8x120xf32>
    %c0_233 = arith.constant 0 : index
    %c0_234 = arith.constant 0 : index
    %169 = vector.load %arg7[%c0_233, %c0_234] : memref<1x120xf32, #tpu.memory_space<vmem>>, vector<1x120xf32>
    %170 = vector.broadcast %169 : vector<1x120xf32> to vector<8x120xf32>
    %171 = arith.addf %168, %170 : vector<8x120xf32>
    %cst_235 = arith.constant 0.000000e+00 : f32
    %172 = vector.broadcast %cst_235 : f32 to vector<8x120xf32>
    %173 = arith.maximumf %171, %172 : vector<8x120xf32>
    %c0_236 = arith.constant 0 : index
    %c0_237 = arith.constant 0 : index
    %174 = vector.load %arg8[%c0_236, %c0_237] : memref<120x84xf32, #tpu.memory_space<vmem>>, vector<120x84xf32>
    %cst_238 = arith.constant dense<0.000000e+00> : vector<8x84xf32>
    %175 = tpu.matmul %173, %174, %cst_238 {dimension_numbers = #tpu.dot_dimension_numbers<[1], [0], [0], [1], [0, 0, 1, 1], [], []>} : vector<8x120xf32>, vector<120x84xf32>, vector<8x84xf32> -> vector<8x84xf32>
    %c0_239 = arith.constant 0 : index
    %c0_240 = arith.constant 0 : index
    %176 = vector.load %arg9[%c0_239, %c0_240] : memref<1x84xf32, #tpu.memory_space<vmem>>, vector<1x84xf32>
    %177 = vector.broadcast %176 : vector<1x84xf32> to vector<8x84xf32>
    %178 = arith.addf %175, %177 : vector<8x84xf32>
    %cst_241 = arith.constant 0.000000e+00 : f32
    %179 = vector.broadcast %cst_241 : f32 to vector<8x84xf32>
    %180 = arith.maximumf %178, %179 : vector<8x84xf32>
    %c0_242 = arith.constant 0 : index
    %c0_243 = arith.constant 0 : index
    %181 = vector.load %arg10[%c0_242, %c0_243] : memref<84x128xf32, #tpu.memory_space<vmem>>, vector<84x128xf32>
    %cst_244 = arith.constant dense<0.000000e+00> : vector<8x128xf32>
    %182 = tpu.matmul %180, %181, %cst_244 {dimension_numbers = #tpu.dot_dimension_numbers<[1], [0], [0], [1], [0, 0, 1, 1], [], []>} : vector<8x84xf32>, vector<84x128xf32>, vector<8x128xf32> -> vector<8x128xf32>
    %c0_245 = arith.constant 0 : index
    %c0_246 = arith.constant 0 : index
    %183 = vector.load %arg11[%c0_245, %c0_246] : memref<1x128xf32, #tpu.memory_space<vmem>>, vector<1x128xf32>
    %184 = vector.broadcast %183 : vector<1x128xf32> to vector<8x128xf32>
    %185 = arith.addf %182, %184 : vector<8x128xf32>
    %c0_247 = arith.constant 0 : index
    %c0_248 = arith.constant 0 : index
    %186 = vector.load %arg12[%c0_247, %c0_248] : memref<8x128xf32, #tpu.memory_space<vmem>>, vector<8x128xf32>
    tpu.vector_store %arg12[%c0_247, %c0_248], %185 {strides = array<i32>} : memref<8x128xf32, #tpu.memory_space<vmem>>, vector<8x128xf32>,
    return
  }
  func.func @transform_0(%arg0: i32) -> (i32, i32, i32) {
    %c0_i32 = arith.constant 0 : i32
    %c0_i32_0 = arith.constant 0 : i32
    %c0_i32_1 = arith.constant 0 : i32
    return %arg0, %c0_i32, %c0_i32_0 : i32, i32, i32
  }
  func.func @transform_1(%arg0: i32) -> (i32, i32, i32, i32) {
    %c0_i32 = arith.constant 0 : i32
    %c0_i32_0 = arith.constant 0 : i32
    %c0_i32_1 = arith.constant 0 : i32
    %c0_i32_2 = arith.constant 0 : i32
    %c0_i32_3 = arith.constant 0 : i32
    return %c0_i32, %c0_i32_0, %c0_i32_1, %c0_i32_2 : i32, i32, i32, i32
  }
  func.func @transform_2(%arg0: i32) -> (i32, i32) {
    %c0_i32 = arith.constant 0 : i32
    %c0_i32_0 = arith.constant 0 : i32
    %c0_i32_1 = arith.constant 0 : i32
    return %c0_i32, %c0_i32_0 : i32, i32
  }
  func.func @transform_3(%arg0: i32) -> (i32, i32, i32) {
    %c0_i32 = arith.constant 0 : i32
    %c0_i32_0 = arith.constant 0 : i32
    %c0_i32_1 = arith.constant 0 : i32
    %c0_i32_2 = arith.constant 0 : i32
    return %c0_i32, %c0_i32_0, %c0_i32_1 : i32, i32, i32
  }
  func.func @transform_4(%arg0: i32) -> (i32, i32) {
    %c0_i32 = arith.constant 0 : i32
    %c0_i32_0 = arith.constant 0 : i32
    %c0_i32_1 = arith.constant 0 : i32
    return %c0_i32, %c0_i32_0 : i32, i32
  }
  func.func @transform_5(%arg0: i32) -> (i32, i32, i32) {
    %c0_i32 = arith.constant 0 : i32
    %c0_i32_0 = arith.constant 0 : i32
    %c0_i32_1 = arith.constant 0 : i32
    %c0_i32_2 = arith.constant 0 : i32
    return %c0_i32, %c0_i32_0, %c0_i32_1 : i32, i32, i32
  }
  func.func @transform_6(%arg0: i32) -> (i32, i32) {
    %c0_i32 = arith.constant 0 : i32
    %c0_i32_0 = arith.constant 0 : i32
    %c0_i32_1 = arith.constant 0 : i32
    return %c0_i32, %c0_i32_0 : i32, i32
  }
  func.func @transform_7(%arg0: i32) -> (i32, i32) {
    %c0_i32 = arith.constant 0 : i32
    %c0_i32_0 = arith.constant 0 : i32
    %c0_i32_1 = arith.constant 0 : i32
    return %c0_i32, %c0_i32_0 : i32, i32
  }
  func.func @transform_8(%arg0: i32) -> (i32, i32) {
    %c0_i32 = arith.constant 0 : i32
    %c0_i32_0 = arith.constant 0 : i32
    %c0_i32_1 = arith.constant 0 : i32
    return %c0_i32, %c0_i32_0 : i32, i32
  }
  func.func @transform_9(%arg0: i32) -> (i32, i32) {
    %c0_i32 = arith.constant 0 : i32
    %c0_i32_0 = arith.constant 0 : i32
    %c0_i32_1 = arith.constant 0 : i32
    return %c0_i32, %c0_i32_0 : i32, i32
  }
  func.func @transform_10(%arg0: i32) -> (i32, i32) {
    %c0_i32 = arith.constant 0 : i32
    %c0_i32_0 = arith.constant 0 : i32
    %c0_i32_1 = arith.constant 0 : i32
    return %c0_i32, %c0_i32_0 : i32, i32
  }
  func.func @transform_11(%arg0: i32) -> (i32, i32) {
    %c0_i32 = arith.constant 0 : i32
    %c0_i32_0 = arith.constant 0 : i32
    return %arg0, %c0_i32 : i32, i32
  }
}

</mosaic_0001>

<bundles_post_ra>
// kernel: simple_convnet_forward.1
= control target key start
LH: loop header
LB: loop body
LE: loop exit
PB: predicated region body
PF: predicated region fallthrough
CT: control target
= control target key end

     0   :  { %vm139_vm0 = vcmask 1043456   ;;  %vm6964_vm1 = vmmov 1   ;;  %vm66_vm3 = vcmask 228352   ;;  %vm521_vm4 = vcmask 588800   ;;  %s6966_s27 = smov 64   ;;  %s8684_s1 = inlined_call_operand.vmem [shape: f32[5,2,28,72], index: 1, kind: input, shape index: {}]   ;;  %s8685_s0 = inlined_call_operand.vmem [shape: f32[8,28,28], index: 0, kind: input, shape index: {}]   ;;  %s8686_s3 = inlined_call_operand.vmem [shape: f32[5,72,128], index: 3, kind: input, shape index: {}]   ;;  %s8687_s2 = inlined_call_operand.vmem [shape: f32[1,72], index: 2, kind: input, shape index: {}]   ;;  %s8688_s5 = inlined_call_operand.vmem [shape: f32[4,128,120], index: 5, kind: input, shape index: {}]   ;;  %s8689_s4 = inlined_call_operand.vmem [shape: f32[1,128], index: 4, kind: input, shape index: {}]   ;;  %s8690_s7 = inlined_call_operand.vmem [shape: f32[120,84], index: 7, kind: input, shape index: {}]   ;;  %s8691_s9 = inlined_call_operand.vmem [shape: f32[84,128], index: 9, kind: input, shape index: {}]   ;;  %s8692_s6 = inlined_call_operand.vmem [shape: f32[1,120], index: 6, kind: input, shape index: {}]   ;;  %s8693_s8 = inlined_call_operand.vmem [shape: f32[1,84], index: 8, kind: input, shape index: {}]   ;;  %s8694_s10 = inlined_call_operand.vmem [shape: f32[1,128], index: 10, kind: input, shape index: {}]   ;;  %s8695_s11 = inlined_call_operand.vmem [shape: f32[8,128], index: 11, kind: output, shape index: {}]  }
   0x1   :  { %v62_v0 = vld [vmem:[%s8684_s1] sm:$0xff]  ;;  %v63_v1 = vld [vmem:[%s8684_s1 + $0x8] sm:$0xff]  ;;  %v64_v5 = vld [vmem:[%s8684_s1 + $0x10] sm:$0xff]  ;;  %vm3288_vm5 = vcmask 584704   ;;  %vm6967_vm6 = vmmov 0   ;;  %vm4316_vm7 = vcmask 1041409  }
   0x2   :  { %v4969_v2 = vld [vmem:[%s8684_s1 + $0x20] sm:$0xff]  ;;  %v6611_v3 = vpack.c.bf16 %v63_v1, %v62_v0  ;;  %v4970_v4 = vld [vmem:[%s8684_s1 + $0x28] sm:$0xff]  ;;  %v65_v6 = vld [vmem:[%s8684_s1 + $0x18] sm:$0xf]  ;;  %vm4319_vm8 = vcmask 1042434   ;;  %vm4322_vm9 = vcmask 1043459  }
   0x3   :  { %v6621_v7 = vpack.c.bf16 %v4970_v4, %v4969_v2  ;;  %v6615_v8 = vpack.c.bf16 %v65_v6, %v64_v5  ;;  %vm7048_vm2 = vmpackc.low %vm139_vm0, %vm6964_vm1  ;;  %v4971_v10 = vld [vmem:[%s8684_s1 + $0x30] sm:$0xff]  ;;  %v4972_v11 = vld [vmem:[%s8684_s1 + $0x38] sm:$0xf]  ;;  %vm4325_vm10 = vcmask 1044484   ;;  %vm4328_vm11 = vcmask 1045509  }
   0x4   :  { %6612 = vmatprep.subr.bf16.mxu0 %v6611_v3  ;;  %v6625_v12 = vpack.c.bf16 %v4972_v11, %v4971_v10  ;;  %v7061_v13 = vld [vmem:[%s8685_s0] sm:$0xff]  ;;  %v42_v14 = vld [vmem:[%s8685_s0 + $0x28] sm:$0xff]  ;;  %v43_v18 = vld [vmem:[%s8685_s0 + $0x30] sm:$0xff]  ;;  %vm4331_vm12 = vcmask 1046534   ;;  %vm4334_vm13 = vcmask 1047559   ;;  %vm4769_vm14 = vcmask 982016  }
   0x5   :  { %6923 = vmatprep.subr.bf16.mxu1 %v6621_v7  ;;  %6614 = vmatpush3.bf16.msra.mxu0 %v6611_v3  ;;  %v5027_v15 = vld [vmem:[%s8684_s1 + $0x60] sm:$0xff]  ;;  %v7081_v16 = vld [vmem:[%s8685_s0 + $0x8] sm:$0xff]  ;;  %v7094_v20 = vld [vmem:[%s8685_s0 + $0x10] sm:$0xff]  ;;  %vm4862_vm15 = vcmask 687104  }
   0x6   :  { %6925 = vmatpush3.bf16.msra.mxu1 %v6621_v7  ;;  %6617 = vmatprep.subr.msk.bf16.mxu0 %vm7048_vm2, %v6615_v8  ;;  %v5028_v17 = vld [vmem:[%s8684_s1 + $0x68] sm:$0xff]  ;;  %v44_v21 = vld [vmem:[%s8685_s0 + $0x40] sm:$0xff]  ;;  %v5029_v22 = vld [vmem:[%s8684_s1 + $0x70] sm:$0xff] }
   0x7   :  { %6924 = vmatprep.subr.msk.bf16.mxu1 %vm7048_vm2, %v6625_v12  ;;  %5831 = vmatprep.mubr.msk.f32.mxu0 %vm66_vm3, %v7061_v13  ;;  %v6641_v19 = vpack.c.bf16 %v5028_v17, %v5027_v15  ;;  %v7108_v23 = vld [vmem:[%s8685_s0 + $0x20] sm:$0xff]  ;;  %v5030_v24 = vld [vmem:[%s8684_s1 + $0x78] sm:$0xf]  ;;  %v45_v25 = vld [vmem:[%s8685_s0 + $0x48] sm:$0xff] }
   0x8   :  { %5881 = vmatprep.mubr.msk.f32.mxu1 %vm66_vm3, %v42_v14  ;;  %v6645_v26 = vpack.c.bf16 %v5030_v24, %v5029_v22  ;;  %v46_v27 = vld [vmem:[%s8685_s0 + $0x50] sm:$0xff]  ;;  %v4998_v28 = vld [vmem:[%s8684_s1 + $0x40] sm:$0xff]  ;;  %v4999_v29 = vld [vmem:[%s8684_s1 + $0x48] sm:$0xff] }
   0x9   :  { %6620 = vmatpush3.bf16.msk.msra.mxu0 %vm7048_vm2, %v6615_v8  ;;  %v7134_v30 = vpack.c.bf16 %v4999_v29, %v4998_v28  ;;  %v47_v31 = vld [vmem:[%s8685_s0 + $0x60] sm:$0xff]  ;;  %v48_v33 = vld [vmem:[%s8685_s0 + $0x68] sm:$0xff]  ;;  %v49_v36 = vld [vmem:[%s8685_s0 + $0x70] sm:$0xff] }
   0xa   :  { %6926 = vmatpush3.bf16.msk.msra.mxu1 %vm7048_vm2, %v6625_v12  ;;  %6622 = vmatprep.subr.bf16.mxu0 %v6621_v7  ;;  %v5085_v32 = vld [vmem:[%s8684_s1 + $0xa0] sm:$0xff]  ;;  %v5086_v34 = vld [vmem:[%s8684_s1 + $0xa8] sm:$0xff]  ;;  %v52_v39 = vld [vmem:[%s8685_s0 + $0x90] sm:$0xff] }
   0xb   :  { %6642 = vmatprep.subr.bf16.mxu1 %v6641_v19  ;;  %v6661_v35 = vpack.c.bf16 %v5086_v34, %v5085_v32  ;;  %v50_v37 = vld [vmem:[%s8685_s0 + $0x80] sm:$0xff]  ;;  %v51_v38 = vld [vmem:[%s8685_s0 + $0x88] sm:$0xff]  ;;  %v55_v42 = vld [vmem:[%s8685_s0 + $0xb0] sm:$0xff] }
   0xc   :  { %5832 = vmatmul.mubr.msk.f32.vlgmr.msra.gmra.mrb[0].mxu0 %vm66_vm3, %v7081_v16  ;;  %v53_v40 = vld [vmem:[%s8685_s0 + $0xa0] sm:$0xff]  ;;  %v54_v41 = vld [vmem:[%s8685_s0 + $0xa8] sm:$0xff]  ;;  %v58_v45 = vld [vmem:[%s8685_s0 + $0xd0] sm:$0xff] }
   0xd   :  { %5882 = vmatmul.mubr.msk.f32.vlgmr.msra.gmra.mrb[0].mxu1 %vm66_vm3, %v43_v18  ;;  %6624 = vmatpush3.bf16.msra.mxu0 %v6621_v7  ;;  %v56_v43 = vld [vmem:[%s8685_s0 + $0xc0] sm:$0xff]  ;;  %v57_v44 = vld [vmem:[%s8685_s0 + $0xc8] sm:$0xff]  ;;  %v61_v48 = vld [vmem:[%s8685_s0 + $0xf0] sm:$0xff] }
   0xe   :  { %5834 = vmatprep.mubr.msk.f32.mxu0 %vm66_vm3, %v7094_v20  ;;  %5884 = vmatprep.mubr.msk.f32.mxu1 %vm66_vm3, %v44_v21  ;;  %v59_v46 = vld [vmem:[%s8685_s0 + $0xe0] sm:$0xff]  ;;  %v60_v47 = vld [vmem:[%s8685_s0 + $0xe8] sm:$0xff]  ;;  %v5087_v50 = vld [vmem:[%s8684_s1 + $0xb0] sm:$0xff] }
   0xf   :  { %6644 = vmatpush3.bf16.msra.mxu1 %v6641_v19  ;;  %6627 = vmatprep.subr.msk.bf16.mxu0 %vm7048_vm2, %v6625_v12  ;;  %v570_v49 = vld [vmem:[%s8685_s0 + $0x1] sm:$0xff]  ;;  %v5088_v51 = vld [vmem:[%s8684_s1 + $0xb8] sm:$0xf]  ;;  %v571_v52 = vld [vmem:[%s8685_s0 + $0x9] sm:$0xff] }
  0x10   :  { %5835 = vmatmul.mubr.msk.f32.gmra.mrb[2].mxu0 %vm66_vm3, %v7108_v23  ;;  %6647 = vmatprep.subr.msk.bf16.mxu1 %vm7048_vm2, %v6645_v26  ;;  %v572_v53 = vld [vmem:[%s8685_s0 + $0x11] sm:$0xff]  ;;  %v6665_v54 = vpack.c.bf16 %v5088_v51, %v5087_v50  ;;  %v5143_v55 = vld [vmem:[%s8684_s1 + $0xe0] sm:$0xff]  ;;  %v5144_v56 = vld [vmem:[%s8684_s1 + $0xe8] sm:$0xff] }
  0x11   :  { %5885 = vmatmul.mubr.msk.f32.gmra.mrb[2].mxu1 %vm66_vm3, %v45_v25  ;;  %5837 = vmatprep.mubr.msk.f32.mxu0 %vm66_vm3, %v42_v14  ;;  %v573_v57 = vld [vmem:[%s8685_s0 + $0x21] sm:$0xff]  ;;  %v574_v58 = vld [vmem:[%s8685_s0 + $0x29] sm:$0xff]  ;;  %v7260_v59 = vpack.c.bf16 %v5144_v56, %v5143_v55  ;;  %v5001_v61 = vld [vmem:[%s8684_s1 + $0x58] sm:$0xf] }
  0x12   :  { %5887 = vmatprep.mubr.msk.f32.mxu1 %vm66_vm3, %v46_v27  ;;  %6630 = vmatpush3.bf16.msk.msra.mxu0 %vm7048_vm2, %v6625_v12  ;;  %v5000_v60 = vld [vmem:[%s8684_s1 + $0x50] sm:$0xff]  ;;  %v576_v63 = vld [vmem:[%s8685_s0 + $0x41] sm:$0xff]  ;;  %v5059_v7 = vld [vmem:[%s8684_s1 + $0x98] sm:$0xf] }
  0x13   :  { %6650 = vmatpush3.bf16.msk.msra.mxu1 %vm7048_vm2, %v6645_v26  ;;  %6632 = vmatprep.subr.bf16.mxu0 %v7134_v30  ;;  %v575_v62 = vld [vmem:[%s8685_s0 + $0x31] sm:$0xff]  ;;  %v6635_v0 = vpack.c.bf16 %v5001_v61, %v5000_v60  ;;  %v5056_v1 = vld [vmem:[%s8684_s1 + $0x80] sm:$0xff]  ;;  %v5057_v2 = vld [vmem:[%s8684_s1 + $0x88] sm:$0xff] }
  0x14   :  { %5838 = vmatmul.mubr.msk.f32.gmra.mrb[4].mxu0 %vm66_vm3, %v43_v18  ;;  %6662 = vmatprep.subr.bf16.mxu1 %v6661_v35  ;;  %v577_v3 = vld [vmem:[%s8685_s0 + $0x49] sm:$0xff]  ;;  %v578_v4 = vld [vmem:[%s8685_s0 + $0x51] sm:$0xff]  ;;  %v6651_v5 = vpack.c.bf16 %v5057_v2, %v5056_v1  ;;  %v579_v8 = vld [vmem:[%s8685_s0 + $0x61] sm:$0xff] }
  0x15   :  { %5888 = vmatmul.mubr.msk.f32.gmra.mrb[4].mxu1 %vm66_vm3, %v47_v31  ;;  %5840 = vmatprep.mubr.msk.f32.mxu0 %vm66_vm3, %v44_v21  ;;  %v5058_v6 = vld [vmem:[%s8684_s1 + $0x90] sm:$0xff]  ;;  %v5114_v12 = vld [vmem:[%s8684_s1 + $0xc0] sm:$0xff]  ;;  %v5204_v2 = vld [vmem:[%s8684_s1 + $0x138] sm:$0xf] }
  0x16   :  { %5890 = vmatprep.mubr.msk.f32.mxu1 %vm66_vm3, %v48_v33  ;;  %v580_v10 = vld [vmem:[%s8685_s0 + $0x69] sm:$0xff]  ;;  %v6655_v11 = vpack.c.bf16 %v5059_v7, %v5058_v6  ;;  %v581_v14 = vld [vmem:[%s8685_s0 + $0x71] sm:$0xff]  ;;  %v582_v15 = vld [vmem:[%s8685_s0 + $0x81] sm:$0xff] }
  0x17   :  { %v583_v17 = vld [vmem:[%s8685_s0 + $0x89] sm:$0xff]  ;;  %v584_v18 = vld [vmem:[%s8685_s0 + $0x91] sm:$0xff]  ;;  %v585_v19 = vld [vmem:[%s8685_s0 + $0xa1] sm:$0xff] }
  0x18   :  { %5841 = vmatmul.mubr.msk.f32.gmra.mrb[6].mxu0 %vm66_vm3, %v45_v25  ;;  %v587_v21 = vld [vmem:[%s8685_s0 + $0xb1] sm:$0xff]  ;;  %v588_v22 = vld [vmem:[%s8685_s0 + $0xc1] sm:$0xff]  ;;  %v592_v26 = vld [vmem:[%s8685_s0 + $0xe9] sm:$0xff] }
  0x19   :  { %5891 = vmatmul.mubr.msk.f32.gmra.mrb[6].mxu1 %vm66_vm3, %v49_v36  ;;  %5843 = vmatprep.mubr.msk.f32.mxu0 %vm66_vm3, %v46_v27  ;;  %v590_v24 = vld [vmem:[%s8685_s0 + $0xd1] sm:$0xff]  ;;  %v591_v25 = vld [vmem:[%s8685_s0 + $0xe1] sm:$0xff] }
  0x1a   :  { %5893 = vmatprep.mubr.msk.f32.mxu1 %vm66_vm3, %v50_v37  ;;  %v593_v27 = vld [vmem:[%s8685_s0 + $0xf1] sm:$0xff]  ;;  %v1196_v28 = vld [vmem:[%s8685_s0 + $0x2] sm:$0xff] }
  0x1b   :  { %v5145_v29 = vld [vmem:[%s8684_s1 + $0xf0] sm:$0xff]  ;;  %v5201_v34 = vld [vmem:[%s8684_s1 + $0x120] sm:$0xff] }
  0x1c   :  { %5844 = vmatmul.mubr.msk.f32.gmra.mrb[8].mxu0 %vm66_vm3, %v47_v31  ;;  %v1197_v31 = vld [vmem:[%s8685_s0 + $0xa] sm:$0xff]  ;;  %v1198_v32 = vld [vmem:[%s8685_s0 + $0x12] sm:$0xff]  ;;  %v1208_v51 = vld [vmem:[%s8685_s0 + $0x82] sm:$0xff] }
  0x1d   :  { %5894 = vmatmul.mubr.msk.f32.gmra.mrb[8].mxu1 %vm66_vm3, %v51_v38  ;;  %5846 = vmatprep.mubr.msk.f32.mxu0 %vm66_vm3, %v48_v33  ;;  %v1207_v50 = vld [vmem:[%s8685_s0 + $0x72] sm:$0xff]  ;;  %v1211_v55 = vld [vmem:[%s8685_s0 + $0xa2] sm:$0xff]  ;;  %v1212_v56 = vld [vmem:[%s8685_s0 + $0xaa] sm:$0xff] }
  0x1e   :  { %5896 = vmatprep.mubr.msk.f32.mxu1 %vm66_vm3, %v52_v39  ;;  %v1216_v60 = vld [vmem:[%s8685_s0 + $0xd2] sm:$0xff]  ;;  %v1217_v61 = vld [vmem:[%s8685_s0 + $0xe2] sm:$0xff] }
  0x1f   :  { %v5203_v1 = vld [vmem:[%s8684_s1 + $0x130] sm:$0xff]  ;;  %v1825_v6 = vld [vmem:[%s8685_s0 + $0x23] sm:$0xff] }
  0x20   :  { %5847 = vmatmul.mubr.msk.f32.gmra.mrb[10].mxu0 %vm66_vm3, %v49_v36  ;;  %v1199_v36 = vld [vmem:[%s8685_s0 + $0x22] sm:$0xff]  ;;  %v1826_v7 = vld [vmem:[%s8685_s0 + $0x2b] sm:$0xff] }
  0x21   :  { %5897 = vmatmul.mubr.msk.f32.gmra.mrb[10].mxu1 %vm66_vm3, %v53_v40  ;;  %5849 = vmatprep.mubr.msk.f32.mxu0 %vm66_vm3, %v50_v37  ;;  %v1200_v37 = vld [vmem:[%s8685_s0 + $0x2a] sm:$0xff] }
  0x22   :  { %5899 = vmatprep.mubr.msk.f32.mxu1 %vm66_vm3, %v54_v41  ;;  %v1838_v9 = vld [vmem:[%s8685_s0 + $0xab] sm:$0xff] }
  0x24   :  { %5850 = vmatmul.mubr.msk.f32.gmra.mrb[12].mxu0 %vm66_vm3, %v51_v38 }
  0x25   :  { %5900 = vmatmul.mubr.msk.f32.gmra.mrb[12].mxu1 %vm66_vm3, %v55_v42  ;;  %5852 = vmatprep.mubr.msk.f32.mxu0 %vm66_vm3, %v52_v39  ;;  %v1201_v39 = vld [vmem:[%s8685_s0 + $0x32] sm:$0xff] }
  0x26   :  { %5902 = vmatprep.mubr.msk.f32.mxu1 %vm66_vm3, %v56_v43 }
  0x28   :  { %5853 = vmatmul.mubr.msk.f32.gmra.mrb[14].mxu0 %vm66_vm3, %v53_v40  ;;  %v1202_v40 = vld [vmem:[%s8685_s0 + $0x42] sm:$0xff] }
  0x29   :  { %5903 = vmatmul.mubr.msk.f32.gmra.mrb[14].mxu1 %vm66_vm3, %v57_v44  ;;  %5855 = vmatprep.mubr.msk.f32.mxu0 %vm66_vm3, %v54_v41  ;;  %v1203_v41 = vld [vmem:[%s8685_s0 + $0x4a] sm:$0xff] }
  0x2a   :  { %5905 = vmatprep.mubr.msk.f32.mxu1 %vm66_vm3, %v58_v45 }
  0x2c   :  { %5856 = vmatmul.mubr.msk.f32.gmra.mrb[16].mxu0 %vm66_vm3, %v55_v42  ;;  %v1204_v42 = vld [vmem:[%s8685_s0 + $0x52] sm:$0xff] }
  0x2d   :  { %5906 = vmatmul.mubr.msk.f32.gmra.mrb[16].mxu1 %vm66_vm3, %v59_v46  ;;  %5858 = vmatprep.mubr.msk.f32.mxu0 %vm66_vm3, %v56_v43  ;;  %v5116_v43 = vld [vmem:[%s8684_s1 + $0xd0] sm:$0xff] }
  0x2e   :  { %5908 = vmatprep.mubr.msk.f32.mxu1 %vm66_vm3, %v60_v47 }
  0x30   :  { %5859 = vmatmul.mubr.msk.f32.gmra.mrb[18].mxu0 %vm66_vm3, %v57_v44  ;;  %v5117_v44 = vld [vmem:[%s8684_s1 + $0xd8] sm:$0xf] }
  0x31   :  { %5909 = vmatmul.mubr.msk.f32.gmra.mrb[18].mxu1 %vm66_vm3, %v61_v48  ;;  %5861 = vmatprep.mubr.msk.f32.mxu0 %vm66_vm3, %v58_v45  ;;  %v1205_v45 = vld [vmem:[%s8685_s0 + $0x62] sm:$0xff] }
  0x32   :  { %5963 = vmatprep.mubr.msk.f32.mxu1 %vm66_vm3, %v570_v49 }
  0x34   :  { %5862 = vmatmul.mubr.msk.f32.gmra.mrb[20].mxu0 %vm66_vm3, %v59_v46  ;;  %v1206_v46 = vld [vmem:[%s8685_s0 + $0x6a] sm:$0xff] }
  0x35   :  { %5964 = vmatmul.mubr.msk.f32.vlgmr.msra.gmra.mrb[20].mxu1 %vm66_vm3, %v571_v52  ;;  %5864 = vmatprep.mubr.msk.f32.mxu0 %vm66_vm3, %v60_v47  ;;  %v6675_v47 = vpack.c.bf16 %v5117_v44, %v5116_v43  ;;  %v2461_v43 = vld [vmem:[%s8685_s0 + $0x8c] sm:$0xff]  ;;  %v2462_v44 = vld [vmem:[%s8685_s0 + $0x94] sm:$0xff] }
  0x36   :  { %5966 = vmatprep.mubr.msk.f32.mxu1 %vm66_vm3, %v572_v53  ;;  %6664 = vmatpush3.bf16.msra.mxu1 %v6661_v35  ;;  %v5202_v35 = vld [vmem:[%s8684_s1 + $0x128] sm:$0xff] }
  0x37   :  { %6667 = vmatprep.subr.msk.bf16.mxu1 %vm7048_vm2, %v6665_v54  ;;  %v7440_v38 = vpack.c.bf16 %v5202_v35, %v5201_v34  ;;  %v2452_v34 = vld [vmem:[%s8685_s0 + $0x2c] sm:$0xff]  ;;  %v2453_v35 = vld [vmem:[%s8685_s0 + $0x34] sm:$0xff] }
  0x38   :  { %5865 = vmatmul.mubr.msk.f32.gmra.mrb[22].mxu0 %vm66_vm3, %v61_v48  ;;  %v5172_v48 = vld [vmem:[%s8684_s1 + $0x100] sm:$0xff] }
  0x39   :  { %5967 = vmatmul.mubr.msk.f32.gmra.mrb[22].mxu1 %vm66_vm3, %v573_v57  ;;  %5875 = vmatprep.mubr.msk.f32.mxu0 %vm66_vm3, %v7061_v13  ;;  %v5115_v13 = vld [vmem:[%s8684_s1 + $0xc8] sm:$0xff] }
  0x3a   :  { %5969 = vmatprep.mubr.msk.f32.mxu1 %vm66_vm3, %v574_v58  ;;  %6670 = vmatpush3.bf16.msk.msra.mxu1 %vm7048_vm2, %v6665_v54  ;;  %v1210_v54 = vld [vmem:[%s8685_s0 + $0x92] sm:$0xff] }
  0x3b   :  { %6682 = vmatprep.subr.bf16.mxu1 %v7260_v59 }
  0x3c   :  { %5876 = vmatmul.mubr.msk.f32.vlgmr.msra.gmra.mrb[24].mxu0 %vm66_vm3, %v7081_v16  ;;  %v7340_v16 = vpack.c.bf16 %v5115_v13, %v5114_v12  ;;  %v1830_v12 = vld [vmem:[%s8685_s0 + $0x53] sm:$0xff] }
  0x3d   :  { %5970 = vmatmul.mubr.msk.f32.gmra.mrb[24].mxu1 %vm66_vm3, %v575_v62  ;;  %6634 = vmatpush3.bf16.msra.mxu0 %v7134_v30  ;;  %v5146_v30 = vld [vmem:[%s8684_s1 + $0xf8] sm:$0xf]  ;;  %v5174_v13 = vld [vmem:[%s8684_s1 + $0x110] sm:$0xff] }
  0x3e   :  { %5878 = vmatprep.mubr.msk.f32.mxu0 %vm66_vm3, %v7094_v20  ;;  %5972 = vmatprep.mubr.msk.f32.mxu1 %vm66_vm3, %v576_v63  ;;  %v586_v20 = vld [vmem:[%s8685_s0 + $0xa9] sm:$0xff]  ;;  %v6685_v33 = vpack.c.bf16 %v5146_v30, %v5145_v29  ;;  %v1845_v29 = vld [vmem:[%s8685_s0 + $0xf3] sm:$0xff] }
  0x3f   :  { %6637 = vmatprep.subr.msk.bf16.mxu0 %vm7048_vm2, %v6635_v0  ;;  %v2448_v30 = vld [vmem:[%s8685_s0 + $0x4] sm:$0xff] }
  0x40   :  { %5879 = vmatmul.mubr.msk.f32.gmra.mrb[26].mxu0 %vm66_vm3, %v7108_v23  ;;  %v589_v23 = vld [vmem:[%s8685_s0 + $0xc9] sm:$0xff] }
  0x41   :  { %5973 = vmatmul.mubr.msk.f32.gmra.mrb[26].mxu1 %vm66_vm3, %v577_v3  ;;  %6640 = vmatpush3.bf16.msk.msra.mxu0 %vm7048_vm2, %v6635_v0  ;;  %v1822_v0 = vld [vmem:[%s8685_s0 + $0x3] sm:$0xff] }
  0x42   :  { %5919 = vmatprep.mubr.msk.f32.mxu0 %vm66_vm3, %v570_v49  ;;  %5975 = vmatprep.mubr.msk.f32.mxu1 %vm66_vm3, %v578_v4  ;;  %v5173_v49 = vld [vmem:[%s8684_s1 + $0x108] sm:$0xff] }
  0x43   :  { %6652 = vmatprep.subr.bf16.mxu0 %v6651_v5 }
  0x44   :  { %5920 = vmatmul.mubr.msk.f32.vlgmr.msra.gmra.mrb[28].mxu0 %vm66_vm3, %v571_v52  ;;  %v7500_v52 = vpack.c.bf16 %v5173_v49, %v5172_v48 }
  0x45   :  { %5976 = vmatmul.mubr.msk.f32.gmra.mrb[28].mxu1 %vm66_vm3, %v579_v8  ;;  %6654 = vmatpush3.bf16.msra.mxu0 %v6651_v5  ;;  %v6705_v5 = vpack.c.bf16 %v5204_v2, %v5203_v1  ;;  %v2470_v1 = vld [vmem:[%s8685_s0 + $0xec] sm:$0xff] }
  0x46   :  { %5922 = vmatprep.mubr.msk.f32.mxu0 %vm66_vm3, %v572_v53  ;;  %5978 = vmatprep.mubr.msk.f32.mxu1 %vm66_vm3, %v580_v10  ;;  %v1209_v53 = vld [vmem:[%s8685_s0 + $0x8a] sm:$0xff] }
  0x47   :  { %6657 = vmatprep.subr.msk.bf16.mxu0 %vm7048_vm2, %v6655_v11 }
  0x48   :  { %5923 = vmatmul.mubr.msk.f32.gmra.mrb[30].mxu0 %vm66_vm3, %v573_v57  ;;  %v1213_v57 = vld [vmem:[%s8685_s0 + $0xb2] sm:$0xff] }
  0x49   :  { %5979 = vmatmul.mubr.msk.f32.gmra.mrb[30].mxu1 %vm66_vm3, %v581_v14  ;;  %5925 = vmatprep.mubr.msk.f32.mxu0 %vm66_vm3, %v574_v58  ;;  %v1214_v58 = vld [vmem:[%s8685_s0 + $0xc2] sm:$0xff] }
  0x4a   :  { %5981 = vmatprep.mubr.msk.f32.mxu1 %vm66_vm3, %v582_v15  ;;  %6660 = vmatpush3.bf16.msk.msra.mxu0 %vm7048_vm2, %v6655_v11  ;;  %v1829_v11 = vld [vmem:[%s8685_s0 + $0x4b] sm:$0xff] }
  0x4b   :  { %6672 = vmatprep.subr.bf16.mxu0 %v7340_v16 }
  0x4c   :  { %5926 = vmatmul.mubr.msk.f32.gmra.mrb[32].mxu0 %vm66_vm3, %v575_v62  ;;  %v1218_v62 = vld [vmem:[%s8685_s0 + $0xea] sm:$0xff] }
  0x4d   :  { %5982 = vmatmul.mubr.msk.f32.gmra.mrb[32].mxu1 %vm66_vm3, %v583_v17  ;;  %5928 = vmatprep.mubr.msk.f32.mxu0 %vm66_vm3, %v576_v63  ;;  %v1219_v63 = vld [vmem:[%s8685_s0 + $0xf2] sm:$0xff] }
  0x4e   :  { %5984 = vmatprep.mubr.msk.f32.mxu1 %vm66_vm3, %v584_v18 }
  0x50   :  { %5929 = vmatmul.mubr.msk.f32.gmra.mrb[34].mxu0 %vm66_vm3, %v577_v3  ;;  %v1823_v3 = vld [vmem:[%s8685_s0 + $0xb] sm:$0xff] }
  0x51   :  { %5985 = vmatmul.mubr.msk.f32.gmra.mrb[34].mxu1 %vm66_vm3, %v585_v19  ;;  %5931 = vmatprep.mubr.msk.f32.mxu0 %vm66_vm3, %v578_v4  ;;  %v1824_v4 = vld [vmem:[%s8685_s0 + $0x13] sm:$0xff] }
  0x52   :  { %5987 = vmatprep.mubr.msk.f32.mxu1 %vm66_vm3, %v586_v20 }
  0x54   :  { %5932 = vmatmul.mubr.msk.f32.gmra.mrb[36].mxu0 %vm66_vm3, %v579_v8  ;;  %v1827_v8 = vld [vmem:[%s8685_s0 + $0x33] sm:$0xff] }
  0x55   :  { %5988 = vmatmul.mubr.msk.f32.gmra.mrb[36].mxu1 %vm66_vm3, %v587_v21  ;;  %5934 = vmatprep.mubr.msk.f32.mxu0 %vm66_vm3, %v580_v10  ;;  %v1828_v10 = vld [vmem:[%s8685_s0 + $0x43] sm:$0xff] }
  0x56   :  { %5990 = vmatprep.mubr.msk.f32.mxu1 %vm66_vm3, %v588_v22 }
  0x58   :  { %5935 = vmatmul.mubr.msk.f32.gmra.mrb[38].mxu0 %vm66_vm3, %v581_v14  ;;  %v5175_v14 = vld [vmem:[%s8684_s1 + $0x118] sm:$0xf] }
  0x59   :  { %5991 = vmatmul.mubr.msk.f32.gmra.mrb[38].mxu1 %vm66_vm3, %v589_v23  ;;  %5937 = vmatprep.mubr.msk.f32.mxu0 %vm66_vm3, %v582_v15  ;;  %v1831_v15 = vld [vmem:[%s8685_s0 + $0x63] sm:$0xff] }
  0x5a   :  { %5993 = vmatprep.mubr.msk.f32.mxu1 %vm66_vm3, %v590_v24 }
  0x5c   :  { %5938 = vmatmul.mubr.msk.f32.gmra.mrb[40].mxu0 %vm66_vm3, %v583_v17  ;;  %v6695_v17 = vpack.c.bf16 %v5175_v14, %v5174_v13 }
  0x5d   :  { %5994 = vmatmul.mubr.msk.f32.gmra.mrb[40].mxu1 %vm66_vm3, %v591_v25  ;;  %5940 = vmatprep.mubr.msk.f32.mxu0 %vm66_vm3, %v584_v18  ;;  %v1833_v18 = vld [vmem:[%s8685_s0 + $0x73] sm:$0xff] }
  0x5e   :  { %5996 = vmatprep.mubr.msk.f32.mxu1 %vm66_vm3, %v592_v26 }
  0x60   :  { %5941 = vmatmul.mubr.msk.f32.gmra.mrb[42].mxu0 %vm66_vm3, %v585_v19  ;;  %v1834_v19 = vld [vmem:[%s8685_s0 + $0x83] sm:$0xff] }
  0x61   :  { %5997 = vmatmul.mubr.msk.f32.gmra.mrb[42].mxu1 %vm66_vm3, %v593_v27  ;;  %5943 = vmatprep.mubr.msk.f32.mxu0 %vm66_vm3, %v586_v20  ;;  %v1835_v20 = vld [vmem:[%s8685_s0 + $0x8b] sm:$0xff] }
  0x62   :  { %6051 = vmatprep.mubr.msk.f32.mxu1 %vm66_vm3, %v1196_v28 }
  0x64   :  { %5944 = vmatmul.mubr.msk.f32.gmra.mrb[44].mxu0 %vm66_vm3, %v587_v21  ;;  %v1836_v21 = vld [vmem:[%s8685_s0 + $0x93] sm:$0xff] }
  0x65   :  { %6052 = vmatmul.mubr.msk.f32.vlgmr.msra.gmra.mrb[44].mxu1 %vm66_vm3, %v1197_v31  ;;  %5946 = vmatprep.mubr.msk.f32.mxu0 %vm66_vm3, %v588_v22  ;;  %v1837_v22 = vld [vmem:[%s8685_s0 + $0xa3] sm:$0xff] }
  0x66   :  { %6054 = vmatprep.mubr.msk.f32.mxu1 %vm66_vm3, %v1198_v32  ;;  %6684 = vmatpush3.bf16.msra.mxu1 %v7260_v59  ;;  %v1215_v59 = vld [vmem:[%s8685_s0 + $0xca] sm:$0xff] }
  0x67   :  { %6687 = vmatprep.subr.msk.bf16.mxu1 %vm7048_vm2, %v6685_v33 }
  0x68   :  { %5947 = vmatmul.mubr.msk.f32.gmra.mrb[46].mxu0 %vm66_vm3, %v589_v23  ;;  %v1839_v23 = vld [vmem:[%s8685_s0 + $0xb3] sm:$0xff] }
  0x69   :  { %6055 = vmatmul.mubr.msk.f32.gmra.mrb[46].mxu1 %vm66_vm3, %v1199_v36  ;;  %5949 = vmatprep.mubr.msk.f32.mxu0 %vm66_vm3, %v590_v24  ;;  %v1840_v24 = vld [vmem:[%s8685_s0 + $0xc3] sm:$0xff] }
  0x6a   :  { %6057 = vmatprep.mubr.msk.f32.mxu1 %vm66_vm3, %v1200_v37  ;;  %6690 = vmatpush3.bf16.msk.msra.mxu1 %vm7048_vm2, %v6685_v33  ;;  %v2451_v33 = vld [vmem:[%s8685_s0 + $0x24] sm:$0xff] }
  0x6b   :  { %6702 = vmatprep.subr.bf16.mxu1 %v7440_v38 }
  0x6c   :  { %5950 = vmatmul.mubr.msk.f32.gmra.mrb[48].mxu0 %vm66_vm3, %v591_v25  ;;  %v1841_v25 = vld [vmem:[%s8685_s0 + $0xcb] sm:$0xff] }
  0x6d   :  { %6058 = vmatmul.mubr.msk.f32.gmra.mrb[48].mxu1 %vm66_vm3, %v1201_v39  ;;  %5952 = vmatprep.mubr.msk.f32.mxu0 %vm66_vm3, %v592_v26  ;;  %v1842_v26 = vld [vmem:[%s8685_s0 + $0xd3] sm:$0xff] }
  0x6e   :  { %6060 = vmatprep.mubr.msk.f32.mxu1 %vm66_vm3, %v1202_v40 }
  0x70   :  { %5953 = vmatmul.mubr.msk.f32.gmra.mrb[50].mxu0 %vm66_vm3, %v593_v27  ;;  %v1843_v27 = vld [vmem:[%s8685_s0 + $0xe3] sm:$0xff] }
  0x71   :  { %6061 = vmatmul.mubr.msk.f32.gmra.mrb[50].mxu1 %vm66_vm3, %v1203_v41  ;;  %6007 = vmatprep.mubr.msk.f32.mxu0 %vm66_vm3, %v1196_v28  ;;  %v1844_v28 = vld [vmem:[%s8685_s0 + $0xeb] sm:$0xff] }
  0x72   :  { %6063 = vmatprep.mubr.msk.f32.mxu1 %vm66_vm3, %v1204_v42 }
  0x74   :  { %6008 = vmatmul.mubr.msk.f32.vlgmr.msra.gmra.mrb[52].mxu0 %vm66_vm3, %v1197_v31  ;;  %v2449_v31 = vld [vmem:[%s8685_s0 + $0xc] sm:$0xff] }
  0x75   :  { %6064 = vmatmul.mubr.msk.f32.gmra.mrb[52].mxu1 %vm66_vm3, %v1205_v45  ;;  %6674 = vmatpush3.bf16.msra.mxu0 %v7340_v16  ;;  %v1832_v16 = vld [vmem:[%s8685_s0 + $0x6b] sm:$0xff] }
  0x76   :  { %6010 = vmatprep.mubr.msk.f32.mxu0 %vm66_vm3, %v1198_v32  ;;  %6066 = vmatprep.mubr.msk.f32.mxu1 %vm66_vm3, %v1206_v46  ;;  %v2450_v32 = vld [vmem:[%s8685_s0 + $0x14] sm:$0xff] }
  0x77   :  { %6677 = vmatprep.subr.msk.bf16.mxu0 %vm7048_vm2, %v6675_v47 }
  0x78   :  { %6011 = vmatmul.mubr.msk.f32.gmra.mrb[54].mxu0 %vm66_vm3, %v1199_v36  ;;  %v2454_v36 = vld [vmem:[%s8685_s0 + $0x44] sm:$0xff] }
  0x79   :  { %6067 = vmatmul.mubr.msk.f32.gmra.mrb[54].mxu1 %vm66_vm3, %v1207_v50  ;;  %6013 = vmatprep.mubr.msk.f32.mxu0 %vm66_vm3, %v1200_v37  ;;  %v2455_v37 = vld [vmem:[%s8685_s0 + $0x4c] sm:$0xff] }
  0x7a   :  { %6069 = vmatprep.mubr.msk.f32.mxu1 %vm66_vm3, %v1208_v51  ;;  %6680 = vmatpush3.bf16.msk.msra.mxu0 %vm7048_vm2, %v6675_v47  ;;  %v2464_v47 = vld [vmem:[%s8685_s0 + $0xac] sm:$0xff] }
  0x7b   :  { %6692 = vmatprep.subr.bf16.mxu0 %v7500_v52 }
  0x7c   :  { %6014 = vmatmul.mubr.msk.f32.gmra.mrb[56].mxu0 %vm66_vm3, %v1201_v39  ;;  %v2457_v39 = vld [vmem:[%s8685_s0 + $0x64] sm:$0xff] }
  0x7d   :  { %6070 = vmatmul.mubr.msk.f32.gmra.mrb[56].mxu1 %vm66_vm3, %v1209_v53  ;;  %6016 = vmatprep.mubr.msk.f32.mxu0 %vm66_vm3, %v1202_v40  ;;  %v2458_v40 = vld [vmem:[%s8685_s0 + $0x6c] sm:$0xff] }
  0x7e   :  { %6072 = vmatprep.mubr.msk.f32.mxu1 %vm66_vm3, %v1210_v54 }
  0x80   :  { %6017 = vmatmul.mubr.msk.f32.gmra.mrb[58].mxu0 %vm66_vm3, %v1203_v41  ;;  %v2459_v41 = vld [vmem:[%s8685_s0 + $0x74] sm:$0xff] }
  0x81   :  { %6073 = vmatmul.mubr.msk.f32.gmra.mrb[58].mxu1 %vm66_vm3, %v1211_v55  ;;  %6019 = vmatprep.mubr.msk.f32.mxu0 %vm66_vm3, %v1204_v42  ;;  %v2460_v42 = vld [vmem:[%s8685_s0 + $0x84] sm:$0xff] }
  0x82   :  { %6075 = vmatprep.mubr.msk.f32.mxu1 %vm66_vm3, %v1212_v56 }
  0x84   :  { %6020 = vmatmul.mubr.msk.f32.gmra.mrb[60].mxu0 %vm66_vm3, %v1205_v45  ;;  %v2463_v45 = vld [vmem:[%s8685_s0 + $0xa4] sm:$0xff] }
  0x85   :  { %6076 = vmatmul.mubr.msk.f32.gmra.mrb[60].mxu1 %vm66_vm3, %v1213_v57  ;;  %6022 = vmatprep.mubr.msk.f32.mxu0 %vm66_vm3, %v1206_v46 }
  0x86   :  { %6078 = vmatprep.mubr.msk.f32.mxu1 %vm66_vm3, %v1214_v58 }
  0x88   :  { %6023 = vmatmul.mubr.msk.f32.gmra.mrb[62].mxu0 %vm66_vm3, %v1207_v50 }
  0x89   :  { %6079 = vmatmul.mubr.msk.f32.gmra.mrb[62].mxu1 %vm66_vm3, %v1215_v59  ;;  %6025 = vmatprep.mubr.msk.f32.mxu0 %vm66_vm3, %v1208_v51  ;;  %v2465_v51 = vld [vmem:[%s8685_s0 + $0xb4] sm:$0xff] }
  0x8a   :  { %6081 = vmatprep.mubr.msk.f32.mxu1 %vm66_vm3, %v1216_v60 }
  0x8c   :  { %6026 = vmatmul.mubr.msk.f32.gmra.mrb[64].mxu0 %vm66_vm3, %v1209_v53  ;;  %v2466_v53 = vld [vmem:[%s8685_s0 + $0xc4] sm:$0xff] }
  0x8d   :  { %6082 = vmatmul.mubr.msk.f32.gmra.mrb[64].mxu1 %vm66_vm3, %v1217_v61  ;;  %6028 = vmatprep.mubr.msk.f32.mxu0 %vm66_vm3, %v1210_v54 }
  0x8e   :  { %6084 = vmatprep.mubr.msk.f32.mxu1 %vm66_vm3, %v1218_v62 }
  0x90   :  { %6029 = vmatmul.mubr.msk.f32.gmra.mrb[66].mxu0 %vm66_vm3, %v1211_v55 }
  0x91   :  { %6085 = vmatmul.mubr.msk.f32.gmra.mrb[66].mxu1 %vm66_vm3, %v1219_v63  ;;  %6031 = vmatprep.mubr.msk.f32.mxu0 %vm66_vm3, %v1212_v56 }
  0x92   :  { %6139 = vmatprep.mubr.msk.f32.mxu1 %vm66_vm3, %v1822_v0 }
  0x94   :  { %6032 = vmatmul.mubr.msk.f32.gmra.mrb[68].mxu0 %vm66_vm3, %v1213_v57  ;;  %v2467_v57 = vld [vmem:[%s8685_s0 + $0xcc] sm:$0xff] }
  0x95   :  { %6140 = vmatmul.mubr.msk.f32.vlgmr.msra.gmra.mrb[68].mxu1 %vm66_vm3, %v1823_v3  ;;  %6034 = vmatprep.mubr.msk.f32.mxu0 %vm66_vm3, %v1214_v58 }
  0x96   :  { %6142 = vmatprep.mubr.msk.f32.mxu1 %vm66_vm3, %v1824_v4  ;;  %6704 = vmatpush3.bf16.msra.mxu1 %v7440_v38  ;;  %v2456_v38 = vld [vmem:[%s8685_s0 + $0x54] sm:$0xff] }
  0x97   :  { %6707 = vmatprep.subr.msk.bf16.mxu1 %vm7048_vm2, %v6705_v5 }
  0x98   :  { %6035 = vmatmul.mubr.msk.f32.gmra.mrb[70].mxu0 %vm66_vm3, %v1215_v59  ;;  %v2468_v59 = vld [vmem:[%s8685_s0 + $0xd4] sm:$0xff] }
  0x99   :  { %6143 = vmatmul.mubr.msk.f32.gmra.mrb[70].mxu1 %vm66_vm3, %v1825_v6  ;;  %6037 = vmatprep.mubr.msk.f32.mxu0 %vm66_vm3, %v1216_v60 }
  0x9a   :  { %6145 = vmatprep.mubr.msk.f32.mxu1 %vm66_vm3, %v1826_v7  ;;  %6710 = vmatpush3.bf16.msk.msra.mxu1 %vm7048_vm2, %v6705_v5  ;;  %v2471_v5 = vld [vmem:[%s8685_s0 + $0xf4] sm:$0xff] }
  0x9c   :  { %6038 = vmatmul.mubr.msk.f32.gmra.mrb[72].mxu0 %vm66_vm3, %v1217_v61 }
  0x9d   :  { %6146 = vmatmul.mubr.msk.f32.gmra.mrb[72].mxu1 %vm66_vm3, %v1827_v8  ;;  %6040 = vmatprep.mubr.msk.f32.mxu0 %vm66_vm3, %v1218_v62 }
  0x9e   :  { %6148 = vmatprep.mubr.msk.f32.mxu1 %vm66_vm3, %v1828_v10 }
  0xa0   :  { %6041 = vmatmul.mubr.msk.f32.gmra.mrb[74].mxu0 %vm66_vm3, %v1219_v63  ;;  %v2469_v63 = vld [vmem:[%s8685_s0 + $0xe4] sm:$0xff] }
  0xa1   :  { %6149 = vmatmul.mubr.msk.f32.gmra.mrb[74].mxu1 %vm66_vm3, %v1829_v11  ;;  %6095 = vmatprep.mubr.msk.f32.mxu0 %vm66_vm3, %v1822_v0 }
  0xa2   :  { %6151 = vmatprep.mubr.msk.f32.mxu1 %vm66_vm3, %v1830_v12 }
  0xa4   :  { %6096 = vmatmul.mubr.msk.f32.vlgmr.msra.gmra.mrb[76].mxu0 %vm66_vm3, %v1823_v3 }
  0xa5   :  { %6152 = vmatmul.mubr.msk.f32.gmra.mrb[76].mxu1 %vm66_vm3, %v1831_v15  ;;  %6694 = vmatpush3.bf16.msra.mxu0 %v7500_v52 }
  0xa6   :  { %6098 = vmatprep.mubr.msk.f32.mxu0 %vm66_vm3, %v1824_v4  ;;  %6154 = vmatprep.mubr.msk.f32.mxu1 %vm66_vm3, %v1832_v16 }
  0xa7   :  { %6697 = vmatprep.subr.msk.bf16.mxu0 %vm7048_vm2, %v6695_v17 }
  0xa8   :  { %6099 = vmatmul.mubr.msk.f32.gmra.mrb[78].mxu0 %vm66_vm3, %v1825_v6 }
  0xa9   :  { %6155 = vmatmul.mubr.msk.f32.gmra.mrb[78].mxu1 %vm66_vm3, %v1833_v18  ;;  %6101 = vmatprep.mubr.msk.f32.mxu0 %vm66_vm3, %v1826_v7 }
  0xaa   :  { %6157 = vmatprep.mubr.msk.f32.mxu1 %vm66_vm3, %v1834_v19  ;;  %6700 = vmatpush3.bf16.msk.msra.mxu0 %vm7048_vm2, %v6695_v17 }
  0xac   :  { %6102 = vmatmul.mubr.msk.f32.gmra.mrb[80].mxu0 %vm66_vm3, %v1827_v8 }
  0xad   :  { %6158 = vmatmul.mubr.msk.f32.gmra.mrb[80].mxu1 %vm66_vm3, %v1835_v20  ;;  %6104 = vmatprep.mubr.msk.f32.mxu0 %vm66_vm3, %v1828_v10 }
  0xae   :  { %6160 = vmatprep.mubr.msk.f32.mxu1 %vm66_vm3, %v1836_v21 }
  0xb0   :  { %6105 = vmatmul.mubr.msk.f32.gmra.mrb[82].mxu0 %vm66_vm3, %v1829_v11 }
  0xb1   :  { %6161 = vmatmul.mubr.msk.f32.gmra.mrb[82].mxu1 %vm66_vm3, %v1837_v22  ;;  %6107 = vmatprep.mubr.msk.f32.mxu0 %vm66_vm3, %v1830_v12 }
  0xb2   :  { %6163 = vmatprep.mubr.msk.f32.mxu1 %vm66_vm3, %v1838_v9 }
  0xb4   :  { %6108 = vmatmul.mubr.msk.f32.gmra.mrb[84].mxu0 %vm66_vm3, %v1831_v15 }
  0xb5   :  { %6164 = vmatmul.mubr.msk.f32.gmra.mrb[84].mxu1 %vm66_vm3, %v1839_v23  ;;  %6110 = vmatprep.mubr.msk.f32.mxu0 %vm66_vm3, %v1832_v16 }
  0xb6   :  { %6166 = vmatprep.mubr.msk.f32.mxu1 %vm66_vm3, %v1840_v24 }
  0xb8   :  { %6111 = vmatmul.mubr.msk.f32.gmra.mrb[86].mxu0 %vm66_vm3, %v1833_v18 }
  0xb9   :  { %6167 = vmatmul.mubr.msk.f32.gmra.mrb[86].mxu1 %vm66_vm3, %v1841_v25  ;;  %6113 = vmatprep.mubr.msk.f32.mxu0 %vm66_vm3, %v1834_v19 }
  0xba   :  { %6169 = vmatprep.mubr.msk.f32.mxu1 %vm66_vm3, %v1842_v26 }
  0xbc   :  { %6114 = vmatmul.mubr.msk.f32.gmra.mrb[88].mxu0 %vm66_vm3, %v1835_v20 }
  0xbd   :  { %6170 = vmatmul.mubr.msk.f32.gmra.mrb[88].mxu1 %vm66_vm3, %v1843_v27  ;;  %6116 = vmatprep.mubr.msk.f32.mxu0 %vm66_vm3, %v1836_v21 }
  0xbe   :  { %6172 = vmatprep.mubr.msk.f32.mxu1 %vm66_vm3, %v1844_v28 }
  0xc0   :  { %6117 = vmatmul.mubr.msk.f32.gmra.mrb[90].mxu0 %vm66_vm3, %v1837_v22 }
  0xc1   :  { %6173 = vmatmul.mubr.msk.f32.gmra.mrb[90].mxu1 %vm66_vm3, %v1845_v29  ;;  %6119 = vmatprep.mubr.msk.f32.mxu0 %vm66_vm3, %v1838_v9 }
  0xc2   :  { %6227 = vmatprep.mubr.msk.f32.mxu1 %vm66_vm3, %v2448_v30 }
  0xc4   :  { %6120 = vmatmul.mubr.msk.f32.gmra.mrb[92].mxu0 %vm66_vm3, %v1839_v23 }
  0xc5   :  { %6228 = vmatmul.mubr.msk.f32.vlgmr.msra.gmra.mrb[92].mxu1 %vm66_vm3, %v2449_v31  ;;  %6122 = vmatprep.mubr.msk.f32.mxu0 %vm66_vm3, %v1840_v24 }
  0xc6   :  { %6230 = vmatprep.mubr.msk.f32.mxu1 %vm66_vm3, %v2450_v32 }
  0xc8   :  { %6123 = vmatmul.mubr.msk.f32.gmra.mrb[94].mxu0 %vm66_vm3, %v1841_v25 }
  0xc9   :  { %6231 = vmatmul.mubr.msk.f32.gmra.mrb[94].mxu1 %vm66_vm3, %v2451_v33  ;;  %6125 = vmatprep.mubr.msk.f32.mxu0 %vm66_vm3, %v1842_v26 }
  0xca   :  { %6233 = vmatprep.mubr.msk.f32.mxu1 %vm66_vm3, %v2452_v34 }
  0xcc   :  { %6126 = vmatmul.mubr.msk.f32.gmra.mrb[96].mxu0 %vm66_vm3, %v1843_v27 }
  0xcd   :  { %6234 = vmatmul.mubr.msk.f32.gmra.mrb[96].mxu1 %vm66_vm3, %v2453_v35  ;;  %6128 = vmatprep.mubr.msk.f32.mxu0 %vm66_vm3, %v1844_v28 }
  0xce   :  { %6236 = vmatprep.mubr.msk.f32.mxu1 %vm66_vm3, %v2454_v36 }
  0xd0   :  { %6129 = vmatmul.mubr.msk.f32.gmra.mrb[98].mxu0 %vm66_vm3, %v1845_v29 }
  0xd1   :  { %6237 = vmatmul.mubr.msk.f32.gmra.mrb[98].mxu1 %vm66_vm3, %v2455_v37  ;;  %6183 = vmatprep.mubr.msk.f32.mxu0 %vm66_vm3, %v2448_v30 }
  0xd2   :  { %6239 = vmatprep.mubr.msk.f32.mxu1 %vm66_vm3, %v2456_v38 }
  0xd4   :  { %6184 = vmatmul.mubr.msk.f32.vlgmr.msra.gmra.mrb[100].mxu0 %vm66_vm3, %v2449_v31 }
  0xd5   :  { %6240 = vmatmul.mubr.msk.f32.gmra.mrb[100].mxu1 %vm66_vm3, %v2457_v39  ;;  %6186 = vmatprep.mubr.msk.f32.mxu0 %vm66_vm3, %v2450_v32 }
  0xd6   :  { %6242 = vmatprep.mubr.msk.f32.mxu1 %vm66_vm3, %v2458_v40 }
  0xd8   :  { %6187 = vmatmul.mubr.msk.f32.gmra.mrb[102].mxu0 %vm66_vm3, %v2451_v33 }
  0xd9   :  { %6243 = vmatmul.mubr.msk.f32.gmra.mrb[102].mxu1 %vm66_vm3, %v2459_v41  ;;  %6189 = vmatprep.mubr.msk.f32.mxu0 %vm66_vm3, %v2452_v34 }
  0xda   :  { %6245 = vmatprep.mubr.msk.f32.mxu1 %vm66_vm3, %v2460_v42 }
  0xdc   :  { %6190 = vmatmul.mubr.msk.f32.gmra.mrb[104].mxu0 %vm66_vm3, %v2453_v35 }
  0xdd   :  { %6246 = vmatmul.mubr.msk.f32.gmra.mrb[104].mxu1 %vm66_vm3, %v2461_v43  ;;  %6192 = vmatprep.mubr.msk.f32.mxu0 %vm66_vm3, %v2454_v36 }
  0xde   :  { %6248 = vmatprep.mubr.msk.f32.mxu1 %vm66_vm3, %v2462_v44 }
  0xdf   :  { %v5833_v46 = vpop.f32.mrb[0].mxu0 }
  0xe0   :  { %523 = vst.msk [vmem:[#allocation2 + $0x8] sm:$0xff] %vm521_vm4, %v5833_v46  ;;  %v209_v48 = vpop.f32.mrb[1].mxu0  ;;  %6193 = vmatmul.mubr.msk.f32.gmra.mrb[106].mxu0 %vm66_vm3, %v2455_v37  ;;  %v5883_v49 = vpop.f32.mrb[0].mxu1 }
  0xe1   :  { %522 = vst.msk [vmem:[#allocation2] sm:$0xff] %vm521_vm4, %v209_v48  ;;  %6249 = vmatmul.mubr.msk.f32.gmra.mrb[106].mxu1 %vm66_vm3, %v2463_v45  ;;  %6195 = vmatprep.mubr.msk.f32.mxu0 %vm66_vm3, %v2456_v38  ;;  %551 = vst.msk [vmem:[#allocation3 + $0x28] sm:$0xff] %vm521_vm4, %v5883_v49  ;;  %v422_v50 = vpop.f32.mrb[1].mxu1 }
  0xe2   :  { %6251 = vmatprep.mubr.msk.f32.mxu1 %vm66_vm3, %v2464_v47  ;;  %550 = vst.msk [vmem:[#allocation3 + $0x20] sm:$0xff] %vm521_vm4, %v422_v50 }
  0xe3   :  { %v5836_v52 = vpop.f32.mrb[2].mxu0 }
  0xe4   :  { %525 = vst.msk [vmem:[#allocation2 + $0x18] sm:$0xff] %vm521_vm4, %v5836_v52  ;;  %v219_v54 = vpop.f32.mrb[3].mxu0  ;;  %6196 = vmatmul.mubr.msk.f32.gmra.mrb[108].mxu0 %vm66_vm3, %v2457_v39  ;;  %v5886_v55 = vpop.f32.mrb[2].mxu1 }
  0xe5   :  { %524 = vst.msk [vmem:[#allocation2 + $0x10] sm:$0xff] %vm521_vm4, %v219_v54  ;;  %6252 = vmatmul.mubr.msk.f32.gmra.mrb[108].mxu1 %vm66_vm3, %v2465_v51  ;;  %6198 = vmatprep.mubr.msk.f32.mxu0 %vm66_vm3, %v2458_v40  ;;  %553 = vst.msk [vmem:[#allocation3 + $0x38] sm:$0xff] %vm521_vm4, %v5886_v55  ;;  %v432_v56 = vpop.f32.mrb[3].mxu1 }
  0xe6   :  { %6254 = vmatprep.mubr.msk.f32.mxu1 %vm66_vm3, %v2466_v53  ;;  %552 = vst.msk [vmem:[#allocation3 + $0x30] sm:$0xff] %vm521_vm4, %v432_v56 }
  0xe7   :  { %v5839_v58 = vpop.f32.mrb[4].mxu0  ;;  %v1053_v56 = vld [vmem:[#allocation2 + $0x8] sm:$0xff] }
  0xe8   :  { %527 = vst.msk [vmem:[#allocation2 + $0x28] sm:$0xff] %vm521_vm4, %v5839_v58  ;;  %v229_v60 = vpop.f32.mrb[5].mxu0  ;;  %6199 = vmatmul.mubr.msk.f32.gmra.mrb[110].mxu0 %vm66_vm3, %v2459_v41  ;;  %v5889_v61 = vpop.f32.mrb[4].mxu1  ;;  %v1129_v40 = vld [vmem:[#allocation3 + $0x28] sm:$0xff] }
  0xe9   :  { %526 = vst.msk [vmem:[#allocation2 + $0x20] sm:$0xff] %vm521_vm4, %v229_v60  ;;  %6255 = vmatmul.mubr.msk.f32.gmra.mrb[110].mxu1 %vm66_vm3, %v2467_v57  ;;  %6201 = vmatprep.mubr.msk.f32.mxu0 %vm66_vm3, %v2460_v42  ;;  %555 = vst.msk [vmem:[#allocation3 + $0x48] sm:$0xff] %vm521_vm4, %v5889_v61  ;;  %v442_v62 = vpop.f32.mrb[5].mxu1 }
  0xea   :  { %6257 = vmatprep.mubr.msk.f32.mxu1 %vm66_vm3, %v2468_v59  ;;  %554 = vst.msk [vmem:[#allocation3 + $0x40] sm:$0xff] %vm521_vm4, %v442_v62 }
  0xeb   :  { %v5842_v0 = vpop.f32.mrb[6].mxu0 }
  0xec   :  { %529 = vst.msk [vmem:[#allocation2 + $0x38] sm:$0xff] %vm521_vm4, %v5842_v0  ;;  %v239_v2 = vpop.f32.mrb[7].mxu0  ;;  %6202 = vmatmul.mubr.msk.f32.gmra.mrb[112].mxu0 %vm66_vm3, %v2461_v43  ;;  %v5892_v3 = vpop.f32.mrb[6].mxu1  ;;  %v1131_v48 = vld [vmem:[#allocation3 + $0x38] sm:$0xff] }
  0xed   :  { %528 = vst.msk [vmem:[#allocation2 + $0x30] sm:$0xff] %vm521_vm4, %v239_v2  ;;  %6258 = vmatmul.mubr.msk.f32.gmra.mrb[112].mxu1 %vm66_vm3, %v2469_v63  ;;  %6204 = vmatprep.mubr.msk.f32.mxu0 %vm66_vm3, %v2462_v44  ;;  %557 = vst.msk [vmem:[#allocation3 + $0x58] sm:$0xff] %vm521_vm4, %v5892_v3  ;;  %v452_v4 = vpop.f32.mrb[7].mxu1  ;;  %v1128_v44 = vld [vmem:[#allocation3 + $0x20] sm:$0xff]  ;;  %v1130_v52 = vld [vmem:[#allocation3 + $0x30] sm:$0xff] }
  0xee   :  { %6260 = vmatprep.mubr.msk.f32.mxu1 %vm66_vm3, %v2470_v1  ;;  %556 = vst.msk [vmem:[#allocation3 + $0x50] sm:$0xff] %vm521_vm4, %v452_v4 }
  0xef   :  { %v5845_v6 = vpop.f32.mrb[8].mxu0 }
  0xf0   :  { %531 = vst.msk [vmem:[#allocation2 + $0x48] sm:$0xff] %vm521_vm4, %v5845_v6  ;;  %v249_v7 = vpop.f32.mrb[9].mxu0  ;;  %6205 = vmatmul.mubr.msk.f32.gmra.mrb[114].mxu0 %vm66_vm3, %v2463_v45  ;;  %v5895_v8 = vpop.f32.mrb[8].mxu1  ;;  %v1133_v61 = vld [vmem:[#allocation3 + $0x48] sm:$0xff] }
  0xf1   :  { %530 = vst.msk [vmem:[#allocation2 + $0x40] sm:$0xff] %vm521_vm4, %v249_v7  ;;  %6261 = vmatmul.mubr.msk.f32.gmra.mrb[114].mxu1 %vm66_vm3, %v2471_v5  ;;  %6207 = vmatprep.mubr.msk.f32.mxu0 %vm66_vm3, %v2464_v47  ;;  %559 = vst.msk [vmem:[#allocation3 + $0x68] sm:$0xff] %vm521_vm4, %v5895_v8  ;;  %v462_v10 = vpop.f32.mrb[9].mxu1  ;;  %v1132_v4 = vld [vmem:[#allocation3 + $0x40] sm:$0xff]  ;;  %v1055_v8 = vld [vmem:[#allocation2 + $0x18] sm:$0xff] }
  0xf2   :  { %558 = vst.msk [vmem:[#allocation3 + $0x60] sm:$0xff] %vm521_vm4, %v462_v10 }
  0xf3   :  { %v5848_v11 = vpop.f32.mrb[10].mxu0 }
  0xf4   :  { %533 = vst.msk [vmem:[#allocation2 + $0x58] sm:$0xff] %vm521_vm4, %v5848_v11  ;;  %v259_v12 = vpop.f32.mrb[11].mxu0  ;;  %6208 = vmatmul.mubr.msk.f32.gmra.mrb[116].mxu0 %vm66_vm3, %v2465_v51  ;;  %v5898_v13 = vpop.f32.mrb[10].mxu1 }
  0xf5   :  { %532 = vst.msk [vmem:[#allocation2 + $0x50] sm:$0xff] %vm521_vm4, %v259_v12  ;;  %6210 = vmatprep.mubr.msk.f32.mxu0 %vm66_vm3, %v2466_v53  ;;  %561 = vst.msk [vmem:[#allocation3 + $0x78] sm:$0xff] %vm521_vm4, %v5898_v13  ;;  %v472_v14 = vpop.f32.mrb[11].mxu1 }
  0xf6   :  { %560 = vst.msk [vmem:[#allocation3 + $0x70] sm:$0xff] %vm521_vm4, %v472_v14  ;;  %v1135_v14 = vld [vmem:[#allocation3 + $0x58] sm:$0xff] }
  0xf7   :  { %v5851_v15 = vpop.f32.mrb[12].mxu0 }
  0xf8   :  { %535 = vst.msk [vmem:[#allocation2 + $0x68] sm:$0xff] %vm521_vm4, %v5851_v15  ;;  %v269_v16 = vpop.f32.mrb[13].mxu0  ;;  %6211 = vmatmul.mubr.msk.f32.gmra.mrb[118].mxu0 %vm66_vm3, %v2467_v57  ;;  %v5901_v17 = vpop.f32.mrb[12].mxu1 }
  0xf9   :  { %534 = vst.msk [vmem:[#allocation2 + $0x60] sm:$0xff] %vm521_vm4, %v269_v16  ;;  %6213 = vmatprep.mubr.msk.f32.mxu0 %vm66_vm3, %v2468_v59  ;;  %563 = vst.msk [vmem:[#allocation3 + $0x88] sm:$0xff] %vm521_vm4, %v5901_v17  ;;  %v482_v18 = vpop.f32.mrb[13].mxu1  ;;  %v1054_v16 = vld [vmem:[#allocation2 + $0x10] sm:$0xff] }
  0xfa   :  { %562 = vst.msk [vmem:[#allocation3 + $0x80] sm:$0xff] %vm521_vm4, %v482_v18 }
  0xfb   :  { %v5854_v19 = vpop.f32.mrb[14].mxu0 }
  0xfc   :  { %537 = vst.msk [vmem:[#allocation2 + $0x78] sm:$0xff] %vm521_vm4, %v5854_v19  ;;  %v279_v20 = vpop.f32.mrb[15].mxu0  ;;  %6214 = vmatmul.mubr.msk.f32.gmra.mrb[120].mxu0 %vm66_vm3, %v2469_v63  ;;  %v5904_v21 = vpop.f32.mrb[14].mxu1  ;;  %v1052_v63 = vld [vmem:[#allocation2] sm:$0xff] }
  0xfd   :  { %536 = vst.msk [vmem:[#allocation2 + $0x70] sm:$0xff] %vm521_vm4, %v279_v20  ;;  %6216 = vmatprep.mubr.msk.f32.mxu0 %vm66_vm3, %v2470_v1  ;;  %565 = vst.msk [vmem:[#allocation3 + $0x98] sm:$0xff] %vm521_vm4, %v5904_v21  ;;  %v492_v22 = vpop.f32.mrb[15].mxu1  ;;  %v1134_v21 = vld [vmem:[#allocation3 + $0x50] sm:$0xff] }
  0xfe   :  { %564 = vst.msk [vmem:[#allocation3 + $0x90] sm:$0xff] %vm521_vm4, %v492_v22 }
  0xff   :  { %v5857_v9 = vpop.f32.mrb[16].mxu0 }
 0x100   :  { %539 = vst.msk [vmem:[#allocation2 + $0x88] sm:$0xff] %vm521_vm4, %v5857_v9  ;;  %v289_v23 = vpop.f32.mrb[17].mxu0  ;;  %6217 = vmatmul.mubr.msk.f32.gmra.mrb[122].mxu0 %vm66_vm3, %v2471_v5  ;;  %v5907_v24 = vpop.f32.mrb[16].mxu1 }
 0x101   :  { %538 = vst.msk [vmem:[#allocation2 + $0x80] sm:$0xff] %vm521_vm4, %v289_v23  ;;  %567 = vst.msk [vmem:[#allocation3 + $0xa8] sm:$0xff] %vm521_vm4, %v5907_v24  ;;  %v502_v25 = vpop.f32.mrb[17].mxu1  ;;  %v1057_v23 = vld [vmem:[#allocation2 + $0x28] sm:$0xff] }
 0x102   :  { %566 = vst.msk [vmem:[#allocation3 + $0xa0] sm:$0xff] %vm521_vm4, %v502_v25 }
 0x103   :  { %v5860_v26 = vpop.f32.mrb[18].mxu0 }
 0x104   :  { %541 = vst.msk [vmem:[#allocation2 + $0x98] sm:$0xff] %vm521_vm4, %v5860_v26  ;;  %v299_v27 = vpop.f32.mrb[19].mxu0  ;;  %v5910_v28 = vpop.f32.mrb[18].mxu1  ;;  %v1137_v26 = vld [vmem:[#allocation3 + $0x68] sm:$0xff] }
 0x105   :  { %540 = vst.msk [vmem:[#allocation2 + $0x90] sm:$0xff] %vm521_vm4, %v299_v27  ;;  %569 = vst.msk [vmem:[#allocation3 + $0xb8] sm:$0xff] %vm521_vm4, %v5910_v28  ;;  %v512_v29 = vpop.f32.mrb[19].mxu1  ;;  %v1056_v28 = vld [vmem:[#allocation2 + $0x20] sm:$0xff] }
 0x106   :  { %568 = vst.msk [vmem:[#allocation3 + $0xb0] sm:$0xff] %vm521_vm4, %v512_v29 }
 0x107   :  { %v5863_v30 = vpop.f32.mrb[20].mxu0 }
 0x108   :  { %543 = vst.msk [vmem:[#allocation2 + $0xa8] sm:$0xff] %vm521_vm4, %v5863_v30  ;;  %v309_v31 = vpop.f32.mrb[21].mxu0  ;;  %v5965_v32 = vpop.f32.mrb[20].mxu1 }
 0x109   :  { %542 = vst.msk [vmem:[#allocation2 + $0xa0] sm:$0xff] %vm521_vm4, %v309_v31  ;;  %v933_v33 = vpop.f32.mrb[21].mxu1 }
 0x10b   :  { %v5866_v34 = vpop.f32.mrb[22].mxu0 }
 0x10c   :  { %545 = vst.msk [vmem:[#allocation2 + $0xb8] sm:$0xff] %vm521_vm4, %v5866_v34  ;;  %v319_v35 = vpop.f32.mrb[23].mxu0  ;;  %v5968_v36 = vpop.f32.mrb[22].mxu1 }
 0x10d   :  { %544 = vst.msk [vmem:[#allocation2 + $0xb0] sm:$0xff] %vm521_vm4, %v319_v35  ;;  %v943_v37 = vpop.f32.mrb[23].mxu1  ;;  %v1059_v35 = vld [vmem:[#allocation2 + $0x38] sm:$0xff] }
 0x10f   :  { %v5877_v38 = vpop.f32.mrb[24].mxu0 }
 0x110   :  { %547 = vst.msk [vmem:[#allocation3 + $0x8] sm:$0xff] %vm521_vm4, %v5877_v38  ;;  %v5971_v39 = vpop.f32.mrb[24].mxu1  ;;  %v402_v41 = vpop.f32.mrb[25].mxu0  ;;  %v1139_v38 = vld [vmem:[#allocation3 + $0x78] sm:$0xff] }
 0x111   :  { %v1153_v42 = vadd.f32 %v5971_v39, %v1129_v40  ;;  %546 = vst.msk [vmem:[#allocation3] sm:$0xff] %vm521_vm4, %v402_v41  ;;  %v953_v43 = vpop.f32.mrb[25].mxu1  ;;  %v1058_v40 = vld [vmem:[#allocation2 + $0x30] sm:$0xff] }
 0x112   :  { %v1152_v45 = vadd.f32 %v1128_v44, %v953_v43  ;;  %v1138_v44 = vld [vmem:[#allocation3 + $0x70] sm:$0xff] }
 0x113   :  { %1177 = vst.msk [vmem:[#allocation3 + $0x28] sm:$0xff] %vm521_vm4, %v1153_v42  ;;  %v5880_v46 = vpop.f32.mrb[26].mxu0 }
 0x114   :  { %1176 = vst.msk [vmem:[#allocation3 + $0x20] sm:$0xff] %vm521_vm4, %v1152_v45  ;;  %549 = vst.msk [vmem:[#allocation3 + $0x18] sm:$0xff] %vm521_vm4, %v5880_v46  ;;  %v5974_v47 = vpop.f32.mrb[26].mxu1  ;;  %v412_v49 = vpop.f32.mrb[27].mxu0 }
 0x115   :  { %v1155_v50 = vadd.f32 %v5974_v47, %v1131_v48  ;;  %548 = vst.msk [vmem:[#allocation3 + $0x10] sm:$0xff] %vm521_vm4, %v412_v49  ;;  %v963_v51 = vpop.f32.mrb[27].mxu1  ;;  %v1061_v47 = vld [vmem:[#allocation2 + $0x48] sm:$0xff] }
 0x116   :  { %v1154_v53 = vadd.f32 %v1130_v52, %v963_v51  ;;  %v1060_v52 = vld [vmem:[#allocation2 + $0x40] sm:$0xff] }
 0x117   :  { %v1125_v54 = vld [vmem:[#allocation3 + $0x8] sm:$0xff]  ;;  %1179 = vst.msk [vmem:[#allocation3 + $0x38] sm:$0xff] %vm521_vm4, %v1155_v50  ;;  %v5921_v55 = vpop.f32.mrb[28].mxu0 }
 0x118   :  { %v1149_v57 = vadd.f32 %v5965_v32, %v1125_v54  ;;  %v1124_v58 = vld [vmem:[#allocation3] sm:$0xff]  ;;  %1178 = vst.msk [vmem:[#allocation3 + $0x30] sm:$0xff] %vm521_vm4, %v1154_v53  ;;  %v1077_v59 = vadd.f32 %v5921_v55, %v1053_v56  ;;  %v5977_v60 = vpop.f32.mrb[28].mxu1  ;;  %v740_v62 = vpop.f32.mrb[29].mxu0  ;;  %v1141_v50 = vld [vmem:[#allocation3 + $0x88] sm:$0xff] }
 0x119   :  { %v1148_v0 = vadd.f32 %v1124_v58, %v933_v33  ;;  %v1157_v1 = vadd.f32 %v5977_v60, %v1133_v61  ;;  %v1076_v2 = vadd.f32 %v1052_v63, %v740_v62  ;;  %v973_v3 = vpop.f32.mrb[29].mxu1  ;;  %v1136_v32 = vld [vmem:[#allocation3 + $0x60] sm:$0xff]  ;;  %v1143_v62 = vld [vmem:[#allocation3 + $0x98] sm:$0xff] }
 0x11a   :  { %1173 = vst.msk [vmem:[#allocation3 + $0x8] sm:$0xff] %vm521_vm4, %v1149_v57  ;;  %1101 = vst.msk [vmem:[#allocation2 + $0x8] sm:$0xff] %vm521_vm4, %v1077_v59  ;;  %v1156_v5 = vadd.f32 %v1132_v4, %v973_v3  ;;  %v1140_v56 = vld [vmem:[#allocation3 + $0x80] sm:$0xff]  ;;  %v1063_v59 = vld [vmem:[#allocation2 + $0x58] sm:$0xff] }
 0x11b   :  { %1172 = vst.msk [vmem:[#allocation3] sm:$0xff] %vm521_vm4, %v1148_v0  ;;  %v1127_v6 = vld [vmem:[#allocation3 + $0x18] sm:$0xff]  ;;  %1181 = vst.msk [vmem:[#allocation3 + $0x48] sm:$0xff] %vm521_vm4, %v1157_v1  ;;  %v5924_v7 = vpop.f32.mrb[30].mxu0  ;;  %v1062_v0 = vld [vmem:[#allocation2 + $0x50] sm:$0xff] }
 0x11c   :  { %1100 = vst.msk [vmem:[#allocation2] sm:$0xff] %vm521_vm4, %v1076_v2  ;;  %v1151_v10 = vadd.f32 %v5968_v36, %v1127_v6  ;;  %v1126_v11 = vld [vmem:[#allocation3 + $0x10] sm:$0xff]  ;;  %1180 = vst.msk [vmem:[#allocation3 + $0x40] sm:$0xff] %vm521_vm4, %v1156_v5  ;;  %v1079_v12 = vadd.f32 %v5924_v7, %v1055_v8  ;;  %v5980_v13 = vpop.f32.mrb[30].mxu1  ;;  %v750_v15 = vpop.f32.mrb[31].mxu0  ;;  %v1065_v7 = vld [vmem:[#allocation2 + $0x68] sm:$0xff] }
 0x11d   :  { %v1150_v17 = vadd.f32 %v1126_v11, %v943_v37  ;;  %v1159_v18 = vadd.f32 %v5980_v13, %v1135_v14  ;;  %v1078_v19 = vadd.f32 %v1054_v16, %v750_v15  ;;  %v983_v20 = vpop.f32.mrb[31].mxu1  ;;  %v1142_v4 = vld [vmem:[#allocation3 + $0x90] sm:$0xff]  ;;  %v1145_v11 = vld [vmem:[#allocation3 + $0xa8] sm:$0xff]  ;;  %v1064_v13 = vld [vmem:[#allocation2 + $0x60] sm:$0xff] }
 0x11e   :  { %1175 = vst.msk [vmem:[#allocation3 + $0x18] sm:$0xff] %vm521_vm4, %v1151_v10  ;;  %1103 = vst.msk [vmem:[#allocation2 + $0x18] sm:$0xff] %vm521_vm4, %v1079_v12  ;;  %v1158_v22 = vadd.f32 %v1134_v21, %v983_v20  ;;  %v1067_v20 = vld [vmem:[#allocation2 + $0x78] sm:$0xff] }
 0x11f   :  { %1174 = vst.msk [vmem:[#allocation3 + $0x10] sm:$0xff] %vm521_vm4, %v1150_v17  ;;  %1183 = vst.msk [vmem:[#allocation3 + $0x58] sm:$0xff] %vm521_vm4, %v1159_v18  ;;  %v5927_v9 = vpop.f32.mrb[32].mxu0  ;;  %v1144_v17 = vld [vmem:[#allocation3 + $0xa0] sm:$0xff] }
 0x120   :  { %1102 = vst.msk [vmem:[#allocation2 + $0x10] sm:$0xff] %vm521_vm4, %v1078_v19  ;;  %1182 = vst.msk [vmem:[#allocation3 + $0x50] sm:$0xff] %vm521_vm4, %v1158_v22  ;;  %v1081_v24 = vadd.f32 %v5927_v9, %v1057_v23  ;;  %v5983_v25 = vpop.f32.mrb[32].mxu1  ;;  %v760_v27 = vpop.f32.mrb[33].mxu0  ;;  %v1147_v9 = vld [vmem:[#allocation3 + $0xb8] sm:$0xff] }
 0x121   :  { %v1161_v29 = vadd.f32 %v5983_v25, %v1137_v26  ;;  %v1080_v30 = vadd.f32 %v1056_v28, %v760_v27  ;;  %v993_v31 = vpop.f32.mrb[33].mxu1  ;;  %v1146_v28 = vld [vmem:[#allocation3 + $0xb0] sm:$0xff] }
 0x122   :  { %1105 = vst.msk [vmem:[#allocation2 + $0x28] sm:$0xff] %vm521_vm4, %v1081_v24  ;;  %v1160_v33 = vadd.f32 %v1136_v32, %v993_v31  ;;  %v1066_v24 = vld [vmem:[#allocation2 + $0x70] sm:$0xff]  ;;  %v1069_v31 = vld [vmem:[#allocation2 + $0x88] sm:$0xff]  ;;  %v1068_v32 = vld [vmem:[#allocation2 + $0x80] sm:$0xff] }
 0x123   :  { %1185 = vst.msk [vmem:[#allocation3 + $0x68] sm:$0xff] %vm521_vm4, %v1161_v29  ;;  %1104 = vst.msk [vmem:[#allocation2 + $0x20] sm:$0xff] %vm521_vm4, %v1080_v30  ;;  %v5930_v34 = vpop.f32.mrb[34].mxu0 }
 0x124   :  { %1184 = vst.msk [vmem:[#allocation3 + $0x60] sm:$0xff] %vm521_vm4, %v1160_v33  ;;  %v1083_v36 = vadd.f32 %v5930_v34, %v1059_v35  ;;  %v5986_v37 = vpop.f32.mrb[34].mxu1  ;;  %v770_v39 = vpop.f32.mrb[35].mxu0  ;;  %v1751_v35 = vld [vmem:[#allocation3 + $0x8] sm:$0xff] }
 0x125   :  { %v1163_v41 = vadd.f32 %v5986_v37, %v1139_v38  ;;  %v1082_v42 = vadd.f32 %v1058_v40, %v770_v39  ;;  %v1003_v43 = vpop.f32.mrb[35].mxu1  ;;  %v3312_v37 = vld [vmem:[%s8686_s3] sm:$0xff]  ;;  %v3313_v38 = vld [vmem:[%s8686_s3 + $0x8] sm:$0xff] }
 0x126   :  { %1107 = vst.msk [vmem:[#allocation2 + $0x38] sm:$0xff] %vm521_vm4, %v1083_v36  ;;  %v1162_v45 = vadd.f32 %v1138_v44, %v1003_v43  ;;  %v6711_v43 = vpack.c.bf16 %v3313_v38, %v3312_v37 }
 0x127   :  { %1187 = vst.msk [vmem:[#allocation3 + $0x78] sm:$0xff] %vm521_vm4, %v1163_v41  ;;  %1106 = vst.msk [vmem:[#allocation2 + $0x30] sm:$0xff] %vm521_vm4, %v1082_v42  ;;  %v5933_v46 = vpop.f32.mrb[36].mxu0  ;;  %v1750_v42 = vld [vmem:[#allocation3] sm:$0xff] }
 0x128   :  { %1186 = vst.msk [vmem:[#allocation3 + $0x70] sm:$0xff] %vm521_vm4, %v1162_v45  ;;  %v1085_v48 = vadd.f32 %v5933_v46, %v1061_v47  ;;  %v5989_v49 = vpop.f32.mrb[36].mxu1  ;;  %v780_v51 = vpop.f32.mrb[37].mxu0  ;;  %v1071_v46 = vld [vmem:[#allocation2 + $0x98] sm:$0xff]  ;;  %6712 = vmatprep.subr.bf16.mxu0 %v6711_v43 }
 0x129   :  { %v1165_v53 = vadd.f32 %v5989_v49, %v1141_v50  ;;  %v1084_v54 = vadd.f32 %v1060_v52, %v780_v51  ;;  %v1013_v55 = vpop.f32.mrb[37].mxu1  ;;  %v1753_v49 = vld [vmem:[#allocation3 + $0x18] sm:$0xff]  ;;  %v1070_v51 = vld [vmem:[#allocation2 + $0x90] sm:$0xff]  ;;  %6714 = vmatpush3.bf16.msra.mxu0 %v6711_v43 }
 0x12a   :  { %1109 = vst.msk [vmem:[#allocation2 + $0x48] sm:$0xff] %vm521_vm4, %v1085_v48  ;;  %v1164_v57 = vadd.f32 %v1140_v56, %v1013_v55  ;;  %v1752_v55 = vld [vmem:[#allocation3 + $0x10] sm:$0xff] }
 0x12b   :  { %1189 = vst.msk [vmem:[#allocation3 + $0x88] sm:$0xff] %vm521_vm4, %v1165_v53  ;;  %1108 = vst.msk [vmem:[#allocation2 + $0x40] sm:$0xff] %vm521_vm4, %v1084_v54  ;;  %v5936_v58 = vpop.f32.mrb[38].mxu0 }
 0x12c   :  { %1188 = vst.msk [vmem:[#allocation3 + $0x80] sm:$0xff] %vm521_vm4, %v1164_v57  ;;  %v1087_v60 = vadd.f32 %v5936_v58, %v1063_v59  ;;  %v5992_v61 = vpop.f32.mrb[38].mxu1  ;;  %v790_v63 = vpop.f32.mrb[39].mxu0  ;;  %v3314_v57 = vld [vmem:[%s8686_s3 + $0x10] sm:$0xff]  ;;  %v1073_v59 = vld [vmem:[#allocation2 + $0xa8] sm:$0xff] }
 0x12d   :  { %v1167_v1 = vadd.f32 %v5992_v61, %v1143_v62  ;;  %v1086_v2 = vadd.f32 %v1062_v0, %v790_v63  ;;  %v1023_v3 = vpop.f32.mrb[39].mxu1  ;;  %v1755_v63 = vld [vmem:[#allocation3 + $0x28] sm:$0xff] }
 0x12e   :  { %1111 = vst.msk [vmem:[#allocation2 + $0x58] sm:$0xff] %vm521_vm4, %v1087_v60  ;;  %v1166_v5 = vadd.f32 %v1142_v4, %v1023_v3  ;;  %v3315_v60 = vld [vmem:[%s8686_s3 + $0x18] sm:$0xff] }
 0x12f   :  { %1191 = vst.msk [vmem:[#allocation3 + $0x98] sm:$0xff] %vm521_vm4, %v1167_v1  ;;  %1110 = vst.msk [vmem:[#allocation2 + $0x50] sm:$0xff] %vm521_vm4, %v1086_v2  ;;  %v5939_v6 = vpop.f32.mrb[40].mxu0  ;;  %v1072_v1 = vld [vmem:[#allocation2 + $0xa0] sm:$0xff]  ;;  %v6715_v2 = vpack.c.bf16 %v3315_v60, %v3314_v57 }
 0x130   :  { %1190 = vst.msk [vmem:[#allocation3 + $0x90] sm:$0xff] %vm521_vm4, %v1166_v5  ;;  %v1089_v8 = vadd.f32 %v5939_v6, %v1065_v7  ;;  %v5995_v10 = vpop.f32.mrb[40].mxu1  ;;  %v800_v12 = vpop.f32.mrb[41].mxu0  ;;  %v1754_v6 = vld [vmem:[#allocation3 + $0x20] sm:$0xff] }
 0x131   :  { %v1169_v14 = vadd.f32 %v5995_v10, %v1145_v11  ;;  %v1088_v15 = vadd.f32 %v1064_v13, %v800_v12  ;;  %v1033_v16 = vpop.f32.mrb[41].mxu1  ;;  %6716 = vmatprep.subr.bf16.mxu0 %v6715_v2  ;;  %v1075_v11 = vld [vmem:[#allocation2 + $0xb8] sm:$0xff]  ;;  %v3317_v12 = vld [vmem:[%s8686_s3 + $0x28] sm:$0xff]  ;;  %v1682_v57 = vld [vmem:[#allocation2 + $0x20] sm:$0xff] }
 0x132   :  { %1113 = vst.msk [vmem:[#allocation2 + $0x68] sm:$0xff] %vm521_vm4, %v1089_v8  ;;  %v1168_v18 = vadd.f32 %v1144_v17, %v1033_v16  ;;  %v3316_v8 = vld [vmem:[%s8686_s3 + $0x20] sm:$0xff]  ;;  %6718 = vmatpush3.bf16.msra.mxu0 %v6715_v2  ;;  %v1074_v17 = vld [vmem:[#allocation2 + $0xb0] sm:$0xff] }
 0x133   :  { %1193 = vst.msk [vmem:[#allocation3 + $0xa8] sm:$0xff] %vm521_vm4, %v1169_v14  ;;  %1112 = vst.msk [vmem:[#allocation2 + $0x60] sm:$0xff] %vm521_vm4, %v1088_v15  ;;  %v5942_v19 = vpop.f32.mrb[42].mxu0  ;;  %v1757_v15 = vld [vmem:[#allocation3 + $0x38] sm:$0xff] }
 0x134   :  { %1192 = vst.msk [vmem:[#allocation3 + $0xa0] sm:$0xff] %vm521_vm4, %v1168_v18  ;;  %v1091_v21 = vadd.f32 %v5942_v19, %v1067_v20  ;;  %v5998_v22 = vpop.f32.mrb[42].mxu1  ;;  %v810_v23 = vpop.f32.mrb[43].mxu0  ;;  %v6719_v18 = vpack.c.bf16 %v3317_v12, %v3316_v8 }
 0x135   :  { %v1171_v25 = vadd.f32 %v5998_v22, %v1147_v9  ;;  %v1090_v26 = vadd.f32 %v1066_v24, %v810_v23  ;;  %v1043_v27 = vpop.f32.mrb[43].mxu1  ;;  %v1756_v22 = vld [vmem:[#allocation3 + $0x30] sm:$0xff]  ;;  %v1679_v24 = vld [vmem:[#allocation2 + $0x8] sm:$0xff] }
 0x136   :  { %1115 = vst.msk [vmem:[#allocation2 + $0x78] sm:$0xff] %vm521_vm4, %v1091_v21  ;;  %v1170_v29 = vadd.f32 %v1146_v28, %v1043_v27  ;;  %6720 = vmatprep.subr.bf16.mxu0 %v6719_v18  ;;  %v1759_v27 = vld [vmem:[#allocation3 + $0x48] sm:$0xff] }
 0x137   :  { %1195 = vst.msk [vmem:[#allocation3 + $0xb8] sm:$0xff] %vm521_vm4, %v1171_v25  ;;  %1114 = vst.msk [vmem:[#allocation2 + $0x70] sm:$0xff] %vm521_vm4, %v1090_v26  ;;  %v5945_v30 = vpop.f32.mrb[44].mxu0  ;;  %6722 = vmatpush3.bf16.msra.mxu0 %v6719_v18  ;;  %v1686_v18 = vld [vmem:[#allocation2 + $0x40] sm:$0xff] }
 0x138   :  { %1194 = vst.msk [vmem:[#allocation3 + $0xb0] sm:$0xff] %vm521_vm4, %v1170_v29  ;;  %v1093_v33 = vadd.f32 %v5945_v30, %v1069_v31  ;;  %v6053_v34 = vpop.f32.mrb[44].mxu1  ;;  %v820_v36 = vpop.f32.mrb[45].mxu0  ;;  %v1678_v29 = vld [vmem:[#allocation2] sm:$0xff] }
 0x139   :  { %v1775_v39 = vadd.f32 %v6053_v34, %v1751_v35  ;;  %v1092_v40 = vadd.f32 %v1068_v32, %v820_v36  ;;  %v1559_v41 = vpop.f32.mrb[45].mxu1  ;;  %v3318_v34 = vld [vmem:[%s8686_s3 + $0x30] sm:$0xff]  ;;  %v3319_v35 = vld [vmem:[%s8686_s3 + $0x38] sm:$0xff] }
 0x13a   :  { %1117 = vst.msk [vmem:[#allocation2 + $0x88] sm:$0xff] %vm521_vm4, %v1093_v33  ;;  %v1774_v44 = vadd.f32 %v1750_v42, %v1559_v41  ;;  %v1758_v33 = vld [vmem:[#allocation3 + $0x40] sm:$0xff]  ;;  %v6723_v37 = vpack.c.bf16 %v3319_v35, %v3318_v34  ;;  %v1761_v42 = vld [vmem:[#allocation3 + $0x58] sm:$0xff] }
 0x13b   :  { %1799 = vst.msk [vmem:[#allocation3 + $0x8] sm:$0xff] %vm521_vm4, %v1775_v39  ;;  %1116 = vst.msk [vmem:[#allocation2 + $0x80] sm:$0xff] %vm521_vm4, %v1092_v40  ;;  %v5948_v45 = vpop.f32.mrb[46].mxu0  ;;  %v1681_v39 = vld [vmem:[#allocation2 + $0x18] sm:$0xff] }
 0x13c   :  { %1798 = vst.msk [vmem:[#allocation3] sm:$0xff] %vm521_vm4, %v1774_v44  ;;  %v1095_v47 = vadd.f32 %v5948_v45, %v1071_v46  ;;  %v6056_v48 = vpop.f32.mrb[46].mxu1  ;;  %v830_v50 = vpop.f32.mrb[47].mxu0  ;;  %v1680_v44 = vld [vmem:[#allocation2 + $0x10] sm:$0xff]  ;;  %6724 = vmatprep.subr.bf16.mxu0 %v6723_v37 }
 0x13d   :  { %v1777_v52 = vadd.f32 %v6056_v48, %v1753_v49  ;;  %v1094_v53 = vadd.f32 %v1070_v51, %v830_v50  ;;  %v1569_v54 = vpop.f32.mrb[47].mxu1  ;;  %v1760_v48 = vld [vmem:[#allocation3 + $0x50] sm:$0xff]  ;;  %6726 = vmatpush3.bf16.msra.mxu0 %v6723_v37  ;;  %v1683_v51 = vld [vmem:[#allocation2 + $0x28] sm:$0xff] }
 0x13e   :  { %1119 = vst.msk [vmem:[#allocation2 + $0x98] sm:$0xff] %vm521_vm4, %v1095_v47  ;;  %v1776_v56 = vadd.f32 %v1752_v55, %v1569_v54  ;;  %v1763_v55 = vld [vmem:[#allocation3 + $0x68] sm:$0xff] }
 0x13f   :  { %1801 = vst.msk [vmem:[#allocation3 + $0x18] sm:$0xff] %vm521_vm4, %v1777_v52  ;;  %1118 = vst.msk [vmem:[#allocation2 + $0x90] sm:$0xff] %vm521_vm4, %v1094_v53  ;;  %v5951_v58 = vpop.f32.mrb[48].mxu0  ;;  %v3320_v52 = vld [vmem:[%s8686_s3 + $0x40] sm:$0xff] }
 0x140   :  { %1800 = vst.msk [vmem:[#allocation3 + $0x10] sm:$0xff] %vm521_vm4, %v1776_v56  ;;  %v1097_v61 = vadd.f32 %v5951_v58, %v1073_v59  ;;  %v6059_v62 = vpop.f32.mrb[48].mxu1  ;;  %v840_v0 = vpop.f32.mrb[49].mxu0  ;;  %6279 = vmatprep.subr.mxu0 %v3320_v52 }
 0x141   :  { %v1779_v3 = vadd.f32 %v6059_v62, %v1755_v63  ;;  %v1096_v4 = vadd.f32 %v1072_v1, %v840_v0  ;;  %v1579_v5 = vpop.f32.mrb[49].mxu1  ;;  %6280 = vmatpush3.msra.mxu0 %v3320_v52  ;;  %v1685_v0 = vld [vmem:[#allocation2 + $0x38] sm:$0xff] }
 0x142   :  { %1121 = vst.msk [vmem:[#allocation2 + $0xa8] sm:$0xff] %vm521_vm4, %v1097_v61  ;;  %v1778_v7 = vadd.f32 %v1754_v6, %v1579_v5  ;;  %v1762_v61 = vld [vmem:[#allocation3 + $0x60] sm:$0xff]  ;;  %v1684_v5 = vld [vmem:[#allocation2 + $0x30] sm:$0xff] }
 0x143   :  { %1803 = vst.msk [vmem:[#allocation3 + $0x28] sm:$0xff] %vm521_vm4, %v1779_v3  ;;  %1120 = vst.msk [vmem:[#allocation2 + $0xa0] sm:$0xff] %vm521_vm4, %v1096_v4  ;;  %v5954_v10 = vpop.f32.mrb[50].mxu0  ;;  %v1765_v3 = vld [vmem:[#allocation3 + $0x78] sm:$0xff] }
 0x144   :  { %1802 = vst.msk [vmem:[#allocation3 + $0x20] sm:$0xff] %vm521_vm4, %v1778_v7  ;;  %v1099_v13 = vadd.f32 %v5954_v10, %v1075_v11  ;;  %v6062_v14 = vpop.f32.mrb[50].mxu1  ;;  %v850_v16 = vpop.f32.mrb[51].mxu0  ;;  %v1764_v10 = vld [vmem:[#allocation3 + $0x70] sm:$0xff] }
 0x145   :  { %v1781_v19 = vadd.f32 %v6062_v14, %v1757_v15  ;;  %v1098_v20 = vadd.f32 %v1074_v17, %v850_v16  ;;  %v1589_v21 = vpop.f32.mrb[51].mxu1  ;;  %v1767_v16 = vld [vmem:[#allocation3 + $0x88] sm:$0xff] }
 0x146   :  { %1123 = vst.msk [vmem:[#allocation2 + $0xb8] sm:$0xff] %vm521_vm4, %v1099_v13  ;;  %v1780_v9 = vadd.f32 %v1756_v22, %v1589_v21  ;;  %v1687_v13 = vld [vmem:[#allocation2 + $0x48] sm:$0xff]  ;;  %v1766_v22 = vld [vmem:[#allocation3 + $0x80] sm:$0xff] }
 0x147   :  { %1805 = vst.msk [vmem:[#allocation3 + $0x38] sm:$0xff] %vm521_vm4, %v1781_v19  ;;  %1122 = vst.msk [vmem:[#allocation2 + $0xb0] sm:$0xff] %vm521_vm4, %v1098_v20  ;;  %v6009_v23 = vpop.f32.mrb[52].mxu0 }
 0x148   :  { %1804 = vst.msk [vmem:[#allocation3 + $0x30] sm:$0xff] %vm521_vm4, %v1780_v9  ;;  %v1703_v25 = vadd.f32 %v6009_v23, %v1679_v24  ;;  %v6065_v26 = vpop.f32.mrb[52].mxu1  ;;  %v1366_v28 = vpop.f32.mrb[53].mxu0  ;;  %v1689_v24 = vld [vmem:[#allocation2 + $0x58] sm:$0xff] }
 0x149   :  { %v1783_v30 = vadd.f32 %v6065_v26, %v1759_v27  ;;  %v1702_v31 = vadd.f32 %v1678_v29, %v1366_v28  ;;  %v1599_v32 = vpop.f32.mrb[53].mxu1  ;;  %v1769_v27 = vld [vmem:[#allocation3 + $0x98] sm:$0xff]  ;;  %v1688_v29 = vld [vmem:[#allocation2 + $0x50] sm:$0xff] }
 0x14a   :  { %1727 = vst.msk [vmem:[#allocation2 + $0x8] sm:$0xff] %vm521_vm4, %v1703_v25  ;;  %v1782_v36 = vadd.f32 %v1758_v33, %v1599_v32  ;;  %v1768_v33 = vld [vmem:[#allocation3 + $0x90] sm:$0xff] }
 0x14b   :  { %1807 = vst.msk [vmem:[#allocation3 + $0x48] sm:$0xff] %vm521_vm4, %v1783_v30  ;;  %1726 = vst.msk [vmem:[#allocation2] sm:$0xff] %vm521_vm4, %v1702_v31  ;;  %v6012_v38 = vpop.f32.mrb[54].mxu0 }
 0x14c   :  { %1806 = vst.msk [vmem:[#allocation3 + $0x40] sm:$0xff] %vm521_vm4, %v1782_v36  ;;  %v1705_v40 = vadd.f32 %v6012_v38, %v1681_v39  ;;  %v6068_v41 = vpop.f32.mrb[54].mxu1  ;;  %v1376_v43 = vpop.f32.mrb[55].mxu0  ;;  %v1691_v36 = vld [vmem:[#allocation2 + $0x68] sm:$0xff] }
 0x14d   :  { %v1785_v45 = vadd.f32 %v6068_v41, %v1761_v42  ;;  %v1704_v46 = vadd.f32 %v1680_v44, %v1376_v43  ;;  %v1609_v47 = vpop.f32.mrb[55].mxu1  ;;  %v1771_v39 = vld [vmem:[#allocation3 + $0xa8] sm:$0xff]  ;;  %v1690_v41 = vld [vmem:[#allocation2 + $0x60] sm:$0xff] }
 0x14e   :  { %1729 = vst.msk [vmem:[#allocation2 + $0x18] sm:$0xff] %vm521_vm4, %v1705_v40  ;;  %v1784_v49 = vadd.f32 %v1760_v48, %v1609_v47  ;;  %v5239_v47 = vld [vmem:[%s8686_s3 + $0x48] sm:$0xff] }
 0x14f   :  { %1809 = vst.msk [vmem:[#allocation3 + $0x58] sm:$0xff] %vm521_vm4, %v1785_v45  ;;  %1728 = vst.msk [vmem:[#allocation2 + $0x10] sm:$0xff] %vm521_vm4, %v1704_v46  ;;  %v6015_v50 = vpop.f32.mrb[56].mxu0  ;;  %v1770_v45 = vld [vmem:[#allocation3 + $0xa0] sm:$0xff] }
 0x150   :  { %1808 = vst.msk [vmem:[#allocation3 + $0x50] sm:$0xff] %vm521_vm4, %v1784_v49  ;;  %v1707_v53 = vadd.f32 %v6015_v50, %v1683_v51  ;;  %v6071_v54 = vpop.f32.mrb[56].mxu1  ;;  %v1386_v56 = vpop.f32.mrb[57].mxu0  ;;  %v1693_v49 = vld [vmem:[#allocation2 + $0x78] sm:$0xff]  ;;  %v5240_v50 = vld [vmem:[%s8686_s3 + $0x50] sm:$0xff] }
 0x151   :  { %v1787_v58 = vadd.f32 %v6071_v54, %v1763_v55  ;;  %v1706_v59 = vadd.f32 %v1682_v57, %v1386_v56  ;;  %v1619_v60 = vpop.f32.mrb[57].mxu1  ;;  %v1692_v55 = vld [vmem:[#allocation2 + $0x70] sm:$0xff]  ;;  %v7999_v56 = vpack.c.bf16 %v5240_v50, %v5239_v47  ;;  %v2305_v47 = vld [vmem:[#allocation2 + $0x8] sm:$0xff] }
 0x152   :  { %1731 = vst.msk [vmem:[#allocation2 + $0x28] sm:$0xff] %vm521_vm4, %v1707_v53  ;;  %v1786_v62 = vadd.f32 %v1762_v61, %v1619_v60  ;;  %v1773_v53 = vld [vmem:[#allocation3 + $0xb8] sm:$0xff]  ;;  %v1772_v60 = vld [vmem:[#allocation3 + $0xb0] sm:$0xff]  ;;  %v2385_v50 = vld [vmem:[#allocation3 + $0x48] sm:$0xff] }
 0x153   :  { %1811 = vst.msk [vmem:[#allocation3 + $0x68] sm:$0xff] %vm521_vm4, %v1787_v58  ;;  %1730 = vst.msk [vmem:[#allocation2 + $0x20] sm:$0xff] %vm521_vm4, %v1706_v59  ;;  %v6018_v63 = vpop.f32.mrb[58].mxu0  ;;  %6728 = vmatprep.subr.bf16.mxu0 %v7999_v56 }
 0x154   :  { %1810 = vst.msk [vmem:[#allocation3 + $0x60] sm:$0xff] %vm521_vm4, %v1786_v62  ;;  %v1709_v1 = vadd.f32 %v6018_v63, %v1685_v0  ;;  %v6074_v2 = vpop.f32.mrb[58].mxu1  ;;  %v1396_v4 = vpop.f32.mrb[59].mxu0  ;;  %v1695_v63 = vld [vmem:[#allocation2 + $0x88] sm:$0xff] }
 0x155   :  { %v1789_v6 = vadd.f32 %v6074_v2, %v1765_v3  ;;  %v1708_v7 = vadd.f32 %v1684_v5, %v1396_v4  ;;  %v1629_v8 = vpop.f32.mrb[59].mxu1  ;;  %v2377_v2 = vld [vmem:[#allocation3 + $0x8] sm:$0xff]  ;;  %v1694_v4 = vld [vmem:[#allocation2 + $0x80] sm:$0xff] }
 0x156   :  { %1733 = vst.msk [vmem:[#allocation2 + $0x38] sm:$0xff] %vm521_vm4, %v1709_v1  ;;  %v1788_v11 = vadd.f32 %v1764_v10, %v1629_v8  ;;  %v2376_v8 = vld [vmem:[#allocation3] sm:$0xff] }
 0x157   :  { %1813 = vst.msk [vmem:[#allocation3 + $0x78] sm:$0xff] %vm521_vm4, %v1789_v6  ;;  %1732 = vst.msk [vmem:[#allocation2 + $0x30] sm:$0xff] %vm521_vm4, %v1708_v7  ;;  %v6021_v12 = vpop.f32.mrb[60].mxu0 }
 0x158   :  { %1812 = vst.msk [vmem:[#allocation3 + $0x70] sm:$0xff] %vm521_vm4, %v1788_v11  ;;  %v1711_v14 = vadd.f32 %v6021_v12, %v1687_v13  ;;  %v6077_v15 = vpop.f32.mrb[60].mxu1  ;;  %v1406_v17 = vpop.f32.mrb[61].mxu0  ;;  %v1697_v12 = vld [vmem:[#allocation2 + $0x98] sm:$0xff] }
 0x159   :  { %v1791_v19 = vadd.f32 %v6077_v15, %v1767_v16  ;;  %v1710_v20 = vadd.f32 %v1686_v18, %v1406_v17  ;;  %v1639_v21 = vpop.f32.mrb[61].mxu1  ;;  %v2379_v15 = vld [vmem:[#allocation3 + $0x18] sm:$0xff]  ;;  %v1696_v17 = vld [vmem:[#allocation2 + $0x90] sm:$0xff] }
 0x15a   :  { %1735 = vst.msk [vmem:[#allocation2 + $0x48] sm:$0xff] %vm521_vm4, %v1711_v14  ;;  %v1790_v9 = vadd.f32 %v1766_v22, %v1639_v21  ;;  %v2378_v21 = vld [vmem:[#allocation3 + $0x10] sm:$0xff] }
 0x15b   :  { %1815 = vst.msk [vmem:[#allocation3 + $0x88] sm:$0xff] %vm521_vm4, %v1791_v19  ;;  %1734 = vst.msk [vmem:[#allocation2 + $0x40] sm:$0xff] %vm521_vm4, %v1710_v20  ;;  %v6024_v23 = vpop.f32.mrb[62].mxu0 }
 0x15c   :  { %1814 = vst.msk [vmem:[#allocation3 + $0x80] sm:$0xff] %vm521_vm4, %v1790_v9  ;;  %v1713_v25 = vadd.f32 %v6024_v23, %v1689_v24  ;;  %v6080_v26 = vpop.f32.mrb[62].mxu1  ;;  %v1416_v28 = vpop.f32.mrb[63].mxu0  ;;  %v1699_v23 = vld [vmem:[#allocation2 + $0xa8] sm:$0xff] }
 0x15d   :  { %v1793_v30 = vadd.f32 %v6080_v26, %v1769_v27  ;;  %v1712_v31 = vadd.f32 %v1688_v29, %v1416_v28  ;;  %v1649_v32 = vpop.f32.mrb[63].mxu1  ;;  %v2381_v26 = vld [vmem:[#allocation3 + $0x28] sm:$0xff]  ;;  %v1698_v28 = vld [vmem:[#allocation2 + $0xa0] sm:$0xff] }
 0x15e   :  { %1737 = vst.msk [vmem:[#allocation2 + $0x58] sm:$0xff] %vm521_vm4, %v1713_v25  ;;  %v1792_v34 = vadd.f32 %v1768_v33, %v1649_v32  ;;  %v2380_v32 = vld [vmem:[#allocation3 + $0x20] sm:$0xff] }
 0x15f   :  { %1817 = vst.msk [vmem:[#allocation3 + $0x98] sm:$0xff] %vm521_vm4, %v1793_v30  ;;  %1736 = vst.msk [vmem:[#allocation2 + $0x50] sm:$0xff] %vm521_vm4, %v1712_v31  ;;  %v6027_v35 = vpop.f32.mrb[64].mxu0 }
 0x160   :  { %1816 = vst.msk [vmem:[#allocation3 + $0x90] sm:$0xff] %vm521_vm4, %v1792_v34  ;;  %v1715_v37 = vadd.f32 %v6027_v35, %v1691_v36  ;;  %v6083_v38 = vpop.f32.mrb[64].mxu1  ;;  %v1426_v40 = vpop.f32.mrb[65].mxu0  ;;  %v1701_v35 = vld [vmem:[#allocation2 + $0xb8] sm:$0xff] }
 0x161   :  { %v1795_v42 = vadd.f32 %v6083_v38, %v1771_v39  ;;  %v1714_v43 = vadd.f32 %v1690_v41, %v1426_v40  ;;  %v1659_v44 = vpop.f32.mrb[65].mxu1  ;;  %v2383_v38 = vld [vmem:[#allocation3 + $0x38] sm:$0xff]  ;;  %v1700_v40 = vld [vmem:[#allocation2 + $0xb0] sm:$0xff] }
 0x162   :  { %1739 = vst.msk [vmem:[#allocation2 + $0x68] sm:$0xff] %vm521_vm4, %v1715_v37  ;;  %v1794_v46 = vadd.f32 %v1770_v45, %v1659_v44  ;;  %v2382_v44 = vld [vmem:[#allocation3 + $0x30] sm:$0xff] }
 0x163   :  { %1819 = vst.msk [vmem:[#allocation3 + $0xa8] sm:$0xff] %vm521_vm4, %v1795_v42  ;;  %1738 = vst.msk [vmem:[#allocation2 + $0x60] sm:$0xff] %vm521_vm4, %v1714_v43  ;;  %v6030_v48 = vpop.f32.mrb[66].mxu0 }
 0x164   :  { %1818 = vst.msk [vmem:[#allocation3 + $0xa0] sm:$0xff] %vm521_vm4, %v1794_v46  ;;  %v1717_v51 = vadd.f32 %v6030_v48, %v1693_v49  ;;  %v6086_v52 = vpop.f32.mrb[66].mxu1  ;;  %v1436_v54 = vpop.f32.mrb[67].mxu0 }
 0x165   :  { %v1797_v57 = vadd.f32 %v6086_v52, %v1773_v53  ;;  %v1716_v58 = vadd.f32 %v1692_v55, %v1436_v54  ;;  %v1669_v59 = vpop.f32.mrb[67].mxu1  ;;  %v2304_v52 = vld [vmem:[#allocation2] sm:$0xff] }
 0x166   :  { %1741 = vst.msk [vmem:[#allocation2 + $0x78] sm:$0xff] %vm521_vm4, %v1717_v51  ;;  %v1796_v61 = vadd.f32 %v1772_v60, %v1669_v59  ;;  %v2307_v60 = vld [vmem:[#allocation2 + $0x18] sm:$0xff] }
 0x167   :  { %1821 = vst.msk [vmem:[#allocation3 + $0xb8] sm:$0xff] %vm521_vm4, %v1797_v57  ;;  %1740 = vst.msk [vmem:[#allocation2 + $0x70] sm:$0xff] %vm521_vm4, %v1716_v58  ;;  %v6033_v62 = vpop.f32.mrb[68].mxu0  ;;  %v2384_v57 = vld [vmem:[#allocation3 + $0x40] sm:$0xff] }
 0x168   :  { %1820 = vst.msk [vmem:[#allocation3 + $0xb0] sm:$0xff] %vm521_vm4, %v1796_v61  ;;  %v1719_v0 = vadd.f32 %v6033_v62, %v1695_v63  ;;  %v6141_v1 = vpop.f32.mrb[68].mxu1  ;;  %v1446_v3 = vpop.f32.mrb[69].mxu0  ;;  %v2387_v63 = vld [vmem:[#allocation3 + $0x58] sm:$0xff] }
 0x169   :  { %v2401_v5 = vadd.f32 %v6141_v1, %v2377_v2  ;;  %v1718_v6 = vadd.f32 %v1694_v4, %v1446_v3  ;;  %v2185_v7 = vpop.f32.mrb[69].mxu1  ;;  %v2306_v1 = vld [vmem:[#allocation2 + $0x10] sm:$0xff] }
 0x16a   :  { %1743 = vst.msk [vmem:[#allocation2 + $0x88] sm:$0xff] %vm521_vm4, %v1719_v0  ;;  %v2400_v10 = vadd.f32 %v2376_v8, %v2185_v7  ;;  %v2309_v8 = vld [vmem:[#allocation2 + $0x28] sm:$0xff] }
 0x16b   :  { %2425 = vst.msk [vmem:[#allocation3 + $0x8] sm:$0xff] %vm521_vm4, %v2401_v5  ;;  %1742 = vst.msk [vmem:[#allocation2 + $0x80] sm:$0xff] %vm521_vm4, %v1718_v6  ;;  %v6036_v11 = vpop.f32.mrb[70].mxu0  ;;  %v2386_v5 = vld [vmem:[#allocation3 + $0x50] sm:$0xff] }
 0x16c   :  { %2424 = vst.msk [vmem:[#allocation3] sm:$0xff] %vm521_vm4, %v2400_v10  ;;  %v1721_v13 = vadd.f32 %v6036_v11, %v1697_v12  ;;  %v6144_v14 = vpop.f32.mrb[70].mxu1  ;;  %v1456_v16 = vpop.f32.mrb[71].mxu0  ;;  %v2389_v12 = vld [vmem:[#allocation3 + $0x68] sm:$0xff] }
 0x16d   :  { %v2403_v18 = vadd.f32 %v6144_v14, %v2379_v15  ;;  %v1720_v19 = vadd.f32 %v1696_v17, %v1456_v16  ;;  %v2195_v20 = vpop.f32.mrb[71].mxu1  ;;  %v2308_v14 = vld [vmem:[#allocation2 + $0x20] sm:$0xff] }
 0x16e   :  { %1745 = vst.msk [vmem:[#allocation2 + $0x98] sm:$0xff] %vm521_vm4, %v1721_v13  ;;  %v2402_v22 = vadd.f32 %v2378_v21, %v2195_v20  ;;  %v2311_v21 = vld [vmem:[#allocation2 + $0x38] sm:$0xff] }
 0x16f   :  { %2427 = vst.msk [vmem:[#allocation3 + $0x18] sm:$0xff] %vm521_vm4, %v2403_v18  ;;  %1744 = vst.msk [vmem:[#allocation2 + $0x90] sm:$0xff] %vm521_vm4, %v1720_v19  ;;  %v6039_v9 = vpop.f32.mrb[72].mxu0  ;;  %v2388_v18 = vld [vmem:[#allocation3 + $0x60] sm:$0xff] }
 0x170   :  { %2426 = vst.msk [vmem:[#allocation3 + $0x10] sm:$0xff] %vm521_vm4, %v2402_v22  ;;  %v1723_v24 = vadd.f32 %v6039_v9, %v1699_v23  ;;  %v6147_v25 = vpop.f32.mrb[72].mxu1  ;;  %v1466_v27 = vpop.f32.mrb[73].mxu0  ;;  %v2391_v23 = vld [vmem:[#allocation3 + $0x78] sm:$0xff] }
 0x171   :  { %v2405_v29 = vadd.f32 %v6147_v25, %v2381_v26  ;;  %v1722_v30 = vadd.f32 %v1698_v28, %v1466_v27  ;;  %v2205_v31 = vpop.f32.mrb[73].mxu1  ;;  %v2310_v25 = vld [vmem:[#allocation2 + $0x30] sm:$0xff] }
 0x172   :  { %1747 = vst.msk [vmem:[#allocation2 + $0xa8] sm:$0xff] %vm521_vm4, %v1723_v24  ;;  %v2404_v33 = vadd.f32 %v2380_v32, %v2205_v31  ;;  %v2313_v32 = vld [vmem:[#allocation2 + $0x48] sm:$0xff] }
 0x173   :  { %2429 = vst.msk [vmem:[#allocation3 + $0x28] sm:$0xff] %vm521_vm4, %v2405_v29  ;;  %1746 = vst.msk [vmem:[#allocation2 + $0xa0] sm:$0xff] %vm521_vm4, %v1722_v30  ;;  %v6042_v34 = vpop.f32.mrb[74].mxu0  ;;  %v2390_v29 = vld [vmem:[#allocation3 + $0x70] sm:$0xff] }
 0x174   :  { %2428 = vst.msk [vmem:[#allocation3 + $0x20] sm:$0xff] %vm521_vm4, %v2404_v33  ;;  %v1725_v36 = vadd.f32 %v6042_v34, %v1701_v35  ;;  %v6150_v37 = vpop.f32.mrb[74].mxu1  ;;  %v1476_v39 = vpop.f32.mrb[75].mxu0  ;;  %v2393_v35 = vld [vmem:[#allocation3 + $0x88] sm:$0xff] }
 0x175   :  { %v2407_v41 = vadd.f32 %v6150_v37, %v2383_v38  ;;  %v1724_v42 = vadd.f32 %v1700_v40, %v1476_v39  ;;  %v2215_v43 = vpop.f32.mrb[75].mxu1  ;;  %v2312_v37 = vld [vmem:[#allocation2 + $0x40] sm:$0xff] }
 0x176   :  { %1749 = vst.msk [vmem:[#allocation2 + $0xb8] sm:$0xff] %vm521_vm4, %v1725_v36  ;;  %v2406_v45 = vadd.f32 %v2382_v44, %v2215_v43  ;;  %v2315_v44 = vld [vmem:[#allocation2 + $0x58] sm:$0xff] }
 0x177   :  { %2431 = vst.msk [vmem:[#allocation3 + $0x38] sm:$0xff] %vm521_vm4, %v2407_v41  ;;  %1748 = vst.msk [vmem:[#allocation2 + $0xb0] sm:$0xff] %vm521_vm4, %v1724_v42  ;;  %v6097_v46 = vpop.f32.mrb[76].mxu0  ;;  %v2392_v41 = vld [vmem:[#allocation3 + $0x80] sm:$0xff] }
 0x178   :  { %2430 = vst.msk [vmem:[#allocation3 + $0x30] sm:$0xff] %vm521_vm4, %v2406_v45  ;;  %v2329_v48 = vadd.f32 %v6097_v46, %v2305_v47  ;;  %v6153_v49 = vpop.f32.mrb[76].mxu1  ;;  %v1992_v51 = vpop.f32.mrb[77].mxu0  ;;  %v2395_v47 = vld [vmem:[#allocation3 + $0x98] sm:$0xff] }
 0x179   :  { %v2409_v53 = vadd.f32 %v6153_v49, %v2385_v50  ;;  %v2328_v54 = vadd.f32 %v2304_v52, %v1992_v51  ;;  %v2225_v55 = vpop.f32.mrb[77].mxu1  ;;  %v2314_v49 = vld [vmem:[#allocation2 + $0x50] sm:$0xff] }
 0x17a   :  { %2353 = vst.msk [vmem:[#allocation2 + $0x8] sm:$0xff] %vm521_vm4, %v2329_v48  ;;  %v2408_v58 = vadd.f32 %v2384_v57, %v2225_v55  ;;  %v2317_v57 = vld [vmem:[#allocation2 + $0x68] sm:$0xff] }
 0x17b   :  { %2433 = vst.msk [vmem:[#allocation3 + $0x48] sm:$0xff] %vm521_vm4, %v2409_v53  ;;  %2352 = vst.msk [vmem:[#allocation2] sm:$0xff] %vm521_vm4, %v2328_v54  ;;  %v6100_v59 = vpop.f32.mrb[78].mxu0  ;;  %v2394_v53 = vld [vmem:[#allocation3 + $0x90] sm:$0xff] }
 0x17c   :  { %2432 = vst.msk [vmem:[#allocation3 + $0x40] sm:$0xff] %vm521_vm4, %v2408_v58  ;;  %v2331_v61 = vadd.f32 %v6100_v59, %v2307_v60  ;;  %v6156_v62 = vpop.f32.mrb[78].mxu1  ;;  %v2002_v0 = vpop.f32.mrb[79].mxu0  ;;  %v2397_v60 = vld [vmem:[#allocation3 + $0xa8] sm:$0xff] }
 0x17d   :  { %v2411_v2 = vadd.f32 %v6156_v62, %v2387_v63  ;;  %v2330_v3 = vadd.f32 %v2306_v1, %v2002_v0  ;;  %v2235_v4 = vpop.f32.mrb[79].mxu1  ;;  %v2316_v62 = vld [vmem:[#allocation2 + $0x60] sm:$0xff] }
 0x17e   :  { %2355 = vst.msk [vmem:[#allocation2 + $0x18] sm:$0xff] %vm521_vm4, %v2331_v61  ;;  %v2410_v6 = vadd.f32 %v2386_v5, %v2235_v4  ;;  %v2319_v5 = vld [vmem:[#allocation2 + $0x78] sm:$0xff] }
 0x17f   :  { %2435 = vst.msk [vmem:[#allocation3 + $0x58] sm:$0xff] %vm521_vm4, %v2411_v2  ;;  %2354 = vst.msk [vmem:[#allocation2 + $0x10] sm:$0xff] %vm521_vm4, %v2330_v3  ;;  %v6103_v7 = vpop.f32.mrb[80].mxu0  ;;  %v2396_v2 = vld [vmem:[#allocation3 + $0xa0] sm:$0xff] }
 0x180   :  { %2434 = vst.msk [vmem:[#allocation3 + $0x50] sm:$0xff] %vm521_vm4, %v2410_v6  ;;  %v2333_v10 = vadd.f32 %v6103_v7, %v2309_v8  ;;  %v6159_v11 = vpop.f32.mrb[80].mxu1  ;;  %v2012_v13 = vpop.f32.mrb[81].mxu0  ;;  %v2399_v8 = vld [vmem:[#allocation3 + $0xb8] sm:$0xff] }
 0x181   :  { %v2413_v15 = vadd.f32 %v6159_v11, %v2389_v12  ;;  %v2332_v16 = vadd.f32 %v2308_v14, %v2012_v13  ;;  %v2245_v17 = vpop.f32.mrb[81].mxu1  ;;  %v2318_v11 = vld [vmem:[#allocation2 + $0x70] sm:$0xff] }
 0x182   :  { %2357 = vst.msk [vmem:[#allocation2 + $0x28] sm:$0xff] %vm521_vm4, %v2333_v10  ;;  %v2412_v19 = vadd.f32 %v2388_v18, %v2245_v17  ;;  %v2321_v18 = vld [vmem:[#allocation2 + $0x88] sm:$0xff] }
 0x183   :  { %2437 = vst.msk [vmem:[#allocation3 + $0x68] sm:$0xff] %vm521_vm4, %v2413_v15  ;;  %2356 = vst.msk [vmem:[#allocation2 + $0x20] sm:$0xff] %vm521_vm4, %v2332_v16  ;;  %v6106_v20 = vpop.f32.mrb[82].mxu0  ;;  %v2398_v15 = vld [vmem:[#allocation3 + $0xb0] sm:$0xff] }
 0x184   :  { %2436 = vst.msk [vmem:[#allocation3 + $0x60] sm:$0xff] %vm521_vm4, %v2412_v19  ;;  %v2335_v22 = vadd.f32 %v6106_v20, %v2311_v21  ;;  %v6162_v9 = vpop.f32.mrb[82].mxu1  ;;  %v2022_v24 = vpop.f32.mrb[83].mxu0  ;;  %v3003_v21 = vld [vmem:[#allocation3 + $0x8] sm:$0xff] }
 0x185   :  { %v2415_v26 = vadd.f32 %v6162_v9, %v2391_v23  ;;  %v2334_v27 = vadd.f32 %v2310_v25, %v2022_v24  ;;  %v2255_v28 = vpop.f32.mrb[83].mxu1  ;;  %v2320_v9 = vld [vmem:[#allocation2 + $0x80] sm:$0xff] }
 0x186   :  { %2359 = vst.msk [vmem:[#allocation2 + $0x38] sm:$0xff] %vm521_vm4, %v2335_v22  ;;  %v2414_v30 = vadd.f32 %v2390_v29, %v2255_v28  ;;  %v2323_v29 = vld [vmem:[#allocation2 + $0x98] sm:$0xff] }
 0x187   :  { %2439 = vst.msk [vmem:[#allocation3 + $0x78] sm:$0xff] %vm521_vm4, %v2415_v26  ;;  %2358 = vst.msk [vmem:[#allocation2 + $0x30] sm:$0xff] %vm521_vm4, %v2334_v27  ;;  %v6109_v31 = vpop.f32.mrb[84].mxu0  ;;  %v3002_v26 = vld [vmem:[#allocation3] sm:$0xff] }
 0x188   :  { %2438 = vst.msk [vmem:[#allocation3 + $0x70] sm:$0xff] %vm521_vm4, %v2414_v30  ;;  %v2337_v33 = vadd.f32 %v6109_v31, %v2313_v32  ;;  %v6165_v34 = vpop.f32.mrb[84].mxu1  ;;  %v2032_v36 = vpop.f32.mrb[85].mxu0  ;;  %v3005_v32 = vld [vmem:[#allocation3 + $0x18] sm:$0xff] }
 0x189   :  { %v2417_v38 = vadd.f32 %v6165_v34, %v2393_v35  ;;  %v2336_v39 = vadd.f32 %v2312_v37, %v2032_v36  ;;  %v2265_v40 = vpop.f32.mrb[85].mxu1  ;;  %v2322_v34 = vld [vmem:[#allocation2 + $0x90] sm:$0xff] }
 0x18a   :  { %2361 = vst.msk [vmem:[#allocation2 + $0x48] sm:$0xff] %vm521_vm4, %v2337_v33  ;;  %v2416_v42 = vadd.f32 %v2392_v41, %v2265_v40  ;;  %v2325_v41 = vld [vmem:[#allocation2 + $0xa8] sm:$0xff] }
 0x18b   :  { %2441 = vst.msk [vmem:[#allocation3 + $0x88] sm:$0xff] %vm521_vm4, %v2417_v38  ;;  %2360 = vst.msk [vmem:[#allocation2 + $0x40] sm:$0xff] %vm521_vm4, %v2336_v39  ;;  %v6112_v43 = vpop.f32.mrb[86].mxu0  ;;  %v3004_v38 = vld [vmem:[#allocation3 + $0x10] sm:$0xff] }
 0x18c   :  { %2440 = vst.msk [vmem:[#allocation3 + $0x80] sm:$0xff] %vm521_vm4, %v2416_v42  ;;  %v2339_v45 = vadd.f32 %v6112_v43, %v2315_v44  ;;  %v6168_v46 = vpop.f32.mrb[86].mxu1  ;;  %v2042_v48 = vpop.f32.mrb[87].mxu0  ;;  %v3007_v44 = vld [vmem:[#allocation3 + $0x28] sm:$0xff] }
 0x18d   :  { %v2419_v50 = vadd.f32 %v6168_v46, %v2395_v47  ;;  %v2338_v51 = vadd.f32 %v2314_v49, %v2042_v48  ;;  %v2275_v52 = vpop.f32.mrb[87].mxu1  ;;  %v2324_v46 = vld [vmem:[#allocation2 + $0xa0] sm:$0xff] }
 0x18e   :  { %2363 = vst.msk [vmem:[#allocation2 + $0x58] sm:$0xff] %vm521_vm4, %v2339_v45  ;;  %v2418_v54 = vadd.f32 %v2394_v53, %v2275_v52  ;;  %v2327_v53 = vld [vmem:[#allocation2 + $0xb8] sm:$0xff] }
 0x18f   :  { %2443 = vst.msk [vmem:[#allocation3 + $0x98] sm:$0xff] %vm521_vm4, %v2419_v50  ;;  %2362 = vst.msk [vmem:[#allocation2 + $0x50] sm:$0xff] %vm521_vm4, %v2338_v51  ;;  %v6115_v55 = vpop.f32.mrb[88].mxu0  ;;  %v3006_v50 = vld [vmem:[#allocation3 + $0x20] sm:$0xff] }
 0x190   :  { %2442 = vst.msk [vmem:[#allocation3 + $0x90] sm:$0xff] %vm521_vm4, %v2418_v54  ;;  %v2341_v58 = vadd.f32 %v6115_v55, %v2317_v57  ;;  %v6171_v59 = vpop.f32.mrb[88].mxu1  ;;  %v2052_v61 = vpop.f32.mrb[89].mxu0  ;;  %v3009_v57 = vld [vmem:[#allocation3 + $0x38] sm:$0xff] }
 0x191   :  { %v2421_v63 = vadd.f32 %v6171_v59, %v2397_v60  ;;  %v2340_v0 = vadd.f32 %v2316_v62, %v2052_v61  ;;  %v2285_v1 = vpop.f32.mrb[89].mxu1  ;;  %v2326_v59 = vld [vmem:[#allocation2 + $0xb0] sm:$0xff] }
 0x192   :  { %2365 = vst.msk [vmem:[#allocation2 + $0x68] sm:$0xff] %vm521_vm4, %v2341_v58  ;;  %v2420_v3 = vadd.f32 %v2396_v2, %v2285_v1  ;;  %v2931_v2 = vld [vmem:[#allocation2 + $0x8] sm:$0xff] }
 0x193   :  { %2445 = vst.msk [vmem:[#allocation3 + $0xa8] sm:$0xff] %vm521_vm4, %v2421_v63  ;;  %2364 = vst.msk [vmem:[#allocation2 + $0x60] sm:$0xff] %vm521_vm4, %v2340_v0  ;;  %v6118_v4 = vpop.f32.mrb[90].mxu0  ;;  %v3008_v63 = vld [vmem:[#allocation3 + $0x30] sm:$0xff] }
 0x194   :  { %2444 = vst.msk [vmem:[#allocation3 + $0xa0] sm:$0xff] %vm521_vm4, %v2420_v3  ;;  %v2343_v6 = vadd.f32 %v6118_v4, %v2319_v5  ;;  %v6174_v7 = vpop.f32.mrb[90].mxu1  ;;  %v2062_v10 = vpop.f32.mrb[91].mxu0  ;;  %v3011_v4 = vld [vmem:[#allocation3 + $0x48] sm:$0xff] }
 0x195   :  { %v2423_v12 = vadd.f32 %v6174_v7, %v2399_v8  ;;  %v2342_v13 = vadd.f32 %v2318_v11, %v2062_v10  ;;  %v2295_v14 = vpop.f32.mrb[91].mxu1  ;;  %v2930_v8 = vld [vmem:[#allocation2] sm:$0xff] }
 0x196   :  { %2367 = vst.msk [vmem:[#allocation2 + $0x78] sm:$0xff] %vm521_vm4, %v2343_v6  ;;  %v2422_v16 = vadd.f32 %v2398_v15, %v2295_v14  ;;  %v3010_v11 = vld [vmem:[#allocation3 + $0x40] sm:$0xff]  ;;  %v2933_v15 = vld [vmem:[#allocation2 + $0x18] sm:$0xff] }
 0x197   :  { %2447 = vst.msk [vmem:[#allocation3 + $0xb8] sm:$0xff] %vm521_vm4, %v2423_v12  ;;  %2366 = vst.msk [vmem:[#allocation2 + $0x70] sm:$0xff] %vm521_vm4, %v2342_v13  ;;  %v6121_v17 = vpop.f32.mrb[92].mxu0 }
 0x198   :  { %2446 = vst.msk [vmem:[#allocation3 + $0xb0] sm:$0xff] %vm521_vm4, %v2422_v16  ;;  %v2345_v19 = vadd.f32 %v6121_v17, %v2321_v18  ;;  %v6229_v20 = vpop.f32.mrb[92].mxu1  ;;  %v2072_v22 = vpop.f32.mrb[93].mxu0  ;;  %v3013_v18 = vld [vmem:[#allocation3 + $0x58] sm:$0xff] }
 0x199   :  { %v3027_v23 = vadd.f32 %v6229_v20, %v3003_v21  ;;  %v2344_v24 = vadd.f32 %v2320_v9, %v2072_v22  ;;  %v2811_v25 = vpop.f32.mrb[93].mxu1  ;;  %v2932_v20 = vld [vmem:[#allocation2 + $0x10] sm:$0xff] }
 0x19a   :  { %2369 = vst.msk [vmem:[#allocation2 + $0x88] sm:$0xff] %vm521_vm4, %v2345_v19  ;;  %v3026_v27 = vadd.f32 %v3002_v26, %v2811_v25  ;;  %v2935_v26 = vld [vmem:[#allocation2 + $0x28] sm:$0xff] }
 0x19b   :  { %3051 = vst.msk [vmem:[#allocation3 + $0x8] sm:$0xff] %vm521_vm4, %v3027_v23  ;;  %2368 = vst.msk [vmem:[#allocation2 + $0x80] sm:$0xff] %vm521_vm4, %v2344_v24  ;;  %v6124_v28 = vpop.f32.mrb[94].mxu0  ;;  %v3012_v23 = vld [vmem:[#allocation3 + $0x50] sm:$0xff] }
 0x19c   :  { %3050 = vst.msk [vmem:[#allocation3] sm:$0xff] %vm521_vm4, %v3026_v27  ;;  %v2347_v30 = vadd.f32 %v6124_v28, %v2323_v29  ;;  %v6232_v31 = vpop.f32.mrb[94].mxu1  ;;  %v2082_v33 = vpop.f32.mrb[95].mxu0  ;;  %v3015_v29 = vld [vmem:[#allocation3 + $0x68] sm:$0xff] }
 0x19d   :  { %v3029_v35 = vadd.f32 %v6232_v31, %v3005_v32  ;;  %v2346_v36 = vadd.f32 %v2322_v34, %v2082_v33  ;;  %v2821_v37 = vpop.f32.mrb[95].mxu1  ;;  %v2934_v31 = vld [vmem:[#allocation2 + $0x20] sm:$0xff] }
 0x19e   :  { %2371 = vst.msk [vmem:[#allocation2 + $0x98] sm:$0xff] %vm521_vm4, %v2347_v30  ;;  %v3028_v39 = vadd.f32 %v3004_v38, %v2821_v37  ;;  %v3014_v37 = vld [vmem:[#allocation3 + $0x60] sm:$0xff] }
 0x19f   :  { %3053 = vst.msk [vmem:[#allocation3 + $0x18] sm:$0xff] %vm521_vm4, %v3029_v35  ;;  %2370 = vst.msk [vmem:[#allocation2 + $0x90] sm:$0xff] %vm521_vm4, %v2346_v36  ;;  %v6127_v40 = vpop.f32.mrb[96].mxu0 }
 0x1a0   :  { %3052 = vst.msk [vmem:[#allocation3 + $0x10] sm:$0xff] %vm521_vm4, %v3028_v39  ;;  %v2349_v42 = vadd.f32 %v6127_v40, %v2325_v41  ;;  %v6235_v43 = vpop.f32.mrb[96].mxu1  ;;  %v2092_v45 = vpop.f32.mrb[97].mxu0 }
 0x1a1   :  { %v3031_v47 = vadd.f32 %v6235_v43, %v3007_v44  ;;  %v2348_v48 = vadd.f32 %v2324_v46, %v2092_v45  ;;  %v2831_v49 = vpop.f32.mrb[97].mxu1  ;;  %v8084_v46 = vld [vmem:[%s8687_s2] ss:$0 sm:$0xff] }
 0x1a2   :  { %2373 = vst.msk [vmem:[#allocation2 + $0xa8] sm:$0xff] %vm521_vm4, %v2349_v42  ;;  %v3030_v51 = vadd.f32 %v3006_v50, %v2831_v49  ;;  %v2937_v42 = vld [vmem:[#allocation2 + $0x38] sm:$0xff] }
 0x1a3   :  { %3055 = vst.msk [vmem:[#allocation3 + $0x28] sm:$0xff] %vm521_vm4, %v3031_v47  ;;  %2372 = vst.msk [vmem:[#allocation2 + $0xa0] sm:$0xff] %vm521_vm4, %v2348_v48  ;;  %v6130_v52 = vpop.f32.mrb[98].mxu0  ;;  %v3153_v32 = vld [vmem:[#allocation3] ss:$2 sm:$0xff]  ;;  %v3017_v48 = vld [vmem:[#allocation3 + $0x78] sm:$0xff] }
 0x1a4   :  { %3054 = vst.msk [vmem:[#allocation3 + $0x20] sm:$0xff] %vm521_vm4, %v3030_v51  ;;  %v2351_v54 = vadd.f32 %v6130_v52, %v2327_v53  ;;  %v6238_v55 = vpop.f32.mrb[98].mxu1  ;;  %v2102_v58 = vpop.f32.mrb[99].mxu0  ;;  %v3185_v33 = vld [vmem:[#allocation3 + $0x1] ss:$2 sm:$0xff]  ;;  %v2936_v52 = vld [vmem:[#allocation2 + $0x30] sm:$0xff] }
 0x1a5   :  { %v3033_v60 = vadd.f32 %v6238_v55, %v3009_v57  ;;  %v2350_v61 = vadd.f32 %v2326_v59, %v2102_v58  ;;  %v2841_v62 = vpop.f32.mrb[99].mxu1  ;;  %v3216_v43 = vmax.f32 %v3153_v32, %v3185_v33  ;;  %v3016_v58 = vld [vmem:[#allocation3 + $0x70] sm:$0xff]  ;;  %v2939_v59 = vld [vmem:[#allocation2 + $0x48] sm:$0xff] }
 0x1a6   :  { %2375 = vst.msk [vmem:[#allocation2 + $0xb8] sm:$0xff] %vm521_vm4, %v2351_v54  ;;  %v3032_v0 = vadd.f32 %v3008_v63, %v2841_v62 }
 0x1a7   :  { %3057 = vst.msk [vmem:[#allocation3 + $0x38] sm:$0xff] %vm521_vm4, %v3033_v60  ;;  %2374 = vst.msk [vmem:[#allocation2 + $0xb0] sm:$0xff] %vm521_vm4, %v2350_v61  ;;  %v6185_v1 = vpop.f32.mrb[100].mxu0  ;;  %v3155_v44 = vld [vmem:[#allocation3 + $0x10] ss:$2 sm:$0xf] }
 0x1a8   :  { %3056 = vst.msk [vmem:[#allocation3 + $0x30] sm:$0xff] %vm521_vm4, %v3032_v0  ;;  %v6241_v3 = vpop.f32.mrb[100].mxu1  ;;  %v2955_v5 = vadd.f32 %v6185_v1, %v2931_v2  ;;  %v2618_v7 = vpop.f32.mrb[101].mxu0  ;;  %v3187_v49 = vld [vmem:[#allocation3 + $0x11] ss:$2 sm:$0xf] }
 0x1a9   :  { %v3035_v6 = vadd.f32 %v6241_v3, %v3011_v4  ;;  %v2851_v10 = vpop.f32.mrb[101].mxu1  ;;  %v2954_v12 = vadd.f32 %v2930_v8, %v2618_v7  ;;  %v3217_v63 = vmax.f32 %v3155_v44, %v3187_v49 }
 0x1aa   :  { %v3034_v13 = vadd.f32 %v3010_v11, %v2851_v10  ;;  %2979 = vst.msk [vmem:[#allocation2 + $0x8] sm:$0xff] %vm521_vm4, %v2955_v5  ;;  %v3159_v53 = vld [vmem:[#allocation3 + $0x28] ss:$2 sm:$0xf] }
 0x1ab   :  { %3059 = vst.msk [vmem:[#allocation3 + $0x48] sm:$0xff] %vm521_vm4, %v3035_v6  ;;  %v6188_v14 = vpop.f32.mrb[102].mxu0  ;;  %2978 = vst.msk [vmem:[#allocation2] sm:$0xff] %vm521_vm4, %v2954_v12  ;;  %v3191_v54 = vld [vmem:[#allocation3 + $0x29] ss:$2 sm:$0xf] }
 0x1ac   :  { %3058 = vst.msk [vmem:[#allocation3 + $0x40] sm:$0xff] %vm521_vm4, %v3034_v13  ;;  %v2957_v16 = vadd.f32 %v6188_v14, %v2933_v15  ;;  %v6244_v17 = vpop.f32.mrb[102].mxu1  ;;  %v2628_v19 = vpop.f32.mrb[103].mxu0  ;;  %v3157_v0 = vld [vmem:[#allocation3 + $0x18] ss:$2 sm:$0xff]  ;;  %v3019_v5 = vld [vmem:[#allocation3 + $0x88] sm:$0xff]  ;;  %v3219_v14 = vmax.f32 %v3159_v53, %v3191_v54 }
 0x1ad   :  { %v3037_v21 = vadd.f32 %v6244_v17, %v3013_v18  ;;  %v2956_v22 = vadd.f32 %v2932_v20, %v2628_v19  ;;  %v2861_v9 = vpop.f32.mrb[103].mxu1  ;;  %v3189_v1 = vld [vmem:[#allocation3 + $0x19] ss:$2 sm:$0xff] }
 0x1ae   :  { %2981 = vst.msk [vmem:[#allocation2 + $0x18] sm:$0xff] %vm521_vm4, %v2957_v16  ;;  %v3036_v24 = vadd.f32 %v3012_v23, %v2861_v9  ;;  %v2938_v6 = vld [vmem:[#allocation2 + $0x40] sm:$0xff] }
 0x1af   :  { %3061 = vst.msk [vmem:[#allocation3 + $0x58] sm:$0xff] %vm521_vm4, %v3037_v21  ;;  %2980 = vst.msk [vmem:[#allocation2 + $0x10] sm:$0xff] %vm521_vm4, %v2956_v22  ;;  %v6191_v25 = vpop.f32.mrb[104].mxu0  ;;  %v3018_v12 = vld [vmem:[#allocation3 + $0x80] sm:$0xff]  ;;  %v3218_v21 = vmax.f32 %v3157_v0, %v3189_v1 }
 0x1b0   :  { %3060 = vst.msk [vmem:[#allocation3 + $0x50] sm:$0xff] %vm521_vm4, %v3036_v24  ;;  %v2959_v27 = vadd.f32 %v6191_v25, %v2935_v26  ;;  %v6247_v28 = vpop.f32.mrb[104].mxu1  ;;  %v2638_v30 = vpop.f32.mrb[105].mxu0  ;;  %v2941_v26 = vld [vmem:[#allocation2 + $0x58] sm:$0xff]  ;;  %v3022_v0 = vld [vmem:[#allocation3 + $0xa0] sm:$0xff] }
 0x1b1   :  { %v3039_v34 = vadd.f32 %v6247_v28, %v3015_v29  ;;  %v2958_v35 = vadd.f32 %v2934_v31, %v2638_v30  ;;  %v2871_v36 = vpop.f32.mrb[105].mxu1  ;;  %v2940_v28 = vld [vmem:[#allocation2 + $0x50] sm:$0xff] }
 0x1b2   :  { %2983 = vst.msk [vmem:[#allocation2 + $0x28] sm:$0xff] %vm521_vm4, %v2959_v27  ;;  %v3038_v38 = vadd.f32 %v3014_v37, %v2871_v36  ;;  %v3074_v39 = vld [vmem:[#allocation2] ss:$2 sm:$0xff]  ;;  %v3106_v40 = vld [vmem:[#allocation2 + $0x1] ss:$2 sm:$0xff]  ;;  %v3021_v27 = vld [vmem:[#allocation3 + $0x98] sm:$0xff] }
 0x1b3   :  { %3063 = vst.msk [vmem:[#allocation3 + $0x68] sm:$0xff] %vm521_vm4, %v3039_v34  ;;  %2982 = vst.msk [vmem:[#allocation2 + $0x20] sm:$0xff] %vm521_vm4, %v2958_v35  ;;  %v6194_v41 = vpop.f32.mrb[106].mxu0  ;;  %v3137_v45 = vmax.f32 %v3074_v39, %v3106_v40  ;;  %v3161_v29 = vld [vmem:[#allocation3 + $0x30] ss:$2 sm:$0xff] }
 0x1b4   :  { %3062 = vst.msk [vmem:[#allocation3 + $0x60] sm:$0xff] %vm521_vm4, %v3038_v38  ;;  %v2961_v47 = vadd.f32 %v6194_v41, %v2937_v42  ;;  %v6250_v50 = vpop.f32.mrb[106].mxu1  ;;  %v2648_v51 = vpop.f32.mrb[107].mxu0  ;;  %v3193_v30 = vld [vmem:[#allocation3 + $0x31] ss:$2 sm:$0xff] }
 0x1b5   :  { %v3041_v55 = vadd.f32 %v6250_v50, %v3017_v48  ;;  %v2960_v57 = vadd.f32 %v2936_v52, %v2648_v51  ;;  %v3232_v60 = vmax.f32 %v3137_v45, %v3216_v43  ;;  %v2881_v3 = vpop.f32.mrb[107].mxu1  ;;  %v3020_v40 = vld [vmem:[#allocation3 + $0x90] sm:$0xff]  ;;  %v3220_v45 = vmax.f32 %v3161_v29, %v3193_v30  ;;  %v2943_v51 = vld [vmem:[#allocation2 + $0x68] sm:$0xff] }
 0x1b6   :  { %2985 = vst.msk [vmem:[#allocation2 + $0x38] sm:$0xff] %vm521_vm4, %v2961_v47  ;;  %v3076_v61 = vld [vmem:[#allocation2 + $0x10] ss:$2 sm:$0xf]  ;;  %v3040_v10 = vadd.f32 %v3016_v58, %v2881_v3  ;;  %v2942_v58 = vld [vmem:[#allocation2 + $0x60] sm:$0xff] }
 0x1b7   :  { %v3108_v62 = vld [vmem:[#allocation2 + $0x11] ss:$2 sm:$0xf]  ;;  %3065 = vst.msk [vmem:[#allocation3 + $0x78] sm:$0xff] %vm521_vm4, %v3041_v55  ;;  %2984 = vst.msk [vmem:[#allocation2 + $0x30] sm:$0xff] %vm521_vm4, %v2960_v57  ;;  %v6197_v4 = vpop.f32.mrb[108].mxu0  ;;  %v3255_v13 = vadd.f32 %v8084_v46, %v3232_v60 }
 0x1b8   :  { %v3138_v2 = vmax.f32 %v3076_v61, %v3108_v62  ;;  %v2963_v11 = vadd.f32 %v6197_v4, %v2939_v59  ;;  %v6253_v18 = vpop.f32.mrb[108].mxu1  ;;  %v2658_v19 = vpop.f32.mrb[109].mxu0  ;;  %3064 = vst.msk [vmem:[#allocation3 + $0x70] sm:$0xff] %vm521_vm4, %v3040_v10  ;;  %v3023_v55 = vld [vmem:[#allocation3 + $0xa8] sm:$0xff]  ;;  %v2945_v10 = vld [vmem:[#allocation2 + $0x78] sm:$0xff]  ;;  %v2944_v29 = vld [vmem:[#allocation2 + $0x70] sm:$0xff] }
 0x1b9   :  { %v3080_v7 = vld [vmem:[#allocation2 + $0x28] ss:$2 sm:$0xf]  ;;  %v3112_v8 = vld [vmem:[#allocation2 + $0x29] ss:$2 sm:$0xf]  ;;  %v3043_v9 = vadd.f32 %v6253_v18, %v3019_v5  ;;  %v2962_v23 = vadd.f32 %v2938_v6, %v2658_v19 }
 0x1ba   :  { %v3140_v15 = vmax.f32 %v3080_v7, %v3112_v8  ;;  %v3078_v16 = vld [vmem:[#allocation2 + $0x18] ss:$2 sm:$0xff]  ;;  %v3110_v17 = vld [vmem:[#allocation2 + $0x19] ss:$2 sm:$0xff]  ;;  %v3233_v20 = vmax.f32 %v3138_v2, %v3217_v63  ;;  %2987 = vst.msk [vmem:[#allocation2 + $0x48] sm:$0xff] %vm521_vm4, %v2963_v11  ;;  %v2891_v24 = vpop.f32.mrb[109].mxu1 }
 0x1bb   :  { %v3139_v22 = vmax.f32 %v3078_v16, %v3110_v17  ;;  %v6200_v25 = vpop.f32.mrb[110].mxu0  ;;  %v3042_v32 = vadd.f32 %v3018_v12, %v2891_v24  ;;  %3067 = vst.msk [vmem:[#allocation3 + $0x88] sm:$0xff] %vm521_vm4, %v3043_v9  ;;  %2986 = vst.msk [vmem:[#allocation2 + $0x40] sm:$0xff] %vm521_vm4, %v2962_v23  ;;  %v3271_v41 = vmax.f32 %v3255_v13, 0.0  ;;  %v5241_v11 = vld [vmem:[%s8686_s3 + $0x58] sm:$0xff] }
 0x1bc   :  { %v3235_v31 = vmax.f32 %v3140_v15, %v3219_v14  ;;  %v2965_v33 = vadd.f32 %v6200_v25, %v2941_v26  ;;  %v6256_v34 = vpop.f32.mrb[110].mxu1  ;;  %v2668_v35 = vpop.f32.mrb[111].mxu0  ;;  %v3256_v44 = vadd.f32 %v8084_v46, %v3233_v20  ;;  %v3163_v2 = vld [vmem:[#allocation3 + $0x40] ss:$2 sm:$0xf] }
 0x1bd   :  { %v3234_v36 = vmax.f32 %v3139_v22, %v3218_v21  ;;  %v3045_v37 = vadd.f32 %v6256_v34, %v3021_v27  ;;  %v2964_v38 = vadd.f32 %v2940_v28, %v2668_v35  ;;  %v2901_v39 = vpop.f32.mrb[111].mxu1  ;;  %3066 = vst.msk [vmem:[#allocation3 + $0x80] sm:$0xff] %vm521_vm4, %v3042_v32  ;;  %3287 = vst.msk [vmem:[#allocation4] sm:$0xff] %vm521_vm4, %v3271_v41  ;;  %v3195_v3 = vld [vmem:[#allocation3 + $0x41] ss:$2 sm:$0xf] }
 0x1be   :  { %v3258_v42 = vadd.f32 %v8084_v46, %v3235_v31  ;;  %2989 = vst.msk [vmem:[#allocation2 + $0x58] sm:$0xff] %vm521_vm4, %v2965_v33  ;;  %v3044_v43 = vadd.f32 %v3020_v40, %v2901_v39  ;;  %v3082_v48 = vld [vmem:[#allocation2 + $0x30] ss:$2 sm:$0xff]  ;;  %v3114_v49 = vld [vmem:[#allocation2 + $0x31] ss:$2 sm:$0xff]  ;;  %v3272_v59 = vmax.f32 %v3256_v44, 0.0  ;;  %v3221_v19 = vmax.f32 %v3163_v2, %v3195_v3 }
 0x1bf   :  { %v3257_v47 = vadd.f32 %v8084_v46, %v3234_v36  ;;  %3069 = vst.msk [vmem:[#allocation3 + $0x98] sm:$0xff] %vm521_vm4, %v3045_v37  ;;  %2988 = vst.msk [vmem:[#allocation2 + $0x50] sm:$0xff] %vm521_vm4, %v2964_v38  ;;  %v6203_v50 = vpop.f32.mrb[112].mxu0  ;;  %v3141_v52 = vmax.f32 %v3082_v48, %v3114_v49  ;;  %v3167_v6 = vld [vmem:[#allocation3 + $0x58] ss:$2 sm:$0xf] }
 0x1c0   :  { %3068 = vst.msk [vmem:[#allocation3 + $0x90] sm:$0xff] %vm521_vm4, %v3044_v43  ;;  %v2967_v53 = vadd.f32 %v6203_v50, %v2943_v51  ;;  %v6259_v54 = vpop.f32.mrb[112].mxu1  ;;  %v2678_v57 = vpop.f32.mrb[113].mxu0  ;;  %v3274_v60 = vmax.f32 %v3258_v42, 0.0  ;;  %v3165_v12 = vld [vmem:[#allocation3 + $0x48] ss:$2 sm:$0xff] }
 0x1c1   :  { %v3047_v61 = vadd.f32 %v6259_v54, %v3023_v55  ;;  %v2966_v62 = vadd.f32 %v2942_v58, %v2678_v57  ;;  %v2911_v63 = vpop.f32.mrb[113].mxu1  ;;  %v3273_v1 = vmax.f32 %v3257_v47, 0.0  ;;  %v3236_v5 = vmax.f32 %v3141_v52, %v3220_v45  ;;  %3289 = vst.msk [vmem:[#allocation4 + $0x8] sm:$0xf] %vm3288_vm5, %v3272_v59  ;;  %v3197_v13 = vld [vmem:[#allocation3 + $0x49] ss:$2 sm:$0xff] }
 0x1c2   :  { %2991 = vst.msk [vmem:[#allocation2 + $0x68] sm:$0xff] %vm521_vm4, %v2967_v53  ;;  %v3046_v4 = vadd.f32 %v3022_v0, %v2911_v63  ;;  %v3199_v7 = vld [vmem:[#allocation3 + $0x59] ss:$2 sm:$0xf]  ;;  %v5242_v15 = vld [vmem:[%s8686_s3 + $0x60] sm:$0xff]  ;;  %v3222_v32 = vmax.f32 %v3165_v12, %v3197_v13  ;;  %v3024_v38 = vld [vmem:[#allocation3 + $0xb0] sm:$0xff] }
 0x1c3   :  { %3291 = vst.msk [vmem:[#allocation4 + $0x18] sm:$0xf] %vm3288_vm5, %v3274_v60  ;;  %v6206_v8 = vpop.f32.mrb[114].mxu0  ;;  %v3084_v16 = vld [vmem:[#allocation2 + $0x40] ss:$2 sm:$0xf]  ;;  %v3259_v18 = vadd.f32 %v8084_v46, %v3236_v5  ;;  %v3223_v25 = vmax.f32 %v3167_v6, %v3199_v7  ;;  %v8119_v30 = vpack.c.bf16 %v5242_v15, %v5241_v11 }
 0x1c4   :  { %3071 = vst.msk [vmem:[#allocation3 + $0xa8] sm:$0xff] %vm521_vm4, %v3047_v61  ;;  %2990 = vst.msk [vmem:[#allocation2 + $0x60] sm:$0xff] %vm521_vm4, %v2966_v62  ;;  %v2969_v14 = vadd.f32 %v6206_v8, %v2945_v10  ;;  %v3116_v17 = vld [vmem:[#allocation2 + $0x41] ss:$2 sm:$0xf]  ;;  %v3025_v28 = vld [vmem:[#allocation3 + $0xb8] sm:$0xff] }
 0x1c5   :  { %3290 = vst.msk [vmem:[#allocation4 + $0x10] sm:$0xff] %vm521_vm4, %v3273_v1  ;;  %3070 = vst.msk [vmem:[#allocation3 + $0xa0] sm:$0xff] %vm521_vm4, %v3046_v4  ;;  %v3169_v20 = vld [vmem:[#allocation3 + $0x60] ss:$2 sm:$0xff]  ;;  %v3201_v21 = vld [vmem:[#allocation3 + $0x61] ss:$2 sm:$0xff]  ;;  %v3142_v22 = vmax.f32 %v3084_v16, %v3116_v17 }
 0x1c6   :  { %v3086_v9 = vld [vmem:[#allocation2 + $0x48] ss:$2 sm:$0xff]  ;;  %2993 = vst.msk [vmem:[#allocation2 + $0x78] sm:$0xff] %vm521_vm4, %v2969_v14  ;;  %v3088_v23 = vld [vmem:[#allocation2 + $0x58] ss:$2 sm:$0xf]  ;;  %v3224_v33 = vmax.f32 %v3169_v20, %v3201_v21 }
 0x1c7   :  { %v3120_v24 = vld [vmem:[#allocation2 + $0x59] ss:$2 sm:$0xf]  ;;  %v3118_v27 = vld [vmem:[#allocation2 + $0x49] ss:$2 sm:$0xff]  ;;  %v3237_v31 = vmax.f32 %v3142_v22, %v3221_v19  ;;  %v6262_v35 = vpop.f32.mrb[114].mxu1 }
 0x1c8   :  { %v3144_v26 = vmax.f32 %v3088_v23, %v3120_v24  ;;  %v3143_v34 = vmax.f32 %v3086_v9, %v3118_v27  ;;  %v3304_v36 = vld [vmem:[#allocation4] sm:$0xff]  ;;  %v2688_v37 = vpop.f32.mrb[115].mxu0  ;;  %v2947_v39 = vld [vmem:[#allocation2 + $0x88] sm:$0xff]  ;;  %v3275_v40 = vmax.f32 %v3259_v18, 0.0  ;;  %v3049_v43 = vadd.f32 %v6262_v35, %v3025_v28  ;;  %v2921_v45 = vpop.f32.mrb[115].mxu1  ;;  %v5244_v59 = vld [vmem:[%s8686_s3 + $0x70] sm:$0xff] }
 0x1c9   :  { %6281 = vmatprep.mubr.msk.f32.mxu0 %vm521_vm4, %v3304_v36  ;;  %v2968_v44 = vadd.f32 %v2944_v29, %v2688_v37  ;;  %v6209_v47 = vpop.f32.mrb[116].mxu0  ;;  %v3260_v48 = vadd.f32 %v8084_v46, %v3237_v31  ;;  %v3048_v51 = vadd.f32 %v3024_v38, %v2921_v45  ;;  %v5243_v54 = vld [vmem:[%s8686_s3 + $0x68] sm:$0xff]  ;;  %v2946_v57 = vld [vmem:[#allocation2 + $0x80] sm:$0xff]  ;;  %v2949_v0 = vld [vmem:[#allocation2 + $0x98] sm:$0xff] }
 0x1ca   :  { %v3239_v49 = vmax.f32 %v3144_v26, %v3223_v25  ;;  %v2971_v52 = vadd.f32 %v6209_v47, %v2947_v39  ;;  %3292 = vst.msk [vmem:[#allocation4 + $0x20] sm:$0xff] %vm521_vm4, %v3275_v40  ;;  %v3238_v53 = vmax.f32 %v3143_v34, %v3222_v32  ;;  %3073 = vst.msk [vmem:[#allocation3 + $0xb8] sm:$0xff] %vm521_vm4, %v3049_v43  ;;  %v2698_v55 = vpop.f32.mrb[117].mxu0  ;;  %v2948_v5 = vld [vmem:[#allocation2 + $0x90] sm:$0xff]  ;;  %v2951_v10 = vld [vmem:[#allocation2 + $0xa8] sm:$0xff] }
 0x1cb   :  { %v3090_v41 = vld [vmem:[#allocation2 + $0x60] ss:$2 sm:$0xff]  ;;  %v3122_v42 = vld [vmem:[#allocation2 + $0x61] ss:$2 sm:$0xff]  ;;  %2992 = vst.msk [vmem:[#allocation2 + $0x70] sm:$0xff] %vm521_vm4, %v2968_v44  ;;  %v3276_v60 = vmax.f32 %v3260_v48, 0.0  ;;  %v2970_v62 = vadd.f32 %v2946_v57, %v2698_v55  ;;  %v6735_v13 = vpack.c.bf16 %v5244_v59, %v5243_v54 }
 0x1cc   :  { %v3145_v50 = vmax.f32 %v3090_v41, %v3122_v42  ;;  %v3305_v58 = vld [vmem:[#allocation4 + $0x10] sm:$0xff]  ;;  %v3262_v61 = vadd.f32 %v8084_v46, %v3239_v49  ;;  %3072 = vst.msk [vmem:[#allocation3 + $0xb0] sm:$0xff] %vm521_vm4, %v3048_v51  ;;  %2995 = vst.msk [vmem:[#allocation2 + $0x88] sm:$0xff] %vm521_vm4, %v2971_v52  ;;  %v6212_v63 = vpop.f32.mrb[118].mxu0  ;;  %v3261_v1 = vadd.f32 %v8084_v46, %v3238_v53  ;;  %v5245_v14 = vld [vmem:[%s8686_s3 + $0x78] sm:$0xff] }
 0x1cd   :  { %6282 = vmatmul.mubr.msk.f32.vlgmr.msra.gmra.mrb[124].mxu0 %vm521_vm4, %v3305_v58  ;;  %v2973_v3 = vadd.f32 %v6212_v63, %v2949_v0  ;;  %v2708_v4 = vpop.f32.mrb[119].mxu0  ;;  %3293 = vst.msk [vmem:[#allocation4 + $0x28] sm:$0xf] %vm3288_vm5, %v3276_v60  ;;  %v3171_v15 = vld [vmem:[#allocation3 + $0x70] ss:$2 sm:$0xf] }
 0x1ce   :  { %v3240_v2 = vmax.f32 %v3145_v50, %v3224_v33  ;;  %6730 = vmatpush3.bf16.msra.mxu0 %v7999_v56  ;;  %v3278_v6 = vmax.f32 %v3262_v61, 0.0  ;;  %2994 = vst.msk [vmem:[#allocation2 + $0x80] sm:$0xff] %vm521_vm4, %v2970_v62  ;;  %v2972_v7 = vadd.f32 %v2948_v5, %v2708_v4  ;;  %v3277_v11 = vmax.f32 %v3261_v1, 0.0  ;;  %v2950_v17 = vld [vmem:[#allocation2 + $0xa0] sm:$0xff]  ;;  %v2953_v26 = vld [vmem:[#allocation2 + $0xb8] sm:$0xff]  ;;  %v5256_v37 = vld [vmem:[%s8686_s3 + $0x90] sm:$0xff] }
 0x1cf   :  { %v6215_v8 = vpop.f32.mrb[120].mxu0  ;;  %6732 = vmatprep.subr.bf16.mxu0 %v8119_v30  ;;  %2997 = vst.msk [vmem:[#allocation2 + $0x98] sm:$0xff] %vm521_vm4, %v2973_v3  ;;  %v5246_v18 = vld [vmem:[%s8686_s3 + $0x80] sm:$0xff]  ;;  %v3203_v19 = vld [vmem:[#allocation3 + $0x71] ss:$2 sm:$0xf] }
 0x1d0   :  { %v3263_v12 = vadd.f32 %v8084_v46, %v3240_v2  ;;  %v2975_v56 = vadd.f32 %v6215_v8, %v2951_v10  ;;  %v2718_v16 = vpop.f32.mrb[121].mxu0  ;;  %3295 = vst.msk [vmem:[#allocation4 + $0x38] sm:$0xf] %vm3288_vm5, %v3278_v6  ;;  %v3175_v22 = vld [vmem:[#allocation3 + $0x88] ss:$2 sm:$0xf]  ;;  %v6739_v27 = vpack.c.bf16 %v5246_v18, %v5245_v14  ;;  %v3225_v32 = vmax.f32 %v3171_v15, %v3203_v19 }
 0x1d1   :  { %2996 = vst.msk [vmem:[#allocation2 + $0x90] sm:$0xff] %vm521_vm4, %v2972_v7  ;;  %v2974_v20 = vadd.f32 %v2950_v17, %v2718_v16  ;;  %3294 = vst.msk [vmem:[#allocation4 + $0x30] sm:$0xff] %vm521_vm4, %v3277_v11  ;;  %v3207_v9 = vld [vmem:[#allocation3 + $0x89] ss:$2 sm:$0xf]  ;;  %v3306_v23 = vld [vmem:[#allocation4 + $0x20] sm:$0xff] }
 0x1d2   :  { %v3279_v21 = vmax.f32 %v3263_v12, 0.0  ;;  %2999 = vst.msk [vmem:[#allocation2 + $0xa8] sm:$0xff] %vm521_vm4, %v2975_v56  ;;  %6734 = vmatpush3.bf16.msra.mxu0 %v8119_v30  ;;  %v3173_v24 = vld [vmem:[#allocation3 + $0x78] ss:$2 sm:$0xff]  ;;  %v3205_v25 = vld [vmem:[#allocation3 + $0x79] ss:$2 sm:$0xff]  ;;  %6284 = vmatprep.mubr.msk.f32.mxu0 %vm521_vm4, %v3306_v23  ;;  %v3227_v43 = vmax.f32 %v3175_v22, %v3207_v9 }
 0x1d3   :  { %2998 = vst.msk [vmem:[#allocation2 + $0xa0] sm:$0xff] %vm521_vm4, %v2974_v20  ;;  %6736 = vmatprep.subr.bf16.mxu0 %v6735_v13  ;;  %v3177_v28 = vld [vmem:[#allocation3 + $0x90] ss:$2 sm:$0xff]  ;;  %v3124_v31 = vld [vmem:[#allocation2 + $0x71] ss:$2 sm:$0xf]  ;;  %v3226_v51 = vmax.f32 %v3173_v24, %v3205_v25 }
 0x1d4   :  { %3296 = vst.msk [vmem:[#allocation4 + $0x40] sm:$0xff] %vm521_vm4, %v3279_v21  ;;  %v3092_v29 = vld [vmem:[#allocation2 + $0x70] ss:$2 sm:$0xf]  ;;  %v3209_v33 = vld [vmem:[#allocation3 + $0x91] ss:$2 sm:$0xff] }
 0x1d5   :  { %v3179_v34 = vld [vmem:[#allocation3 + $0xa0] ss:$2 sm:$0xf]  ;;  %v3211_v35 = vld [vmem:[#allocation3 + $0xa1] ss:$2 sm:$0xf]  ;;  %v3146_v36 = vmax.f32 %v3092_v29, %v3124_v31  ;;  %v3228_v58 = vmax.f32 %v3177_v28, %v3209_v33 }
 0x1d6   :  { %v6218_v30 = vpop.f32.mrb[122].mxu0  ;;  %v5257_v38 = vld [vmem:[%s8686_s3 + $0x98] sm:$0xff]  ;;  %v3096_v39 = vld [vmem:[#allocation2 + $0x88] ss:$2 sm:$0xf]  ;;  %6738 = vmatpush3.bf16.msra.mxu0 %v6735_v13  ;;  %v2952_v49 = vld [vmem:[#allocation2 + $0xb0] sm:$0xff]  ;;  %v3229_v62 = vmax.f32 %v3179_v34, %v3211_v35 }
 0x1d7   :  { %v3128_v40 = vld [vmem:[#allocation2 + $0x89] ss:$2 sm:$0xf]  ;;  %v2977_v41 = vadd.f32 %v6218_v30, %v2953_v26  ;;  %v3094_v45 = vld [vmem:[#allocation2 + $0x78] ss:$2 sm:$0xff]  ;;  %v2728_v48 = vpop.f32.mrb[123].mxu0  ;;  %6740 = vmatprep.subr.bf16.mxu0 %v6739_v27  ;;  %v3241_v50 = vmax.f32 %v3146_v36, %v3225_v32  ;;  %v6743_v2 = vpack.c.bf16 %v5257_v38, %v5256_v37 }
 0x1d8   :  { %v5247_v42 = vld [vmem:[%s8686_s3 + $0x88] sm:$0xff]  ;;  %v3148_v44 = vmax.f32 %v3096_v39, %v3128_v40  ;;  %v3126_v47 = vld [vmem:[#allocation2 + $0x79] ss:$2 sm:$0xff]  ;;  %v3098_v53 = vld [vmem:[#allocation2 + $0x90] ss:$2 sm:$0xff]  ;;  %v2976_v55 = vadd.f32 %v2952_v49, %v2728_v48 }
 0x1d9   :  { %v3147_v52 = vmax.f32 %v3094_v45, %v3126_v47  ;;  %v3130_v54 = vld [vmem:[#allocation2 + $0x91] ss:$2 sm:$0xff]  ;;  %3001 = vst.msk [vmem:[#allocation2 + $0xb8] sm:$0xff] %vm521_vm4, %v2977_v41  ;;  %v3264_v60 = vadd.f32 %v8084_v46, %v3241_v50  ;;  %v3183_v8 = vld [vmem:[#allocation3 + $0xb8] ss:$2 sm:$0xf] }
 0x1da   :  { %v3307_v57 = vld [vmem:[#allocation4 + $0x30] sm:$0xff]  ;;  %v3149_v59 = vmax.f32 %v3098_v53, %v3130_v54  ;;  %v3243_v61 = vmax.f32 %v3148_v44, %v3227_v43  ;;  %v3100_v63 = vld [vmem:[#allocation2 + $0xa0] ss:$2 sm:$0xf]  ;;  %3000 = vst.msk [vmem:[#allocation2 + $0xb0] sm:$0xff] %vm521_vm4, %v2976_v55  ;;  %6742 = vmatpush3.bf16.msra.mxu0 %v6739_v27  ;;  %v5261_v41 = vld [vmem:[%s8686_s3 + $0xb8] sm:$0xff] }
 0x1db   :  { %6285 = vmatmul.mubr.msk.f32.gmra.mrb[126].mxu0 %vm521_vm4, %v3307_v57  ;;  %v3132_v0 = vld [vmem:[#allocation2 + $0xa1] ss:$2 sm:$0xf]  ;;  %v3242_v1 = vmax.f32 %v3147_v52, %v3226_v51  ;;  %6309 = vmatprep.subr.mxu0 %v5247_v42  ;;  %v3280_v6 = vmax.f32 %v3264_v60, 0.0  ;;  %v3181_v15 = vld [vmem:[#allocation3 + $0xa8] ss:$2 sm:$0xff] }
 0x1dc   :  { %v3150_v3 = vmax.f32 %v3100_v63, %v3132_v0  ;;  %v3308_v4 = vld [vmem:[#allocation4 + $0x40] sm:$0xff]  ;;  %v3244_v5 = vmax.f32 %v3149_v59, %v3228_v58  ;;  %v3266_v7 = vadd.f32 %v8084_v46, %v3243_v61  ;;  %v3215_v11 = vld [vmem:[#allocation3 + $0xb9] ss:$2 sm:$0xf]  ;;  %v3213_v56 = vld [vmem:[#allocation3 + $0xa9] ss:$2 sm:$0xff] }
 0x1dd   :  { %6287 = vmatprep.mubr.msk.f32.mxu0 %vm521_vm4, %v3308_v4  ;;  %v3265_v10 = vadd.f32 %v8084_v46, %v3242_v1  ;;  %3297 = vst.msk [vmem:[#allocation4 + $0x48] sm:$0xf] %vm3288_vm5, %v3280_v6  ;;  %v3231_v20 = vmax.f32 %v3183_v8, %v3215_v11  ;;  %v3230_v25 = vmax.f32 %v3181_v15, %v3213_v56  ;;  %v5258_v30 = vld [vmem:[%s8686_s3 + $0xa0] sm:$0xff]  ;;  %v3459_v39 = vld [vmem:[#allocation4 + $0x11] sm:$0xff]  ;;  %v5263_v47 = vld [vmem:[%s8686_s3 + $0xc8] sm:$0xff] }
 0x1de   :  { %v3267_v12 = vadd.f32 %v8084_v46, %v3244_v5  ;;  %v3282_v13 = vmax.f32 %v3266_v7, 0.0  ;;  %v3245_v14 = vmax.f32 %v3150_v3, %v3229_v62  ;;  %6310 = vmatpush3.msra.mxu0 %v5247_v42  ;;  %v3458_v37 = vld [vmem:[#allocation4 + $0x1] sm:$0xff]  ;;  %v5260_v40 = vld [vmem:[%s8686_s3 + $0xb0] sm:$0xff]  ;;  %v5273_v54 = vld [vmem:[%s8686_s3 + $0xd8] sm:$0xff] }
 0x1df   :  { %v3281_v16 = vmax.f32 %v3265_v10, 0.0  ;;  %6744 = vmatprep.subr.bf16.mxu0 %v6743_v2  ;;  %v3460_v42 = vld [vmem:[#allocation4 + $0x21] sm:$0xff]  ;;  %v6751_v43 = vpack.c.bf16 %v5261_v41, %v5260_v40  ;;  %v3461_v44 = vld [vmem:[#allocation4 + $0x31] sm:$0xff] }
 0x1e0   :  { %v3104_v17 = vld [vmem:[#allocation2 + $0xb8] ss:$2 sm:$0xf]  ;;  %v3136_v18 = vld [vmem:[#allocation2 + $0xb9] ss:$2 sm:$0xf]  ;;  %v3268_v19 = vadd.f32 %v8084_v46, %v3245_v14 }
 0x1e1   :  { %3299 = vst.msk [vmem:[#allocation4 + $0x58] sm:$0xf] %vm3288_vm5, %v3282_v13  ;;  %v3152_v21 = vmax.f32 %v3104_v17, %v3136_v18  ;;  %v3283_v22 = vmax.f32 %v3267_v12, 0.0  ;;  %v3102_v9 = vld [vmem:[#allocation2 + $0xa8] ss:$2 sm:$0xff]  ;;  %v5262_v45 = vld [vmem:[%s8686_s3 + $0xc0] sm:$0xff] }
 0x1e2   :  { %3298 = vst.msk [vmem:[#allocation4 + $0x50] sm:$0xff] %vm521_vm4, %v3281_v16  ;;  %v3134_v23 = vld [vmem:[#allocation2 + $0xa9] ss:$2 sm:$0xff]  ;;  %v3284_v24 = vmax.f32 %v3268_v19, 0.0  ;;  %v6755_v49 = vpack.c.bf16 %v5263_v47, %v5262_v45  ;;  %v5274_v55 = vld [vmem:[%s8686_s3 + $0xe0] sm:$0xff]  ;;  %v5277_v63 = vld [vmem:[%s8686_s3 + $0xf8] sm:$0xff] }
 0x1e3   :  { %v3151_v26 = vmax.f32 %v3102_v9, %v3134_v23  ;;  %3300 = vst.msk [vmem:[#allocation4 + $0x60] sm:$0xff] %vm521_vm4, %v3283_v22  ;;  %v3247_v27 = vmax.f32 %v3152_v21, %v3231_v20  ;;  %v5264_v52 = vld [vmem:[%s8686_s3 + $0xd0] sm:$0xff]  ;;  %v3629_v57 = vld [vmem:[#allocation4 + $0x2] sm:$0xff]  ;;  %v6759_v60 = vpack.c.bf16 %v5274_v55, %v5273_v54  ;;  %v5281_v11 = vld [vmem:[%s8686_s3 + $0x118] sm:$0xff] }
 0x1e4   :  { %3301 = vst.msk [vmem:[#allocation4 + $0x68] sm:$0xf] %vm3288_vm5, %v3284_v24  ;;  %v3462_v48 = vld [vmem:[#allocation4 + $0x41] sm:$0xff]  ;;  %v5276_v59 = vld [vmem:[%s8686_s3 + $0xf0] sm:$0xff]  ;;  %v5293_v16 = vld [vmem:[%s8686_s3 + $0x138] sm:$0xff] }
 0x1e5   :  { %v3246_v28 = vmax.f32 %v3151_v26, %v3230_v25  ;;  %v3270_v29 = vadd.f32 %v8084_v46, %v3247_v27  ;;  %v5275_v58 = vld [vmem:[%s8686_s3 + $0xe8] sm:$0xff]  ;;  %v3630_v62 = vld [vmem:[#allocation4 + $0x12] sm:$0xff]  ;;  %v5278_v0 = vld [vmem:[%s8686_s3 + $0x100] sm:$0xff] }
 0x1e6   :  { %v6763_v61 = vpack.c.bf16 %v5276_v59, %v5275_v58  ;;  %v3631_v1 = vld [vmem:[#allocation4 + $0x22] sm:$0xff]  ;;  %v3632_v3 = vld [vmem:[#allocation4 + $0x32] sm:$0xff] }
 0x1e7   :  { %v3269_v31 = vadd.f32 %v8084_v46, %v3246_v28  ;;  %v3286_v32 = vmax.f32 %v3270_v29, 0.0  ;;  %v5259_v46 = vld [vmem:[%s8686_s3 + $0xa8] sm:$0xff]  ;;  %v5280_v5 = vld [vmem:[%s8686_s3 + $0x110] sm:$0xff]  ;;  %v5290_v13 = vld [vmem:[%s8686_s3 + $0x120] sm:$0xff] }
 0x1e8   :  { %v6747_v38 = vpack.c.bf16 %v5259_v46, %v5258_v30  ;;  %v5279_v4 = vld [vmem:[%s8686_s3 + $0x108] sm:$0xff]  ;;  %v5292_v56 = vld [vmem:[%s8686_s3 + $0x130] sm:$0xff]  ;;  %v5294_v20 = vld [vmem:[%s8686_s3 + $0x140] sm:$0xff] }
 0x1e9   :  { %v3309_v33 = vld [vmem:[#allocation4 + $0x50] sm:$0xff]  ;;  %v3285_v34 = vmax.f32 %v3269_v31, 0.0  ;;  %3303 = vst.msk [vmem:[#allocation4 + $0x78] sm:$0xf] %vm3288_vm5, %v3286_v32  ;;  %v3633_v6 = vld [vmem:[#allocation4 + $0x42] sm:$0xff]  ;;  %v6771_v7 = vpack.c.bf16 %v5280_v5, %v5279_v4  ;;  %v6779_v18 = vpack.c.bf16 %v5293_v16, %v5292_v56  ;;  %v5297_v25 = vld [vmem:[%s8686_s3 + $0x158] sm:$0xff] }
 0x1ea   :  { %6288 = vmatmul.mubr.msk.f32.gmra.mrb[128].mxu0 %vm521_vm4, %v3309_v33  ;;  %v3310_v35 = vld [vmem:[#allocation4 + $0x60] sm:$0xff]  ;;  %v3463_v50 = vld [vmem:[#allocation4 + $0x51] sm:$0xff]  ;;  %v5291_v14 = vld [vmem:[%s8686_s3 + $0x128] sm:$0xff] }
 0x1eb   :  { %6290 = vmatprep.mubr.msk.f32.mxu0 %vm521_vm4, %v3310_v35  ;;  %3302 = vst.msk [vmem:[#allocation4 + $0x70] sm:$0xff] %vm521_vm4, %v3285_v34  ;;  %v3464_v51 = vld [vmem:[#allocation4 + $0x61] sm:$0xff]  ;;  %v3634_v8 = vld [vmem:[#allocation4 + $0x52] sm:$0xff]  ;;  %v6775_v17 = vpack.c.bf16 %v5291_v14, %v5290_v13 }
 0x1ec   :  { %v3635_v10 = vld [vmem:[#allocation4 + $0x62] sm:$0xff]  ;;  %v3801_v19 = vld [vmem:[#allocation4 + $0x13] sm:$0xff] }
 0x1ed   :  { %v3800_v15 = vld [vmem:[#allocation4 + $0x3] sm:$0xff]  ;;  %v3803_v23 = vld [vmem:[#allocation4 + $0x33] sm:$0xff] }
 0x1ee   :  { %v5295_v21 = vld [vmem:[%s8686_s3 + $0x148] sm:$0xff]  ;;  %v5296_v24 = vld [vmem:[%s8686_s3 + $0x150] sm:$0xff]  ;;  %v5298_v32 = vld [vmem:[%s8686_s3 + $0x160] sm:$0xff] }
 0x1ef   :  { %v3802_v22 = vld [vmem:[#allocation4 + $0x23] sm:$0xff]  ;;  %v6783_v9 = vpack.c.bf16 %v5295_v21, %v5294_v20  ;;  %v6787_v27 = vpack.c.bf16 %v5297_v25, %v5296_v24  ;;  %v3805_v28 = vld [vmem:[#allocation4 + $0x53] sm:$0xff] }
 0x1f0   :  { %v3804_v26 = vld [vmem:[#allocation4 + $0x43] sm:$0xff]  ;;  %v3972_v34 = vld [vmem:[#allocation4 + $0x14] sm:$0xff] }
 0x1f1   :  { %v3806_v29 = vld [vmem:[#allocation4 + $0x63] sm:$0xff]  ;;  %v3976_v46 = vld [vmem:[#allocation4 + $0x54] sm:$0xff] }
 0x1f2   :  { %v3311_v36 = vld [vmem:[#allocation4 + $0x70] sm:$0xff]  ;;  %v3971_v33 = vld [vmem:[#allocation4 + $0x4] sm:$0xff] }
 0x1f3   :  { %6291 = vmatmul.mubr.msk.f32.gmra.mrb[130].mxu0 %vm521_vm4, %v3311_v36  ;;  %v3465_v53 = vld [vmem:[#allocation4 + $0x71] sm:$0xff]  ;;  %v3973_v35 = vld [vmem:[#allocation4 + $0x24] sm:$0xff] }
 0x1f4   :  { %6311 = vmatprep.mubr.msk.f32.mxu0 %vm521_vm4, %v3458_v37  ;;  %v3636_v12 = vld [vmem:[#allocation4 + $0x72] sm:$0xff]  ;;  %v3975_v30 = vld [vmem:[#allocation4 + $0x44] sm:$0xff] }
 0x1f5   :  { %v3807_v31 = vld [vmem:[#allocation4 + $0x73] sm:$0xff]  ;;  %v3977_v37 = vld [vmem:[#allocation4 + $0x64] sm:$0xff] }
 0x1f6   :  { %v3974_v36 = vld [vmem:[#allocation4 + $0x34] sm:$0xff]  ;;  %v5308_v40 = vld [vmem:[%s8688_s5 + $0x80] sm:$0xff]  ;;  %v5309_v41 = vld [vmem:[%s8688_s5 + $0x88] sm:$0xff] }
 0x1f7   :  { %6312 = vmatmul.mubr.msk.f32.vlgmr.msra.gmra.mrb[124].mxu0 %vm521_vm4, %v3459_v39  ;;  %v6965_v39 = vmov 0.0|0.0   ;;  %v5312_v47 = vld [vmem:[%s8688_s5 + $0xa0] sm:$0xff] }
 0x1f8   :  { %6746 = vmatpush3.bf16.msra.mxu0 %v6743_v2  ;;  %6314 = vmatprep.mubr.msk.f32.mxu0 %vm521_vm4, %v3460_v42  ;;  %v6767_v2 = vpack.c.bf16 %v5278_v0, %v5277_v63  ;;  %v5310_v42 = vld [vmem:[%s8688_s5 + $0x90] sm:$0xff]  ;;  %v5315_v0 = vld [vmem:[%s8688_s5 + $0xb8] sm:$0xff] }
 0x1f9   :  { %6748 = vmatprep.subr.bf16.mxu0 %v6747_v38  ;;  %6791 = vmatprep.subr.bf16.mxu1 %v6965_v39  ;;  %v5314_v63 = vld [vmem:[%s8688_s5 + $0xb0] sm:$0xff] }
 0x1fb   :  { %6315 = vmatmul.mubr.msk.f32.gmra.mrb[126].mxu0 %vm521_vm4, %v3461_v44  ;;  %v5311_v44 = vld [vmem:[%s8688_s5 + $0x98] sm:$0xff] }
 0x1fc   :  { %6750 = vmatpush3.bf16.msra.mxu0 %v6747_v38  ;;  %6317 = vmatprep.mubr.msk.f32.mxu0 %vm521_vm4, %v3462_v48  ;;  %v3978_v38 = vld [vmem:[#allocation4 + $0x74] sm:$0xff]  ;;  %v6795_v45 = vpack.c.bf16 %v5311_v44, %v5310_v42  ;;  %v5313_v48 = vld [vmem:[%s8688_s5 + $0xa8] sm:$0xff] }
 0x1fd   :  { %6752 = vmatprep.subr.bf16.mxu0 %v6751_v43 }
 0x1ff   :  { %6318 = vmatmul.mubr.msk.f32.gmra.mrb[128].mxu0 %vm521_vm4, %v3463_v50 }
 0x200   :  { %6754 = vmatpush3.bf16.msra.mxu0 %v6751_v43  ;;  %6320 = vmatprep.mubr.msk.f32.mxu0 %vm521_vm4, %v3464_v51  ;;  %v6792_v43 = vpack.c.bf16 %v5309_v41, %v5308_v40 }
 0x201   :  { %6756 = vmatprep.subr.bf16.mxu0 %v6755_v49 }
 0x202   :  { %6793 = vmatpush3.bf16.msra.mxu1 %v6792_v43 }
 0x203   :  { %6321 = vmatmul.mubr.msk.f32.gmra.mrb[130].mxu0 %vm521_vm4, %v3465_v53  ;;  %6794 = vmatprep.subr.bf16.mxu1 %v6965_v39 }
 0x204   :  { %6758 = vmatpush3.bf16.msra.mxu0 %v6755_v49  ;;  %6341 = vmatprep.mubr.msk.f32.mxu0 %vm521_vm4, %v3629_v57  ;;  %v6798_v49 = vpack.c.bf16 %v5313_v48, %v5312_v47 }
 0x205   :  { %6339 = vmatprep.subr.mxu0 %v5264_v52 }
 0x206   :  { %6796 = vmatpush3.bf16.msra.mxu1 %v6795_v45 }
 0x207   :  { %6797 = vmatprep.subr.bf16.mxu1 %v6965_v39 }
 0x208   :  { %6340 = vmatpush3.msra.mxu0 %v5264_v52 }
 0x209   :  { %6342 = vmatmul.mubr.msk.f32.vlgmr.msra.gmra.mrb[124].mxu0 %vm521_vm4, %v3630_v62  ;;  %6760 = vmatprep.subr.bf16.mxu0 %v6759_v60 }
 0x20a   :  { %6344 = vmatprep.mubr.msk.f32.mxu0 %vm521_vm4, %v3631_v1  ;;  %6762 = vmatpush3.bf16.msra.mxu0 %v6759_v60 }
 0x20b   :  { %6764 = vmatprep.subr.bf16.mxu0 %v6763_v61  ;;  %6799 = vmatpush3.bf16.msra.mxu1 %v6798_v49 }
 0x20c   :  { %6800 = vmatprep.subr.bf16.mxu1 %v6965_v39 }
 0x20d   :  { %6345 = vmatmul.mubr.msk.f32.gmra.mrb[126].mxu0 %vm521_vm4, %v3632_v3  ;;  %v6801_v3 = vpack.c.bf16 %v5315_v0, %v5314_v63 }
 0x20e   :  { %6347 = vmatprep.mubr.msk.f32.mxu0 %vm521_vm4, %v3633_v6  ;;  %6766 = vmatpush3.bf16.msra.mxu0 %v6763_v61 }
 0x20f   :  { %6768 = vmatprep.subr.bf16.mxu0 %v6767_v2  ;;  %6802 = vmatpush3.bf16.msra.mxu1 %v6801_v3 }
 0x210   :  { %6803 = vmatprep.subr.bf16.mxu1 %v6965_v39 }
 0x211   :  { %6348 = vmatmul.mubr.msk.f32.gmra.mrb[128].mxu0 %vm521_vm4, %v3634_v8 }
 0x212   :  { %6350 = vmatprep.mubr.msk.f32.mxu0 %vm521_vm4, %v3635_v10  ;;  %6770 = vmatpush3.bf16.msra.mxu0 %v6767_v2 }
 0x213   :  { %6772 = vmatprep.subr.bf16.mxu0 %v6771_v7 }
 0x215   :  { %6351 = vmatmul.mubr.msk.f32.gmra.mrb[130].mxu0 %vm521_vm4, %v3636_v12 }
 0x216   :  { %6774 = vmatpush3.bf16.msra.mxu0 %v6771_v7  ;;  %6371 = vmatprep.mubr.msk.f32.mxu0 %vm521_vm4, %v3800_v15 }
 0x217   :  { %6369 = vmatprep.subr.mxu0 %v5281_v11 }
 0x21a   :  { %6370 = vmatpush3.msra.mxu0 %v5281_v11 }
 0x21b   :  { %6372 = vmatmul.mubr.msk.f32.vlgmr.msra.gmra.mrb[124].mxu0 %vm521_vm4, %v3801_v19  ;;  %6776 = vmatprep.subr.bf16.mxu0 %v6775_v17  ;;  %v5317_v19 = vld [vmem:[%s8688_s5 + $0xc8] sm:$0xff] }
 0x21c   :  { %6374 = vmatprep.mubr.msk.f32.mxu0 %vm521_vm4, %v3802_v22  ;;  %6778 = vmatpush3.bf16.msra.mxu0 %v6775_v17 }
 0x21d   :  { %6780 = vmatprep.subr.bf16.mxu0 %v6779_v18 }
 0x21f   :  { %6375 = vmatmul.mubr.msk.f32.gmra.mrb[126].mxu0 %vm521_vm4, %v3803_v23 }
 0x220   :  { %6377 = vmatprep.mubr.msk.f32.mxu0 %vm521_vm4, %v3804_v26  ;;  %6782 = vmatpush3.bf16.msra.mxu0 %v6779_v18  ;;  %v5316_v18 = vld [vmem:[%s8688_s5 + $0xc0] sm:$0xff] }
 0x221   :  { %6784 = vmatprep.subr.bf16.mxu0 %v6783_v9  ;;  %v6804_v20 = vpack.c.bf16 %v5317_v19, %v5316_v18 }
 0x223   :  { %6378 = vmatmul.mubr.msk.f32.gmra.mrb[128].mxu0 %vm521_vm4, %v3805_v28  ;;  %6805 = vmatpush3.bf16.msra.mxu1 %v6804_v20  ;;  %v5319_v28 = vld [vmem:[%s8688_s5 + $0xd8] sm:$0xff] }
 0x224   :  { %6380 = vmatprep.mubr.msk.f32.mxu0 %vm521_vm4, %v3806_v29  ;;  %6786 = vmatpush3.bf16.msra.mxu0 %v6783_v9  ;;  %v5320_v29 = vld [vmem:[%s8688_s5 + $0xe0] sm:$0xff] }
 0x225   :  { %6788 = vmatprep.subr.bf16.mxu0 %v6787_v27  ;;  %6806 = vmatprep.subr.bf16.mxu1 %v6965_v39 }
 0x227   :  { %6381 = vmatmul.mubr.msk.f32.gmra.mrb[130].mxu0 %vm521_vm4, %v3807_v31 }
 0x228   :  { %6790 = vmatpush3.bf16.msra.mxu0 %v6787_v27  ;;  %6401 = vmatprep.mubr.msk.f32.mxu0 %vm521_vm4, %v3971_v33  ;;  %v5318_v27 = vld [vmem:[%s8688_s5 + $0xd0] sm:$0xff]  ;;  %v6968_v33 = vmov 0.0  }
 0x229   :  { %6399 = vmatprep.subr.mxu0 %v5298_v32  ;;  %v6807_v31 = vpack.c.bf16 %v5319_v28, %v5318_v27  ;;  %6445 = vmatprep.mubr.msk.f32.mxu1 %vm6967_vm6, %v6968_v33 }
 0x22b   :  { %6808 = vmatpush3.bf16.msra.mxu1 %v6807_v31 }
 0x22c   :  { %6400 = vmatpush3.msra.mxu0 %v5298_v32  ;;  %v5321_v32 = vld [vmem:[%s8688_s5 + $0xe8] sm:$0xff]  ;;  %6809 = vmatprep.subr.bf16.mxu1 %v6965_v39 }
 0x22d   :  { %6402 = vmatmul.mubr.msk.f32.vlgmr.msra.gmra.mrb[124].mxu0 %vm521_vm4, %v3972_v34  ;;  %6887 = vmatprep.subr.bf16.mxu0 %v6965_v39 }
 0x22e   :  { %6404 = vmatprep.mubr.msk.f32.mxu0 %vm521_vm4, %v3973_v35  ;;  %v6810_v35 = vpack.c.bf16 %v5321_v32, %v5320_v29 }
 0x230   :  { %6811 = vmatpush3.bf16.msra.mxu1 %v6810_v35  ;;  %v4267_v35 = vld [vmem:[%s8688_s5 + $0x8] sm:$0xff] }
 0x231   :  { %6405 = vmatmul.mubr.msk.f32.gmra.mrb[126].mxu0 %vm521_vm4, %v3974_v36  ;;  %v5322_v36 = vld [vmem:[%s8688_s5 + $0xf0] sm:$0xff]  ;;  %6812 = vmatprep.subr.bf16.mxu1 %v6965_v39 }
 0x232   :  { %6407 = vmatprep.mubr.msk.f32.mxu0 %vm521_vm4, %v3975_v30  ;;  %v5323_v30 = vld [vmem:[%s8688_s5 + $0xf8] sm:$0xff] }
 0x235   :  { %6408 = vmatmul.mubr.msk.f32.gmra.mrb[128].mxu0 %vm521_vm4, %v3976_v46  ;;  %v6813_v46 = vpack.c.bf16 %v5323_v30, %v5322_v36 }
 0x236   :  { %6410 = vmatprep.mubr.msk.f32.mxu0 %vm521_vm4, %v3977_v37  ;;  %v5307_v37 = vld [vmem:[%s8689_s4] ss:$0 sm:$0xff] }
 0x237   :  { %6814 = vmatpush3.bf16.msra.mxu1 %v6813_v46  ;;  %v4232_v40 = vcombine.high %v5307_v37, %v5307_v37 }
 0x238   :  { %6815 = vmatprep.subr.bf16.mxu1 %v6965_v39 }
 0x239   :  { %6411 = vmatmul.mubr.msk.f32.gmra.mrb[130].mxu0 %vm521_vm4, %v3978_v38 }
 0x23a   :  { %6583 = vmatprep.mubr.msk.f32.mxu0 %vm6967_vm6, %v6968_v33 }
 0x300   :  { %v6403_v50 = vpop.f32.mrb[124].mxu0 }
 0x301   :  { %4135 = vst [vmem:[#allocation5 + $0x8] sm:$0xff] %v6403_v50  ;;  %v4079_v51 = vpop.f32.mrb[125].mxu0 }
 0x302   :  { %4134 = vst [vmem:[#allocation5] sm:$0xff] %v4079_v51 }
 0x304   :  { %v6406_v52 = vpop.f32.mrb[126].mxu0 }
 0x305   :  { %4137 = vst [vmem:[#allocation5 + $0x18] sm:$0xff] %v6406_v52  ;;  %v4089_v53 = vpop.f32.mrb[127].mxu0 }
 0x306   :  { %4136 = vst [vmem:[#allocation5 + $0x10] sm:$0xff] %v4089_v53 }
 0x308   :  { %v6409_v54 = vpop.f32.mrb[128].mxu0  ;;  %v4144_v55 = vld [vmem:[#allocation5 + $0x8] ss:$2 sm:$0xf] }
 0x309   :  { %4139 = vst [vmem:[#allocation5 + $0x28] sm:$0xff] %v6409_v54  ;;  %v4099_v57 = vpop.f32.mrb[129].mxu0  ;;  %v4142_v58 = vld [vmem:[#allocation5] ss:$2 sm:$0xf] }
 0x30a   :  { %4138 = vst [vmem:[#allocation5 + $0x20] sm:$0xff] %v4099_v57  ;;  %v4158_v59 = vld [vmem:[#allocation5 + $0x1] ss:$2 sm:$0xf] }
 0x30b   :  { %v4160_v60 = vld [vmem:[#allocation5 + $0x9] ss:$2 sm:$0xf]  ;;  %v8317_v61 = vmax.f32 %v4142_v58, %v4158_v59 }
 0x30c   :  { %v8319_v62 = vmax.f32 %v4144_v55, %v4160_v60  ;;  %v6412_v1 = vpop.f32.mrb[130].mxu0  ;;  %v4148_v2 = vld [vmem:[#allocation5 + $0x18] ss:$2 sm:$0xf] }
 0x30d   :  { %4141 = vst [vmem:[#allocation5 + $0x38] sm:$0xff] %v6412_v1  ;;  %v4109_v4 = vpop.f32.mrb[131].mxu0  ;;  %v4146_v6 = vld [vmem:[#allocation5 + $0x10] ss:$2 sm:$0xf] }
 0x30e   :  { %v4189_v5 = vcombine.low %v8317_v61, %v8319_v62  ;;  %4140 = vst [vmem:[#allocation5 + $0x30] sm:$0xff] %v4109_v4  ;;  %v4162_v7 = vld [vmem:[#allocation5 + $0x11] ss:$2 sm:$0xf] }
 0x30f   :  { %v4164_v8 = vld [vmem:[#allocation5 + $0x19] ss:$2 sm:$0xf]  ;;  %v4175_v10 = vmax.f32 %v4146_v6, %v4162_v7 }
 0x310   :  { %4197 = vrot.lane.b32.xlu0 %v4189_v5, %s6966_s27  ;;  %v4176_v11 = vmax.f32 %v4148_v2, %v4164_v8  ;;  %v4152_v12 = vld [vmem:[#allocation5 + $0x28] ss:$2 sm:$0xf]  ;;  %v4168_v13 = vld [vmem:[#allocation5 + $0x29] ss:$2 sm:$0xf] }
 0x311   :  { %v4150_v15 = vld [vmem:[#allocation5 + $0x20] ss:$2 sm:$0xf]  ;;  %v4166_v56 = vld [vmem:[#allocation5 + $0x21] ss:$2 sm:$0xf]  ;;  %v4178_v16 = vmax.f32 %v4152_v12, %v4168_v13 }
 0x312   :  { %v4190_v14 = vcombine.low %v4175_v10, %v4176_v11  ;;  %v4177_v17 = vmax.f32 %v4150_v15, %v4166_v56 }
 0x314   :  { %4199 = vrot.lane.b32.xlu0 %v4190_v14, %s6966_s27  ;;  %v4191_v21 = vcombine.low %v4177_v17, %v4178_v16  ;;  %v4156_v22 = vld [vmem:[#allocation5 + $0x38] ss:$2 sm:$0xf]  ;;  %v4172_v9 = vld [vmem:[#allocation5 + $0x39] ss:$2 sm:$0xf] }
 0x315   :  { %v4154_v23 = vld [vmem:[#allocation5 + $0x30] ss:$2 sm:$0xf]  ;;  %v4170_v24 = vld [vmem:[#allocation5 + $0x31] ss:$2 sm:$0xf]  ;;  %v4180_v25 = vmax.f32 %v4156_v22, %v4172_v9 }
 0x316   :  { %4201 = vrot.lane.b32.xlu1 %v4191_v21, %s6966_s27  ;;  %v4179_v26 = vmax.f32 %v4154_v23, %v4170_v24 }
 0x318   :  { %v4192_v34 = vcombine.low %v4179_v26, %v4180_v25 }
 0x31a   :  { %4203 = vrot.lane.b32.xlu1 %v4192_v34, %s6966_s27  ;;  %v4266_v34 = vld [vmem:[%s8688_s5] sm:$0xff] }
 0x382   :  { %v4198_v38 = vpop.permute.xlu0 %4197 }
 0x383   :  { %v4209_v41 = vcombine.high %v4198_v38, %v4198_v38  ;;  %v4217_v42 = vmax.f32 %v8317_v61, %v4198_v38 }
 0x385   :  { %v4218_v43 = vmax.f32 %v8319_v62, %v4209_v41  ;;  %v4234_v44 = vadd.f32 %v5307_v37, %v4217_v42 }
 0x386   :  { %v4200_v45 = vpop.permute.xlu0 %4199 }
 0x387   :  { %v4235_v47 = vadd.f32 %v4232_v40, %v4218_v43  ;;  %v4242_v48 = vmax.f32 %v4234_v44, 0.0  ;;  %v4210_v49 = vcombine.high %v4200_v45, %v4200_v45  ;;  %v4219_v50 = vmax.f32 %v4175_v10, %v4200_v45 }
 0x388   :  { %v4202_v54 = vpop.permute.xlu1 %4201 }
 0x389   :  { %v4243_v51 = vmax.f32 %v4235_v47, 0.0  ;;  %4250 = vst [vmem:[#allocation6] sm:$0xf] %v4242_v48  ;;  %v4220_v52 = vmax.f32 %v4176_v11, %v4210_v49  ;;  %v4236_v53 = vadd.f32 %v5307_v37, %v4219_v50  ;;  %v4211_v55 = vcombine.high %v4202_v54, %v4202_v54 }
 0x38a   :  { %v4221_v57 = vmax.f32 %v4177_v17, %v4202_v54  ;;  %v6816_v50 = vpack.c.bf16 %v4267_v35, %v4266_v34  ;;  %v4269_v54 = vld [vmem:[%s8688_s5 + $0x18] sm:$0xff] }
 0x38b   :  { %4251 = vst [vmem:[#allocation6 + $0x4] sm:$0xf] %v4243_v51  ;;  %v4237_v58 = vadd.f32 %v4232_v40, %v4220_v52  ;;  %v4244_v59 = vmax.f32 %v4236_v53, 0.0  ;;  %v4222_v60 = vmax.f32 %v4178_v16, %v4211_v55  ;;  %v4268_v51 = vld [vmem:[%s8688_s5 + $0x10] sm:$0xff] }
 0x38c   :  { %v4238_v61 = vadd.f32 %v5307_v37, %v4221_v57  ;;  %v4204_v62 = vpop.permute.xlu1 %4203 }
 0x38d   :  { %v4245_v63 = vmax.f32 %v4237_v58, 0.0  ;;  %4252 = vst [vmem:[#allocation6 + $0x8] sm:$0xf] %v4244_v59  ;;  %v4239_v0 = vadd.f32 %v4232_v40, %v4222_v60  ;;  %v4212_v2 = vcombine.high %v4204_v62, %v4204_v62  ;;  %v4223_v3 = vmax.f32 %v4179_v26, %v4204_v62 }
 0x38e   :  { %v4246_v1 = vmax.f32 %v4238_v61, 0.0 }
 0x38f   :  { %4253 = vst [vmem:[#allocation6 + $0xc] sm:$0xf] %v4245_v63  ;;  %v4247_v4 = vmax.f32 %v4239_v0, 0.0  ;;  %v4224_v5 = vmax.f32 %v4180_v25, %v4212_v2  ;;  %v4240_v6 = vadd.f32 %v5307_v37, %v4223_v3 }
 0x390   :  { %4254 = vst [vmem:[#allocation6 + $0x10] sm:$0xf] %v4246_v1  ;;  %v4282_v14 = vld [vmem:[#allocation6 + $0x1] sm:$0x1]  ;;  %v4500_v23 = vld [vmem:[#allocation6 + $0x2] sm:$0x1] }
 0x391   :  { %4255 = vst [vmem:[#allocation6 + $0x14] sm:$0xf] %v4247_v4  ;;  %v4241_v7 = vadd.f32 %v4232_v40, %v4224_v5  ;;  %v4248_v8 = vmax.f32 %v4240_v6, 0.0  ;;  %v4619_v2 = vld [vmem:[#allocation6 + $0x3] sm:$0x1]  ;;  %v6819_v6 = vpack.c.bf16 %v4269_v54, %v4268_v51  ;;  %v4280_v51 = vld [vmem:[%s8688_s5 + $0x70] sm:$0xff] }
 0x392   :  { %v4283_v10 = vld [vmem:[#allocation6 + $0x5] sm:$0x1]  ;;  %v4501_v12 = vld [vmem:[#allocation6 + $0x6] sm:$0x1]  ;;  %v4620_v37 = vld [vmem:[#allocation6 + $0x7] sm:$0x1] }
 0x393   :  { %v4315_v11 = vrot.slane %v4283_v10, 7  ;;  %v4249_v13 = vmax.f32 %v4241_v7, 0.0  ;;  %4256 = vst [vmem:[#allocation6 + $0x18] sm:$0xf] %v4248_v8  ;;  %v4533_v56 = vrot.slane %v4501_v12, 7  ;;  %v4652_v62 = vrot.slane %v4620_v37, 7 }
 0x394   :  { %v4284_v15 = vld [vmem:[#allocation6 + $0x9] sm:$0x1]  ;;  %v4502_v18 = vld [vmem:[#allocation6 + $0xa] sm:$0x1]  ;;  %v4621_v47 = vld [vmem:[#allocation6 + $0xb] sm:$0x1] }
 0x395   :  { %v4317_v16 = vsel %vm4316_vm7, %v4315_v11, %v4282_v14  ;;  %v4318_v17 = vrot.slane %v4284_v15, 6  ;;  %4257 = vst [vmem:[#allocation6 + $0x1c] sm:$0xf] %v4249_v13  ;;  %v4534_v25 = vsel %vm4316_vm7, %v4533_v56, %v4500_v23  ;;  %v4535_v26 = vrot.slane %v4502_v18, 6  ;;  %v4270_v11 = vld [vmem:[%s8688_s5 + $0x20] sm:$0xff]  ;;  %v4271_v12 = vld [vmem:[%s8688_s5 + $0x28] sm:$0xff] }
 0x396   :  { %v4285_v19 = vld [vmem:[#allocation6 + $0xd] sm:$0x1]  ;;  %v4503_v20 = vld [vmem:[#allocation6 + $0xe] sm:$0x1]  ;;  %v4622_v52 = vld [vmem:[#allocation6 + $0xf] sm:$0x1]  ;;  %v4653_v8 = vsel %vm4316_vm7, %v4652_v62, %v4619_v2 }
 0x397   :  { %v4286_v21 = vld [vmem:[#allocation6 + $0x11] sm:$0x1]  ;;  %v4320_v22 = vsel %vm4319_vm8, %v4318_v17, %v4317_v16  ;;  %v4321_v9 = vrot.slane %v4285_v19, 5  ;;  %v4537_v29 = vrot.slane %v4503_v20, 5  ;;  %v4504_v30 = vld [vmem:[#allocation6 + $0x12] sm:$0x1]  ;;  %v4536_v46 = vsel %vm4319_vm8, %v4535_v26, %v4534_v25 }
 0x398   :  { %v4324_v24 = vrot.slane %v4286_v21, 4  ;;  %v4287_v27 = vld [vmem:[#allocation6 + $0x15] sm:$0x1]  ;;  %v4505_v41 = vld [vmem:[#allocation6 + $0x16] sm:$0x1]  ;;  %v4539_v55 = vrot.slane %v4504_v30, 4  ;;  %v6822_v19 = vpack.c.bf16 %v4271_v12, %v4270_v11 }
 0x399   :  { %v4323_v28 = vsel %vm4322_vm9, %v4321_v9, %v4320_v22  ;;  %v4327_v32 = vrot.slane %v4287_v27, 3  ;;  %v4538_v45 = vsel %vm4322_vm9, %v4537_v29, %v4536_v46  ;;  %v4623_v53 = vld [vmem:[#allocation6 + $0x13] sm:$0x1]  ;;  %v4541_v57 = vrot.slane %v4505_v41, 3  ;;  %v4624_v59 = vld [vmem:[#allocation6 + $0x17] sm:$0x1] }
 0x39a   :  { %v4326_v31 = vsel %vm4325_vm10, %v4324_v24, %v4323_v28  ;;  %v4288_v36 = vld [vmem:[#allocation6 + $0x19] sm:$0x1]  ;;  %v4506_v42 = vld [vmem:[#allocation6 + $0x1a] sm:$0x1]  ;;  %v4625_v63 = vld [vmem:[#allocation6 + $0x1b] sm:$0x1]  ;;  %v4540_v1 = vsel %vm4325_vm10, %v4539_v55, %v4538_v45 }
 0x39b   :  { %v4329_v38 = vsel %vm4328_vm11, %v4327_v32, %v4326_v31  ;;  %v4330_v40 = vrot.slane %v4288_v36, 2  ;;  %v4543_v58 = vrot.slane %v4506_v42, 2  ;;  %v4654_v0 = vrot.slane %v4621_v47, 6  ;;  %v4272_v21 = vld [vmem:[%s8688_s5 + $0x30] sm:$0xff]  ;;  %v4273_v22 = vld [vmem:[%s8688_s5 + $0x38] sm:$0xff]  ;;  %v4274_v28 = vld [vmem:[%s8688_s5 + $0x40] sm:$0xff] }
 0x39c   :  { %v4289_v43 = vld [vmem:[#allocation6 + $0x1d] sm:$0x1]  ;;  %v4507_v44 = vld [vmem:[#allocation6 + $0x1e] sm:$0x1]  ;;  %v4626_v3 = vld [vmem:[#allocation6 + $0x1f] sm:$0x1]  ;;  %v4542_v7 = vsel %vm4328_vm11, %v4541_v57, %v4540_v1  ;;  %v6825_v25 = vpack.c.bf16 %v4273_v22, %v4272_v21 }
 0x39d   :  { %v4332_v48 = vsel %vm4331_vm12, %v4330_v40, %v4329_v38  ;;  %v4333_v49 = vrot.slane %v4289_v43, 1  ;;  %v4545_v61 = vrot.slane %v4507_v44, 1  ;;  %v4656_v4 = vrot.slane %v4622_v52, 5  ;;  %v4259_v9 = vld [vmem:[#allocation6 + $0x4] sm:$0x1]  ;;  %v4275_v29 = vld [vmem:[%s8688_s5 + $0x48] sm:$0xff] }
 0x39e   :  { %v4658_v5 = vrot.slane %v4623_v53, 4  ;;  %v4660_v10 = vrot.slane %v4624_v59, 3  ;;  %v4544_v13 = vsel %vm4331_vm12, %v4543_v58, %v4542_v7  ;;  %v4655_v14 = vsel %vm4319_vm8, %v4654_v0, %v4653_v8  ;;  %v4260_v26 = vld [vmem:[#allocation6 + $0x8] sm:$0x1]  ;;  %v4258_v31 = vld [vmem:[#allocation6] sm:$0x1] }
 0x39f   :  { %v4335_v60 = vsel %vm4334_vm13, %v4333_v49, %v4332_v48  ;;  %v4662_v15 = vrot.slane %v4625_v63, 2  ;;  %v8408_v56 = vsel %vm4334_vm13, %v4545_v61, %v4544_v13  ;;  %v4657_v16 = vsel %vm4322_vm9, %v4656_v4, %v4655_v14  ;;  %v4261_v32 = vld [vmem:[#allocation6 + $0xc] sm:$0x1]  ;;  %v4276_v30 = vld [vmem:[%s8688_s5 + $0x50] sm:$0xff]  ;;  %v4277_v46 = vld [vmem:[%s8688_s5 + $0x58] sm:$0xff] }
 0x3a0   :  { %6446 = vmatmul.mubr.f32.vlgmr.msra.gmra.mrb[116].mxu1 %v4335_v60  ;;  %v4664_v17 = vrot.slane %v4626_v3, 1  ;;  %v4659_v18 = vsel %vm4325_vm10, %v4658_v5, %v4657_v16  ;;  %v4415_v27 = vrot.slane %v4259_v9, 7  ;;  %v4417_v34 = vrot.slane %v4260_v26, 6  ;;  %v4262_v37 = vld [vmem:[#allocation6 + $0x10] sm:$0x1]  ;;  %v4278_v42 = vld [vmem:[%s8688_s5 + $0x60] sm:$0xff] }
 0x3a1   :  { %6817 = vmatpush3.bf16.msra.mxu1 %v6816_v50  ;;  %6480 = vmatprep.mubr.msk.f32.mxu1 %vm6967_vm6, %v6968_v33  ;;  %v4661_v20 = vsel %vm4328_vm11, %v4660_v10, %v4659_v18  ;;  %v6828_v35 = vpack.c.bf16 %v4275_v29, %v4274_v28  ;;  %v4419_v38 = vrot.slane %v4261_v32, 5  ;;  %v6831_v41 = vpack.c.bf16 %v4277_v46, %v4276_v30  ;;  %v4279_v43 = vld [vmem:[%s8688_s5 + $0x68] sm:$0xff]  ;;  %v4263_v44 = vld [vmem:[#allocation6 + $0x14] sm:$0x1]  ;;  %v4264_v49 = vld [vmem:[#allocation6 + $0x18] sm:$0x1] }
 0x3a2   :  { %6818 = vmatprep.subr.bf16.mxu1 %v6965_v39  ;;  %v4663_v23 = vsel %vm4331_vm12, %v4662_v15, %v4661_v20  ;;  %v4416_v36 = vsel %vm4316_vm7, %v4415_v27, %v4258_v31  ;;  %v4421_v45 = vrot.slane %v4262_v37, 4  ;;  %v6834_v48 = vpack.c.bf16 %v4279_v43, %v4278_v42  ;;  %v4281_v52 = vld [vmem:[%s8688_s5 + $0x78] sm:$0xff]  ;;  %v5324_v59 = vld [vmem:[%s8688_s5 + $0x100] sm:$0xff]  ;;  %v5325_v60 = vld [vmem:[%s8688_s5 + $0x108] sm:$0xff] }
 0x3a3   :  { %v8422_v24 = vsel %vm4334_vm13, %v4664_v17, %v4663_v23  ;;  %v4418_v40 = vsel %vm4319_vm8, %v4417_v34, %v4416_v36  ;;  %v4423_v50 = vrot.slane %v4263_v44, 3  ;;  %v4265_v54 = vld [vmem:[#allocation6 + $0x1c] sm:$0x1]  ;;  %v4425_v55 = vrot.slane %v4264_v49, 2  ;;  %v5326_v0 = vld [vmem:[%s8688_s5 + $0x110] sm:$0xff]  ;;  %v5328_v4 = vld [vmem:[%s8688_s5 + $0x120] sm:$0xff] }
 0x3a4   :  { %v4420_v47 = vsel %vm4322_vm9, %v4419_v38, %v4418_v40  ;;  %v6837_v57 = vpack.c.bf16 %v4281_v52, %v4280_v51  ;;  %v4427_v61 = vrot.slane %v4265_v54, 1  ;;  %v6840_v62 = vpack.c.bf16 %v5325_v60, %v5324_v59  ;;  %v5327_v1 = vld [vmem:[%s8688_s5 + $0x118] sm:$0xff]  ;;  %v5329_v5 = vld [vmem:[%s8688_s5 + $0x128] sm:$0xff]  ;;  %v5330_v7 = vld [vmem:[%s8688_s5 + $0x130] sm:$0xff] }
 0x3a5   :  { %6820 = vmatpush3.bf16.msra.mxu1 %v6819_v6  ;;  %v4422_v53 = vsel %vm4325_vm10, %v4421_v45, %v4420_v47  ;;  %v6843_v3 = vpack.c.bf16 %v5327_v1, %v5326_v0  ;;  %v6846_v6 = vpack.c.bf16 %v5329_v5, %v5328_v4  ;;  %v5331_v8 = vld [vmem:[%s8688_s5 + $0x138] sm:$0xff]  ;;  %v5332_v11 = vld [vmem:[%s8688_s5 + $0x140] sm:$0xff]  ;;  %v5333_v12 = vld [vmem:[%s8688_s5 + $0x148] sm:$0xff] }
 0x3a6   :  { %6821 = vmatprep.subr.bf16.mxu1 %v6965_v39  ;;  %v4424_v58 = vsel %vm4328_vm11, %v4423_v50, %v4422_v53  ;;  %v6849_v10 = vpack.c.bf16 %v5331_v8, %v5330_v7  ;;  %v6852_v13 = vpack.c.bf16 %v5333_v12, %v5332_v11  ;;  %v5334_v14 = vld [vmem:[%s8688_s5 + $0x150] sm:$0xff]  ;;  %v5335_v15 = vld [vmem:[%s8688_s5 + $0x158] sm:$0xff]  ;;  %v5336_v17 = vld [vmem:[%s8688_s5 + $0x160] sm:$0xff] }
 0x3a7   :  { %v4426_v63 = vsel %vm4331_vm12, %v4425_v55, %v4424_v58  ;;  %v6855_v16 = vpack.c.bf16 %v5335_v15, %v5334_v14  ;;  %v5337_v18 = vld [vmem:[%s8688_s5 + $0x168] sm:$0xff]  ;;  %v5338_v20 = vld [vmem:[%s8688_s5 + $0x170] sm:$0xff]  ;;  %v5339_v21 = vld [vmem:[%s8688_s5 + $0x178] sm:$0xff] }
 0x3a8   :  { %v4428_v2 = vsel %vm4334_vm13, %v4427_v61, %v4426_v63  ;;  %v6861_v22 = vpack.c.bf16 %v5339_v21, %v5338_v20  ;;  %v5340_v9 = vld [vmem:[%s8688_s5 + $0x180] sm:$0xff]  ;;  %v5341_v23 = vld [vmem:[%s8688_s5 + $0x188] sm:$0xff]  ;;  %v5342_v26 = vld [vmem:[%s8688_s5 + $0x190] sm:$0xff] }
 0x3a9   :  { %6823 = vmatpush3.bf16.msra.mxu1 %v6822_v19  ;;  %v6858_v19 = vpack.c.bf16 %v5337_v18, %v5336_v17  ;;  %v5343_v27 = vld [vmem:[%s8688_s5 + $0x198] sm:$0xff]  ;;  %v5344_v29 = vld [vmem:[%s8688_s5 + $0x1a0] sm:$0xff]  ;;  %v5345_v31 = vld [vmem:[%s8688_s5 + $0x1a8] sm:$0xff] }
 0x3aa   :  { %6824 = vmatprep.subr.bf16.mxu1 %v6965_v39  ;;  %v6867_v28 = vpack.c.bf16 %v5343_v27, %v5342_v26  ;;  %v6870_v32 = vpack.c.bf16 %v5345_v31, %v5344_v29  ;;  %v5347_v34 = vld [vmem:[%s8688_s5 + $0x1b8] sm:$0xff]  ;;  %v5348_v36 = vld [vmem:[%s8688_s5 + $0x1c0] sm:$0xff]  ;;  %v5349_v30 = vld [vmem:[%s8688_s5 + $0x1c8] sm:$0xff] }
 0x3ab   :  { %v6876_v46 = vpack.c.bf16 %v5349_v30, %v5348_v36  ;;  %v5350_v37 = vld [vmem:[%s8688_s5 + $0x1d0] sm:$0xff]  ;;  %v5351_v38 = vld [vmem:[%s8688_s5 + $0x1d8] sm:$0xff]  ;;  %v5353_v42 = vld [vmem:[%s8688_s5 + $0x1e8] sm:$0xff] }
 0x3ac   :  { %v6879_v40 = vpack.c.bf16 %v5351_v38, %v5350_v37  ;;  %v5354_v44 = vld [vmem:[%s8688_s5 + $0x1f0] sm:$0xff]  ;;  %v5355_v45 = vld [vmem:[%s8688_s5 + $0x1f8] sm:$0xff]  ;;  %v4748_v49 = vld [vmem:[%s8690_s7 + $0x8] sm:$0xff] }
 0x3ad   :  { %6826 = vmatpush3.bf16.msra.mxu1 %v6825_v25  ;;  %v6864_v25 = vpack.c.bf16 %v5341_v23, %v5340_v9  ;;  %v6885_v47 = vpack.c.bf16 %v5355_v45, %v5354_v44  ;;  %v4749_v50 = vld [vmem:[%s8690_s7 + $0x10] sm:$0xff]  ;;  %v4751_v53 = vld [vmem:[%s8690_s7 + $0x20] sm:$0xff]  ;;  %v4752_v54 = vld [vmem:[%s8690_s7 + $0x28] sm:$0xff] }
 0x3ae   :  { %6827 = vmatprep.subr.bf16.mxu1 %v6965_v39  ;;  %v6894_v55 = vpack.c.bf16 %v4752_v54, %v4751_v53  ;;  %v4754_v58 = vld [vmem:[%s8690_s7 + $0x38] sm:$0xff]  ;;  %v4755_v60 = vld [vmem:[%s8690_s7 + $0x40] sm:$0xff]  ;;  %v4756_v61 = vld [vmem:[%s8690_s7 + $0x48] sm:$0xff] }
 0x3af   :  { %v6900_v63 = vpack.c.bf16 %v4756_v61, %v4755_v60  ;;  %v4758_v0 = vld [vmem:[%s8690_s7 + $0x58] sm:$0xff]  ;;  %v4844_v5 = vld [vmem:[%s8691_s9] sm:$0xff]  ;;  %v4846_v7 = vld [vmem:[%s8691_s9 + $0x10] sm:$0xff] }
 0x3b0   :  { %v4761_v8 = vld [vmem:[%s8690_s7 + $0x70] sm:$0xff]  ;;  %v4847_v11 = vld [vmem:[%s8691_s9 + $0x18] sm:$0xff]  ;;  %v4849_v14 = vld [vmem:[%s8691_s9 + $0x28] sm:$0xff] }
 0x3b1   :  { %6829 = vmatpush3.bf16.msra.mxu1 %v6828_v35  ;;  %v6912_v12 = vpack.c.bf16 %v4847_v11, %v4846_v7  ;;  %v4851_v17 = vld [vmem:[%s8691_s9 + $0x38] sm:$0xff]  ;;  %v4854_v36 = vld [vmem:[%s8691_s9 + $0x50] sm:$0xf]  ;;  %v5357_v30 = vld [vmem:[%s8693_s8] ss:$0 sm:$0xff] }
 0x3b2   :  { %6830 = vmatprep.subr.bf16.mxu1 %v6965_v39 }
 0x3b5   :  { %6832 = vmatpush3.bf16.msra.mxu1 %v6831_v41  ;;  %v5352_v41 = vld [vmem:[%s8688_s5 + $0x1e0] sm:$0xff] }
 0x3b6   :  { %6833 = vmatprep.subr.bf16.mxu1 %v6965_v39  ;;  %v6882_v43 = vpack.c.bf16 %v5353_v42, %v5352_v41 }
 0x3b9   :  { %6835 = vmatpush3.bf16.msra.mxu1 %v6834_v48  ;;  %v4747_v48 = vld [vmem:[%s8690_s7] sm:$0xff] }
 0x3ba   :  { %6836 = vmatprep.subr.bf16.mxu1 %v6965_v39  ;;  %v6888_v51 = vpack.c.bf16 %v4748_v49, %v4747_v48 }
 0x3bc   :  { %6889 = vmatpush3.bf16.msra.mxu0 %v6888_v51 }
 0x3bd   :  { %6838 = vmatpush3.bf16.msra.mxu1 %v6837_v57  ;;  %6890 = vmatprep.subr.bf16.mxu0 %v6965_v39  ;;  %v4753_v57 = vld [vmem:[%s8690_s7 + $0x30] sm:$0xff] }
 0x3be   :  { %6839 = vmatprep.subr.bf16.mxu1 %v6965_v39  ;;  %v6897_v59 = vpack.c.bf16 %v4754_v58, %v4753_v57 }
 0x3c0   :  { %6481 = vmatmul.mubr.f32.vlgmr.msra.gmra.mrb[118].mxu1 %v4428_v2  ;;  %v4759_v2 = vld [vmem:[%s8690_s7 + $0x60] sm:$0xff] }
 0x3c1   :  { %6841 = vmatpush3.bf16.msra.mxu1 %v6840_v62  ;;  %6515 = vmatprep.mubr.msk.f32.mxu1 %vm6967_vm6, %v6968_v33  ;;  %v4757_v62 = vld [vmem:[%s8690_s7 + $0x50] sm:$0xff] }
 0x3c2   :  { %6842 = vmatprep.subr.bf16.mxu1 %v6965_v39  ;;  %v6903_v1 = vpack.c.bf16 %v4758_v0, %v4757_v62 }
 0x3c5   :  { %6844 = vmatpush3.bf16.msra.mxu1 %v6843_v3  ;;  %v4760_v3 = vld [vmem:[%s8690_s7 + $0x68] sm:$0xff] }
 0x3c6   :  { %6845 = vmatprep.subr.bf16.mxu1 %v6965_v39  ;;  %v6906_v4 = vpack.c.bf16 %v4760_v3, %v4759_v2 }
 0x3c9   :  { %6847 = vmatpush3.bf16.msra.mxu1 %v6846_v6  ;;  %v4845_v6 = vld [vmem:[%s8691_s9 + $0x8] sm:$0xff] }
 0x3ca   :  { %6848 = vmatprep.subr.bf16.mxu1 %v6965_v39 }
 0x3cd   :  { %6850 = vmatpush3.bf16.msra.mxu1 %v6849_v10  ;;  %v6909_v10 = vpack.c.bf16 %v4845_v6, %v4844_v5 }
 0x3ce   :  { %6851 = vmatprep.subr.bf16.mxu1 %v6965_v39 }
 0x3d1   :  { %6853 = vmatpush3.bf16.msra.mxu1 %v6852_v13  ;;  %v4848_v13 = vld [vmem:[%s8691_s9 + $0x20] sm:$0xff] }
 0x3d2   :  { %6854 = vmatprep.subr.bf16.mxu1 %v6965_v39  ;;  %v6915_v15 = vpack.c.bf16 %v4849_v14, %v4848_v13 }
 0x3d5   :  { %6856 = vmatpush3.bf16.msra.mxu1 %v6855_v16  ;;  %v4850_v16 = vld [vmem:[%s8691_s9 + $0x30] sm:$0xff] }
 0x3d6   :  { %6857 = vmatprep.subr.bf16.mxu1 %v6965_v39  ;;  %v6918_v18 = vpack.c.bf16 %v4851_v17, %v4850_v16 }
 0x3d9   :  { %6859 = vmatpush3.bf16.msra.mxu1 %v6858_v19 }
 0x3da   :  { %6860 = vmatprep.subr.bf16.mxu1 %v6965_v39 }
 0x3dd   :  { %6862 = vmatpush3.bf16.msra.mxu1 %v6861_v22 }
 0x3de   :  { %6863 = vmatprep.subr.bf16.mxu1 %v6965_v39 }
 0x3e0   :  { %6516 = vmatmul.mubr.f32.vlgmr.msra.gmra.mrb[120].mxu1 %v8408_v56  ;;  %v5346_v56 = vld [vmem:[%s8688_s5 + $0x1b0] sm:$0xff] }
 0x3e1   :  { %6865 = vmatpush3.bf16.msra.mxu1 %v6864_v25  ;;  %6550 = vmatprep.mubr.msk.f32.mxu1 %vm6967_vm6, %v6968_v33  ;;  %v6873_v35 = vpack.c.bf16 %v5347_v34, %v5346_v56  ;;  %v4853_v34 = vld [vmem:[%s8691_s9 + $0x48] sm:$0xff] }
 0x3e2   :  { %6866 = vmatprep.subr.bf16.mxu1 %v6965_v39 }
 0x3e5   :  { %6868 = vmatpush3.bf16.msra.mxu1 %v6867_v28  ;;  %v5356_v28 = vld [vmem:[%s8692_s6] ss:$0 sm:$0xff] }
 0x3e6   :  { %6869 = vmatprep.subr.bf16.mxu1 %v6965_v39 }
 0x3e9   :  { %6871 = vmatpush3.bf16.msra.mxu1 %v6870_v32 }
 0x3ea   :  { %6872 = vmatprep.subr.bf16.mxu1 %v6965_v39 }
 0x3ed   :  { %6874 = vmatpush3.bf16.msra.mxu1 %v6873_v35 }
 0x3ee   :  { %6875 = vmatprep.subr.bf16.mxu1 %v6965_v39 }
 0x3f1   :  { %6877 = vmatpush3.bf16.msra.mxu1 %v6876_v46 }
 0x3f2   :  { %6878 = vmatprep.subr.bf16.mxu1 %v6965_v39 }
 0x3f5   :  { %6880 = vmatpush3.bf16.msra.mxu1 %v6879_v40 }
 0x3f6   :  { %6881 = vmatprep.subr.bf16.mxu1 %v6965_v39 }
 0x3f9   :  { %6883 = vmatpush3.bf16.msra.mxu1 %v6882_v43 }
 0x3fa   :  { %6884 = vmatprep.subr.bf16.mxu1 %v6965_v39 }
 0x3fd   :  { %6886 = vmatpush3.bf16.msra.mxu1 %v6885_v47 }
 0x3fe   :  { %6908 = vmatprep.subr.bf16.mxu1 %v6965_v39 }
 0x400   :  { %6551 = vmatmul.mubr.f32.vlgmr.msra.gmra.mrb[122].mxu1 %v8422_v24  ;;  %v4750_v24 = vld [vmem:[%s8690_s7 + $0x18] sm:$0xff] }
 0x401   :  { %6608 = vmatprep.mubr.msk.f32.mxu1 %vm6967_vm6, %v6968_v33  ;;  %v6891_v52 = vpack.c.bf16 %v4750_v24, %v4749_v50  ;;  %6910 = vmatpush3.bf16.msra.mxu1 %v6909_v10 }
 0x402   :  { %6911 = vmatprep.subr.bf16.mxu1 %v6965_v39 }
 0x403   :  { %6892 = vmatpush3.bf16.msra.mxu0 %v6891_v52 }
 0x404   :  { %6893 = vmatprep.subr.bf16.mxu0 %v6965_v39 }
 0x405   :  { %6913 = vmatpush3.bf16.msra.mxu1 %v6912_v12 }
 0x406   :  { %6914 = vmatprep.subr.bf16.mxu1 %v6965_v39 }
 0x407   :  { %6895 = vmatpush3.bf16.msra.mxu0 %v6894_v55 }
 0x408   :  { %6896 = vmatprep.subr.bf16.mxu0 %v6965_v39 }
 0x409   :  { %6916 = vmatpush3.bf16.msra.mxu1 %v6915_v15 }
 0x40a   :  { %6917 = vmatprep.subr.bf16.mxu1 %v6965_v39 }
 0x40b   :  { %6898 = vmatpush3.bf16.msra.mxu0 %v6897_v59 }
 0x40c   :  { %6899 = vmatprep.subr.bf16.mxu0 %v6965_v39 }
 0x40d   :  { %6919 = vmatpush3.bf16.msra.mxu1 %v6918_v18 }
 0x40e   :  { %6920 = vmatprep.subr.bf16.mxu1 %v6965_v39 }
 0x40f   :  { %6901 = vmatpush3.bf16.msra.mxu0 %v6900_v63 }
 0x410   :  { %6902 = vmatprep.subr.bf16.mxu0 %v6965_v39 }
 0x413   :  { %6904 = vmatpush3.bf16.msra.mxu0 %v6903_v1 }
 0x414   :  { %6905 = vmatprep.subr.bf16.mxu0 %v6965_v39  ;;  %v4852_v39 = vld [vmem:[%s8691_s9 + $0x40] sm:$0xff] }
 0x415   :  { %v6921_v35 = vpack.c.bf16 %v4853_v34, %v4852_v39 }
 0x417   :  { %6907 = vmatpush3.bf16.msra.mxu0 %v6906_v4  ;;  %6922 = vmatpush3.bf16.msra.mxu1 %v6921_v35 }
 0x418   :  { %6581 = vmatprep.subr.mxu0 %v6968_v33  ;;  %6606 = vmatprep.subr.mxu1 %v6968_v33  ;;  %v5359_v33 = vld [vmem:[%s8694_s10] ss:$0 sm:$0xff] }
 0x41b   :  { %6582 = vmatpush3.msra.mxu0 %v4761_v8  ;;  %6607 = vmatpush3.msk.msra.mxu1 %vm139_vm0, %v4854_v36 }
 0x473   :  { %v4403_v19 = vpop.f32.mrb[116].mxu1 }
 0x474   :  { %v6447_v20 = vpop.f32.mrb[117].mxu1 }
 0x493   :  { %v4496_v21 = vpop.f32.mrb[118].mxu1 }
 0x494   :  { %v4497_v22 = vadd.f32 %v4496_v21, %v4403_v19  ;;  %v6482_v9 = vpop.f32.mrb[119].mxu1 }
 0x4b3   :  { %v4614_v23 = vpop.f32.mrb[120].mxu1 }
 0x4b4   :  { %v4618_v25 = vadd.f32 %v4614_v23, %v4497_v22  ;;  %v6517_v26 = vpop.f32.mrb[121].mxu1 }
 0x4d3   :  { %v4733_v27 = vpop.f32.mrb[122].mxu1 }
 0x4d4   :  { %v4737_v29 = vadd.f32 %v4733_v27, %v4618_v25  ;;  %v6552_v31 = vpop.f32.mrb[123].mxu1 }
 0x4d6   :  { %v4745_v32 = vadd.f32 %v5356_v28, %v4737_v29 }
 0x4d8   :  { %v4746_v56 = vmax.f32 %v4745_v32, 0.0 }
 0x4da   :  { %6584 = vmatmul.mubr.msk.f32.vlgmr.msra.gmra.mrb[132].mxu0 %vm4769_vm14, %v4746_v56 }
 0x5ad   :  { %v4839_v46 = vpop.f32.mrb[132].mxu0 }
 0x5ae   :  { %v4840_v37 = vadd.f32 %v5357_v30, %v4839_v46  ;;  %v6585_v38 = vpop.f32.mrb[133].mxu0 }
 0x5b0   :  { %v4843_v40 = vmax.f32 %v4840_v37, 0.0 }
 0x5b2   :  { %6609 = vmatmul.mubr.msk.f32.vlgmr.msra.gmra.mrb[124].mxu1 %vm4862_vm15, %v4843_v40 }
 0x685   :  { %v4935_v41 = vpop.f32.mrb[124].mxu1 }
 0x686   :  { %v4936_v42 = vadd.f32 %v5359_v33, %v4935_v41  ;;  %v6610_v43 = vpop.f32.mrb[125].mxu1 }
 0x688   :  { %4939 = vst [vmem:[%s8695_s11] sm:$0xff] %v4936_v42 }

</bundles_post_ra>
